<compile_context>
chip_gen: v6e
topology: v6e:2x2x1
jax: 0.10.0
libtpu: 0.0.40
codegen_flags: <defaults>
</compile_context>

<pallas_src>
import functools

import jax
import jax.numpy as jnp
from jax import lax
from jax.experimental import pallas as pl
from jax.experimental.pallas import tpu as pltpu

LN_EPS = 1e-5          # PyTorch nn.LayerNorm default
NEG_SLOPE = 0.02       # LeakyReLU(0.02)

IN_PAD_TO = 64         # pad input features 51 -> 64 (inside the kernel)
TAIL_PAD = 128         # pad the 64->16 layer to 128 lanes (stays in registers)


def _round_up(n, m):
    return (n + m - 1) // m * m


def _leaky_relu(x):
    return jnp.where(x > 0, x, NEG_SLOPE * x)


def _layer_norm_1pass(x, gamma, beta):
    # Single-pass LayerNorm: E[x], E[x^2] reduced independently (f32).
    inv_n = 1.0 / x.shape[-1]
    s1 = jnp.sum(x, axis=-1, keepdims=True)
    s2 = jnp.sum(x * x, axis=-1, keepdims=True)
    mu = s1 * inv_n
    var = jnp.maximum(s2 * inv_n - mu * mu, 0.0)
    return (x - mu) * lax.rsqrt(var + LN_EPS) * gamma + beta


def _layer_norm_2pass(x, gamma, beta):
    mu = jnp.mean(x, axis=-1, keepdims=True)
    var = jnp.mean(jnp.square(x - mu), axis=-1, keepdims=True)
    return (x - mu) * lax.rsqrt(var + LN_EPS) * gamma + beta


def mlp_kernel(x_ref,
               w1, b1, g1, be1,
               w2, b2,
               w3, b3,
               w4, b4, g2, be2,
               w5, b5,
               w6v, b6,
               o_ref):
    # x_ref: (block_m, 51) f32 straight from HBM. Weights: bf16 MXU operands
    # (w6v is an f32 (1, 128) VPU vector). Biases / LN params: f32.
    x = x_ref[...]

    # Pad 51 -> 64 feature lanes in VMEM and cast the MXU operand to bf16.
    k_pad = w1.shape[0] - x.shape[1]
    if k_pad:
        x = jnp.concatenate(
            [x, jnp.zeros((x.shape[0], k_pad), x.dtype)], axis=-1)
    xb = x.astype(jnp.bfloat16)

    # Linear(51 -> 512) [K padded to 64] + LayerNorm(512) + LeakyReLU
    h = jnp.dot(xb, w1[...], preferred_element_type=jnp.float32) + b1[...]
    h = _leaky_relu(_layer_norm_1pass(h, g1[...], be1[...]))

    # Linear(512 -> 256) + LeakyReLU
    h = jnp.dot(h.astype(jnp.bfloat16), w2[...],
                preferred_element_type=jnp.float32) + b2[...]
    h = _leaky_relu(h)

    # Linear(256 -> 128) + LeakyReLU
    h = jnp.dot(h.astype(jnp.bfloat16), w3[...],
                preferred_element_type=jnp.float32) + b3[...]
    h = _leaky_relu(h)

    # Linear(128 -> 64) + LayerNorm(64) + LeakyReLU
    h = jnp.dot(h.astype(jnp.bfloat16), w4[...],
                preferred_element_type=jnp.float32) + b4[...]
    h = _leaky_relu(_layer_norm_1pass(h, g2[...], be2[...]))

    # Dropout(0.5): identity in eval/inference mode.
    # TODO(synk): add pltpu.prng_random_bits mask + 1/(1-p) scale for training.

    # Linear(64 -> 16), N padded to 128 lanes (padded cols are exactly 0);
    # result stays in registers, never written to HBM.
    h = jnp.dot(h.astype(jnp.bfloat16), w5[...],
                preferred_element_type=jnp.float32) + b5[...]
    h = _leaky_relu(h)

    # Linear(16 -> 1) on the VPU: broadcast-multiply + lane reduce (XLU).
    # No MXU push, no padded output slab; write a (block_m, 1) f32 column.
    y = jnp.sum(h * w6v[...], axis=-1, keepdims=True) + b6[...]
    o_ref[...] = y.astype(o_ref.dtype)


def init_params(key, in_dim=51):
    """Deterministic PyTorch-style (uniform +-1/sqrt(fan_in)) init, unpadded f32."""
    dims = [in_dim, 512, 256, 128, 64, 16, 1]
    params = {}
    keys = jax.random.split(key, 2 * (len(dims) - 1))
    for li in range(len(dims) - 1):
        fan_in, fan_out = dims[li], dims[li + 1]
        bound = 1.0 / jnp.sqrt(jnp.float32(fan_in))
        params[f"w{li+1}"] = jax.random.uniform(
            keys[2 * li], (fan_in, fan_out), jnp.float32, -bound, bound)
        params[f"b{li+1}"] = jax.random.uniform(
            keys[2 * li + 1], (1, fan_out), jnp.float32, -bound, bound)
    # LayerNorm affine params (gamma=1, beta=0)
    params["g1"] = jnp.ones((1, 512), jnp.float32)
    params["be1"] = jnp.zeros((1, 512), jnp.float32)
    params["g2"] = jnp.ones((1, 64), jnp.float32)
    params["be2"] = jnp.zeros((1, 64), jnp.float32)
    return params


def prepare_params(params):
    """One-time pack: pad + cast weights (bf16 MXU operands, f32 bias/LN/VPU).

    Call once outside the hot path; re-padding/casting per forward call is
    avoidable HBM churn + extra XLA launches.
    """
    in_dim = params["w1"].shape[0]
    in_pad = _round_up(max(in_dim, IN_PAD_TO), 64)

    w1 = jnp.pad(params["w1"], ((0, in_pad - in_dim), (0, 0))).astype(jnp.bfloat16)
    w2 = params["w2"].astype(jnp.bfloat16)
    w3 = params["w3"].astype(jnp.bfloat16)
    w4 = params["w4"].astype(jnp.bfloat16)
    w5 = jnp.pad(params["w5"],
                 ((0, 0), (0, TAIL_PAD - params["w5"].shape[1]))).astype(jnp.bfloat16)
    b5 = jnp.pad(params["b5"], ((0, 0), (0, TAIL_PAD - params["b5"].shape[1])))
    # Final 16->1 layer as a (1, 128) f32 VPU vector (zeros beyond lane 15).
    w6v = jnp.pad(params["w6"][:, 0:1].T,
                  ((0, 0), (0, TAIL_PAD - params["w6"].shape[0])))
    b6 = params["b6"]  # (1, 1)

    return (
        w1, params["b1"], params["g1"], params["be1"],
        w2, params["b2"],
        w3, params["b3"],
        w4, params["b4"], params["g2"], params["be2"],
        w5, b5,
        w6v, b6,
    )


@functools.partial(jax.jit, static_argnames=("block_m",))
def fully_connected_forward(x, packed, *, block_m=512):
    """x: (batch, in_dim) f32. packed: output of prepare_params. Returns (batch, 1)."""
    batch, in_dim = x.shape

    # Clamp block_m for small batches; otherwise keep it (must be 8-aligned).
    # v7x: prefer block_m such that n_blocks is even and >= ~6; v5e/v6e: keep
    # n_blocks >= 3 so the BlockSpec pipeline can double-buffer.
    if batch <= block_m:
        block_m = batch
    else:
        assert block_m % 8 == 0, "block_m must be a multiple of 8"
    n_blocks = pl.cdiv(batch, block_m)   # ragged last block handled by Pallas
                                         # (OOB reads garbage, OOB writes dropped;
                                         #  rows are independent so this is safe).

    def _resident(arr):
        # Grid-invariant parameter: whole tensor resident in VMEM (constant
        # index map -> fetched once). ~0.5 MiB total in bf16; the default
        # double-buffer reservation is harmless at these block_m values
        # (use pipeline_mode=pl.Buffered(1) here only when pushing block_m
        # toward v7x's 32 MiB scoped VMEM limit).
        return pl.BlockSpec(arr.shape, lambda i: (0,) * arr.ndim)

    grid_spec = pl.GridSpec(
        grid=(n_blocks,),
        in_specs=[pl.BlockSpec((block_m, in_dim), lambda i: (i, 0))]
                 + [_resident(a) for a in packed],
        out_specs=pl.BlockSpec((block_m, 1), lambda i: (i, 0)),
    )

    out = pl.pallas_call(
        mlp_kernel,
        out_shape=jax.ShapeDtypeStruct((batch, 1), jnp.float32),
        grid_spec=grid_spec,
        compiler_params=pltpu.CompilerParams(
            dimension_semantics=("parallel",)),
    )(x, *packed)

    return out.astype(x.dtype)


def reference_forward(x, params):
    """Plain-JAX f32 reference (matches the PyTorch module in eval mode)."""
    h = x @ params["w1"] + params["b1"]
    h = _leaky_relu(_layer_norm_2pass(h, params["g1"], params["be1"]))
    h = _leaky_relu(h @ params["w2"] + params["b2"])
    h = _leaky_relu(h @ params["w3"] + params["b3"])
    h = h @ params["w4"] + params["b4"]
    h = _leaky_relu(_layer_norm_2pass(h, params["g2"], params["be2"]))
    h = _leaky_relu(h @ params["w5"] + params["b5"])
    return h @ params["w6"] + params["b6"]


if __name__ == "__main__":
    key = jax.random.PRNGKey(0)
    pkey, xkey = jax.random.split(key)

    in_dim = 51
    batch = 300            # block_m=128 -> grid=(3,), ragged last block exercised
    params = init_params(pkey, in_dim=in_dim)
    packed = prepare_params(params)            # one-time pad/cast, outside jit
    x = jax.random.normal(xkey, (batch, in_dim), jnp.float32)

    out = fully_connected_forward(x, packed, block_m=128)
    jax.block_until_ready(out)
    assert out.shape == (batch, 1)

    ref = reference_forward(x, params)
    err = float(jnp.max(jnp.abs(out - ref)))
    assert jnp.allclose(out, ref, atol=1e-1, rtol=1e-1), err

    print("KERNEL_OK")
</pallas_src>

<mosaic_0001>
module attributes {stable_mosaic.version = 11 : i64} {
  func.func @mlp_kernel(%arg0: i32, %arg1: memref<128x51xf32, #tpu.memory_space<vmem>>, %arg2: memref<64x512xbf16, #tpu.memory_space<vmem>>, %arg3: memref<1x512xf32, #tpu.memory_space<vmem>>, %arg4: memref<1x512xf32, #tpu.memory_space<vmem>>, %arg5: memref<1x512xf32, #tpu.memory_space<vmem>>, %arg6: memref<512x256xbf16, #tpu.memory_space<vmem>>, %arg7: memref<1x256xf32, #tpu.memory_space<vmem>>, %arg8: memref<256x128xbf16, #tpu.memory_space<vmem>>, %arg9: memref<1x128xf32, #tpu.memory_space<vmem>>, %arg10: memref<128x64xbf16, #tpu.memory_space<vmem>>, %arg11: memref<1x64xf32, #tpu.memory_space<vmem>>, %arg12: memref<1x64xf32, #tpu.memory_space<vmem>>, %arg13: memref<1x64xf32, #tpu.memory_space<vmem>>, %arg14: memref<64x128xbf16, #tpu.memory_space<vmem>>, %arg15: memref<1x128xf32, #tpu.memory_space<vmem>>, %arg16: memref<1x128xf32, #tpu.memory_space<vmem>>, %arg17: memref<1x1xf32, #tpu.memory_space<vmem>>, %arg18: memref<128x1xf32, #tpu.memory_space<vmem>>) attributes {dimension_semantics = [#tpu.dimension_semantics<parallel>], iteration_bounds = array<i64: 3>, scalar_prefetch = 0 : i64, scratch_operands = 0 : i64, tpu.core_type = #tpu.core_type<tc>, window_params = [{transform_indices = @transform_0, window_bounds = array<i64: 128, 51>}, {pipeline_mode = #tpu.pipeline_mode<synchronous>, transform_indices = @transform_1, window_bounds = array<i64: 64, 512>}, {pipeline_mode = #tpu.pipeline_mode<synchronous>, transform_indices = @transform_2, window_bounds = array<i64: 1, 512>}, {pipeline_mode = #tpu.pipeline_mode<synchronous>, transform_indices = @transform_3, window_bounds = array<i64: 1, 512>}, {pipeline_mode = #tpu.pipeline_mode<synchronous>, transform_indices = @transform_4, window_bounds = array<i64: 1, 512>}, {pipeline_mode = #tpu.pipeline_mode<synchronous>, transform_indices = @transform_5, window_bounds = array<i64: 512, 256>}, {pipeline_mode = #tpu.pipeline_mode<synchronous>, transform_indices = @transform_6, window_bounds = array<i64: 1, 256>}, {pipeline_mode = #tpu.pipeline_mode<synchronous>, transform_indices = @transform_7, window_bounds = array<i64: 256, 128>}, {pipeline_mode = #tpu.pipeline_mode<synchronous>, transform_indices = @transform_8, window_bounds = array<i64: 1, 128>}, {pipeline_mode = #tpu.pipeline_mode<synchronous>, transform_indices = @transform_9, window_bounds = array<i64: 128, 64>}, {pipeline_mode = #tpu.pipeline_mode<synchronous>, transform_indices = @transform_10, window_bounds = array<i64: 1, 64>}, {pipeline_mode = #tpu.pipeline_mode<synchronous>, transform_indices = @transform_11, window_bounds = array<i64: 1, 64>}, {pipeline_mode = #tpu.pipeline_mode<synchronous>, transform_indices = @transform_12, window_bounds = array<i64: 1, 64>}, {pipeline_mode = #tpu.pipeline_mode<synchronous>, transform_indices = @transform_13, window_bounds = array<i64: 64, 128>}, {pipeline_mode = #tpu.pipeline_mode<synchronous>, transform_indices = @transform_14, window_bounds = array<i64: 1, 128>}, {pipeline_mode = #tpu.pipeline_mode<synchronous>, transform_indices = @transform_15, window_bounds = array<i64: 1, 128>}, {pipeline_mode = #tpu.pipeline_mode<synchronous>, transform_indices = @transform_16, window_bounds = array<i64: 1, 1>}, {transform_indices = @transform_17, window_bounds = array<i64: 128, 1>}]} {
    %c0 = arith.constant 0 : index
    %c0_0 = arith.constant 0 : index
    %0 = vector.load %arg1[%c0, %c0_0] : memref<128x51xf32, #tpu.memory_space<vmem>>, vector<128x51xf32>
    %cst = arith.constant 0.000000e+00 : f32
    %1 = vector.broadcast %cst : f32 to vector<128x13xf32>
    %2 = tpu.concatenate %0, %1 in 1 : vector<128x51xf32>, vector<128x13xf32> -> vector<128x64xf32>
    %3 = arith.truncf %2 : vector<128x64xf32> to vector<128x64xbf16>
    %c0_1 = arith.constant 0 : index
    %c0_2 = arith.constant 0 : index
    %4 = vector.load %arg2[%c0_1, %c0_2] : memref<64x512xbf16, #tpu.memory_space<vmem>>, vector<64x512xbf16>
    %cst_3 = arith.constant dense<0.000000e+00> : vector<128x512xf32>
    %5 = tpu.matmul %3, %4, %cst_3 {dimension_numbers = #tpu.dot_dimension_numbers<[1], [0], [0], [1], [0, 0, 1, 1], [], []>} : vector<128x64xbf16>, vector<64x512xbf16>, vector<128x512xf32> -> vector<128x512xf32>
    %c0_4 = arith.constant 0 : index
    %c0_5 = arith.constant 0 : index
    %6 = vector.load %arg3[%c0_4, %c0_5] : memref<1x512xf32, #tpu.memory_space<vmem>>, vector<1x512xf32>
    %7 = vector.broadcast %6 : vector<1x512xf32> to vector<128x512xf32>
    %8 = arith.addf %5, %7 : vector<128x512xf32>
    %c0_6 = arith.constant 0 : index
    %c0_7 = arith.constant 0 : index
    %9 = vector.load %arg4[%c0_6, %c0_7] : memref<1x512xf32, #tpu.memory_space<vmem>>, vector<1x512xf32>
    %c0_8 = arith.constant 0 : index
    %c0_9 = arith.constant 0 : index
    %10 = vector.load %arg5[%c0_8, %c0_9] : memref<1x512xf32, #tpu.memory_space<vmem>>, vector<1x512xf32>
    %cst_10 = arith.constant dense<0.000000e+00> : vector<128xf32>
    %11 = vector.multi_reduction <add>, %8, %cst_10 [1] : vector<128x512xf32> to vector<128xf32>
    %12 = vector.shape_cast %11 : vector<128xf32> to vector<128x1xf32>
    %13 = arith.mulf %8, %8 : vector<128x512xf32>
    %cst_11 = arith.constant dense<0.000000e+00> : vector<128xf32>
    %14 = vector.multi_reduction <add>, %13, %cst_11 [1] : vector<128x512xf32> to vector<128xf32>
    %15 = vector.shape_cast %14 : vector<128xf32> to vector<128x1xf32>
    %cst_12 = arith.constant 0.001953125 : f32
    %16 = vector.broadcast %cst_12 : f32 to vector<128x1xf32>
    %17 = arith.mulf %12, %16 : vector<128x1xf32>
    %cst_13 = arith.constant 0.001953125 : f32
    %18 = vector.broadcast %cst_13 : f32 to vector<128x1xf32>
    %19 = arith.mulf %15, %18 : vector<128x1xf32>
    %20 = arith.mulf %17, %17 : vector<128x1xf32>
    %21 = arith.subf %19, %20 : vector<128x1xf32>
    %cst_14 = arith.constant 0.000000e+00 : f32
    %22 = vector.broadcast %cst_14 : f32 to vector<128x1xf32>
    %23 = arith.maximumf %21, %22 : vector<128x1xf32>
    %24 = vector.broadcast %17 : vector<128x1xf32> to vector<128x512xf32>
    %25 = arith.subf %8, %24 : vector<128x512xf32>
    %cst_15 = arith.constant 9.99999974E-6 : f32
    %26 = vector.broadcast %cst_15 : f32 to vector<128x1xf32>
    %27 = arith.addf %23, %26 : vector<128x1xf32>
    %28 = math.rsqrt %27 : vector<128x1xf32>
    %29 = vector.broadcast %28 : vector<128x1xf32> to vector<128x512xf32>
    %30 = arith.mulf %25, %29 : vector<128x512xf32>
    %31 = vector.broadcast %9 : vector<1x512xf32> to vector<128x512xf32>
    %32 = arith.mulf %30, %31 : vector<128x512xf32>
    %33 = vector.broadcast %10 : vector<1x512xf32> to vector<128x512xf32>
    %34 = arith.addf %32, %33 : vector<128x512xf32>
    %cst_16 = arith.constant 0.000000e+00 : f32
    %35 = vector.broadcast %cst_16 : f32 to vector<128x512xf32>
    %36 = arith.cmpf ogt, %34, %35 : vector<128x512xf32>
    %cst_17 = arith.constant 2.000000e-02 : f32
    %37 = vector.broadcast %cst_17 : f32 to vector<128x512xf32>
    %38 = arith.mulf %37, %34 : vector<128x512xf32>
    %39 = arith.select %36, %34, %38 : vector<128x512xi1>, vector<128x512xf32>
    %40 = arith.truncf %39 : vector<128x512xf32> to vector<128x512xbf16>
    %c0_18 = arith.constant 0 : index
    %c0_19 = arith.constant 0 : index
    %41 = vector.load %arg6[%c0_18, %c0_19] : memref<512x256xbf16, #tpu.memory_space<vmem>>, vector<512x256xbf16>
    %cst_20 = arith.constant dense<0.000000e+00> : vector<128x256xf32>
    %42 = tpu.matmul %40, %41, %cst_20 {dimension_numbers = #tpu.dot_dimension_numbers<[1], [0], [0], [1], [0, 0, 1, 1], [], []>} : vector<128x512xbf16>, vector<512x256xbf16>, vector<128x256xf32> -> vector<128x256xf32>
    %c0_21 = arith.constant 0 : index
    %c0_22 = arith.constant 0 : index
    %43 = vector.load %arg7[%c0_21, %c0_22] : memref<1x256xf32, #tpu.memory_space<vmem>>, vector<1x256xf32>
    %44 = vector.broadcast %43 : vector<1x256xf32> to vector<128x256xf32>
    %45 = arith.addf %42, %44 : vector<128x256xf32>
    %cst_23 = arith.constant 0.000000e+00 : f32
    %46 = vector.broadcast %cst_23 : f32 to vector<128x256xf32>
    %47 = arith.cmpf ogt, %45, %46 : vector<128x256xf32>
    %cst_24 = arith.constant 2.000000e-02 : f32
    %48 = vector.broadcast %cst_24 : f32 to vector<128x256xf32>
    %49 = arith.mulf %48, %45 : vector<128x256xf32>
    %50 = arith.select %47, %45, %49 : vector<128x256xi1>, vector<128x256xf32>
    %51 = arith.truncf %50 : vector<128x256xf32> to vector<128x256xbf16>
    %c0_25 = arith.constant 0 : index
    %c0_26 = arith.constant 0 : index
    %52 = vector.load %arg8[%c0_25, %c0_26] : memref<256x128xbf16, #tpu.memory_space<vmem>>, vector<256x128xbf16>
    %cst_27 = arith.constant dense<0.000000e+00> : vector<128x128xf32>
    %53 = tpu.matmul %51, %52, %cst_27 {dimension_numbers = #tpu.dot_dimension_numbers<[1], [0], [0], [1], [0, 0, 1, 1], [], []>} : vector<128x256xbf16>, vector<256x128xbf16>, vector<128x128xf32> -> vector<128x128xf32>
    %c0_28 = arith.constant 0 : index
    %c0_29 = arith.constant 0 : index
    %54 = vector.load %arg9[%c0_28, %c0_29] : memref<1x128xf32, #tpu.memory_space<vmem>>, vector<1x128xf32>
    %55 = vector.broadcast %54 : vector<1x128xf32> to vector<128x128xf32>
    %56 = arith.addf %53, %55 : vector<128x128xf32>
    %cst_30 = arith.constant 0.000000e+00 : f32
    %57 = vector.broadcast %cst_30 : f32 to vector<128x128xf32>
    %58 = arith.cmpf ogt, %56, %57 : vector<128x128xf32>
    %cst_31 = arith.constant 2.000000e-02 : f32
    %59 = vector.broadcast %cst_31 : f32 to vector<128x128xf32>
    %60 = arith.mulf %59, %56 : vector<128x128xf32>
    %61 = arith.select %58, %56, %60 : vector<128x128xi1>, vector<128x128xf32>
    %62 = arith.truncf %61 : vector<128x128xf32> to vector<128x128xbf16>
    %c0_32 = arith.constant 0 : index
    %c0_33 = arith.constant 0 : index
    %63 = vector.load %arg10[%c0_32, %c0_33] : memref<128x64xbf16, #tpu.memory_space<vmem>>, vector<128x64xbf16>
    %cst_34 = arith.constant dense<0.000000e+00> : vector<128x64xf32>
    %64 = tpu.matmul %62, %63, %cst_34 {dimension_numbers = #tpu.dot_dimension_numbers<[1], [0], [0], [1], [0, 0, 1, 1], [], []>} : vector<128x128xbf16>, vector<128x64xbf16>, vector<128x64xf32> -> vector<128x64xf32>
    %c0_35 = arith.constant 0 : index
    %c0_36 = arith.constant 0 : index
    %65 = vector.load %arg11[%c0_35, %c0_36] : memref<1x64xf32, #tpu.memory_space<vmem>>, vector<1x64xf32>
    %66 = vector.broadcast %65 : vector<1x64xf32> to vector<128x64xf32>
    %67 = arith.addf %64, %66 : vector<128x64xf32>
    %c0_37 = arith.constant 0 : index
    %c0_38 = arith.constant 0 : index
    %68 = vector.load %arg12[%c0_37, %c0_38] : memref<1x64xf32, #tpu.memory_space<vmem>>, vector<1x64xf32>
    %c0_39 = arith.constant 0 : index
    %c0_40 = arith.constant 0 : index
    %69 = vector.load %arg13[%c0_39, %c0_40] : memref<1x64xf32, #tpu.memory_space<vmem>>, vector<1x64xf32>
    %cst_41 = arith.constant dense<0.000000e+00> : vector<128xf32>
    %70 = vector.multi_reduction <add>, %67, %cst_41 [1] : vector<128x64xf32> to vector<128xf32>
    %71 = vector.shape_cast %70 : vector<128xf32> to vector<128x1xf32>
    %72 = arith.mulf %67, %67 : vector<128x64xf32>
    %cst_42 = arith.constant dense<0.000000e+00> : vector<128xf32>
    %73 = vector.multi_reduction <add>, %72, %cst_42 [1] : vector<128x64xf32> to vector<128xf32>
    %74 = vector.shape_cast %73 : vector<128xf32> to vector<128x1xf32>
    %cst_43 = arith.constant 1.562500e-02 : f32
    %75 = vector.broadcast %cst_43 : f32 to vector<128x1xf32>
    %76 = arith.mulf %71, %75 : vector<128x1xf32>
    %cst_44 = arith.constant 1.562500e-02 : f32
    %77 = vector.broadcast %cst_44 : f32 to vector<128x1xf32>
    %78 = arith.mulf %74, %77 : vector<128x1xf32>
    %79 = arith.mulf %76, %76 : vector<128x1xf32>
    %80 = arith.subf %78, %79 : vector<128x1xf32>
    %cst_45 = arith.constant 0.000000e+00 : f32
    %81 = vector.broadcast %cst_45 : f32 to vector<128x1xf32>
    %82 = arith.maximumf %80, %81 : vector<128x1xf32>
    %83 = vector.broadcast %76 : vector<128x1xf32> to vector<128x64xf32>
    %84 = arith.subf %67, %83 : vector<128x64xf32>
    %cst_46 = arith.constant 9.99999974E-6 : f32
    %85 = vector.broadcast %cst_46 : f32 to vector<128x1xf32>
    %86 = arith.addf %82, %85 : vector<128x1xf32>
    %87 = math.rsqrt %86 : vector<128x1xf32>
    %88 = vector.broadcast %87 : vector<128x1xf32> to vector<128x64xf32>
    %89 = arith.mulf %84, %88 : vector<128x64xf32>
    %90 = vector.broadcast %68 : vector<1x64xf32> to vector<128x64xf32>
    %91 = arith.mulf %89, %90 : vector<128x64xf32>
    %92 = vector.broadcast %69 : vector<1x64xf32> to vector<128x64xf32>
    %93 = arith.addf %91, %92 : vector<128x64xf32>
    %cst_47 = arith.constant 0.000000e+00 : f32
    %94 = vector.broadcast %cst_47 : f32 to vector<128x64xf32>
    %95 = arith.cmpf ogt, %93, %94 : vector<128x64xf32>
    %cst_48 = arith.constant 2.000000e-02 : f32
    %96 = vector.broadcast %cst_48 : f32 to vector<128x64xf32>
    %97 = arith.mulf %96, %93 : vector<128x64xf32>
    %98 = arith.select %95, %93, %97 : vector<128x64xi1>, vector<128x64xf32>
    %99 = arith.truncf %98 : vector<128x64xf32> to vector<128x64xbf16>
    %c0_49 = arith.constant 0 : index
    %c0_50 = arith.constant 0 : index
    %100 = vector.load %arg14[%c0_49, %c0_50] : memref<64x128xbf16, #tpu.memory_space<vmem>>, vector<64x128xbf16>
    %cst_51 = arith.constant dense<0.000000e+00> : vector<128x128xf32>
    %101 = tpu.matmul %99, %100, %cst_51 {dimension_numbers = #tpu.dot_dimension_numbers<[1], [0], [0], [1], [0, 0, 1, 1], [], []>} : vector<128x64xbf16>, vector<64x128xbf16>, vector<128x128xf32> -> vector<128x128xf32>
    %c0_52 = arith.constant 0 : index
    %c0_53 = arith.constant 0 : index
    %102 = vector.load %arg15[%c0_52, %c0_53] : memref<1x128xf32, #tpu.memory_space<vmem>>, vector<1x128xf32>
    %103 = vector.broadcast %102 : vector<1x128xf32> to vector<128x128xf32>
    %104 = arith.addf %101, %103 : vector<128x128xf32>
    %cst_54 = arith.constant 0.000000e+00 : f32
    %105 = vector.broadcast %cst_54 : f32 to vector<128x128xf32>
    %106 = arith.cmpf ogt, %104, %105 : vector<128x128xf32>
    %cst_55 = arith.constant 2.000000e-02 : f32
    %107 = vector.broadcast %cst_55 : f32 to vector<128x128xf32>
    %108 = arith.mulf %107, %104 : vector<128x128xf32>
    %109 = arith.select %106, %104, %108 : vector<128x128xi1>, vector<128x128xf32>
    %c0_56 = arith.constant 0 : index
    %c0_57 = arith.constant 0 : index
    %110 = vector.load %arg16[%c0_56, %c0_57] : memref<1x128xf32, #tpu.memory_space<vmem>>, vector<1x128xf32>
    %111 = vector.broadcast %110 : vector<1x128xf32> to vector<128x128xf32>
    %112 = arith.mulf %109, %111 : vector<128x128xf32>
    %cst_58 = arith.constant dense<0.000000e+00> : vector<128xf32>
    %113 = vector.multi_reduction <add>, %112, %cst_58 [1] : vector<128x128xf32> to vector<128xf32>
    %114 = vector.shape_cast %113 : vector<128xf32> to vector<128x1xf32>
    %c0_59 = arith.constant 0 : index
    %c0_60 = arith.constant 0 : index
    %115 = vector.load %arg17[%c0_59, %c0_60] : memref<1x1xf32, #tpu.memory_space<vmem>>, vector<1x1xf32>
    %116 = vector.broadcast %115 : vector<1x1xf32> to vector<128x1xf32>
    %117 = arith.addf %114, %116 : vector<128x1xf32>
    %c0_61 = arith.constant 0 : index
    %c0_62 = arith.constant 0 : index
    %118 = vector.load %arg18[%c0_61, %c0_62] : memref<128x1xf32, #tpu.memory_space<vmem>>, vector<128x1xf32>
    tpu.vector_store %arg18[%c0_61, %c0_62], %117 {strides = array<i32>} : memref<128x1xf32, #tpu.memory_space<vmem>>, vector<128x1xf32>,
    return
  }
  func.func @transform_0(%arg0: i32) -> (i32, i32) {
    %c0_i32 = arith.constant 0 : i32
    %c0_i32_0 = arith.constant 0 : i32
    return %arg0, %c0_i32 : i32, i32
  }
  func.func @transform_1(%arg0: i32) -> (i32, i32) {
    %c0_i32 = arith.constant 0 : i32
    %c0_i32_0 = arith.constant 0 : i32
    %c0_i32_1 = arith.constant 0 : i32
    return %c0_i32, %c0_i32_0 : i32, i32
  }
  func.func @transform_2(%arg0: i32) -> (i32, i32) {
    %c0_i32 = arith.constant 0 : i32
    %c0_i32_0 = arith.constant 0 : i32
    %c0_i32_1 = arith.constant 0 : i32
    return %c0_i32, %c0_i32_0 : i32, i32
  }
  func.func @transform_3(%arg0: i32) -> (i32, i32) {
    %c0_i32 = arith.constant 0 : i32
    %c0_i32_0 = arith.constant 0 : i32
    %c0_i32_1 = arith.constant 0 : i32
    return %c0_i32, %c0_i32_0 : i32, i32
  }
  func.func @transform_4(%arg0: i32) -> (i32, i32) {
    %c0_i32 = arith.constant 0 : i32
    %c0_i32_0 = arith.constant 0 : i32
    %c0_i32_1 = arith.constant 0 : i32
    return %c0_i32, %c0_i32_0 : i32, i32
  }
  func.func @transform_5(%arg0: i32) -> (i32, i32) {
    %c0_i32 = arith.constant 0 : i32
    %c0_i32_0 = arith.constant 0 : i32
    %c0_i32_1 = arith.constant 0 : i32
    return %c0_i32, %c0_i32_0 : i32, i32
  }
  func.func @transform_6(%arg0: i32) -> (i32, i32) {
    %c0_i32 = arith.constant 0 : i32
    %c0_i32_0 = arith.constant 0 : i32
    %c0_i32_1 = arith.constant 0 : i32
    return %c0_i32, %c0_i32_0 : i32, i32
  }
  func.func @transform_7(%arg0: i32) -> (i32, i32) {
    %c0_i32 = arith.constant 0 : i32
    %c0_i32_0 = arith.constant 0 : i32
    %c0_i32_1 = arith.constant 0 : i32
    return %c0_i32, %c0_i32_0 : i32, i32
  }
  func.func @transform_8(%arg0: i32) -> (i32, i32) {
    %c0_i32 = arith.constant 0 : i32
    %c0_i32_0 = arith.constant 0 : i32
    %c0_i32_1 = arith.constant 0 : i32
    return %c0_i32, %c0_i32_0 : i32, i32
  }
  func.func @transform_9(%arg0: i32) -> (i32, i32) {
    %c0_i32 = arith.constant 0 : i32
    %c0_i32_0 = arith.constant 0 : i32
    %c0_i32_1 = arith.constant 0 : i32
    return %c0_i32, %c0_i32_0 : i32, i32
  }
  func.func @transform_10(%arg0: i32) -> (i32, i32) {
    %c0_i32 = arith.constant 0 : i32
    %c0_i32_0 = arith.constant 0 : i32
    %c0_i32_1 = arith.constant 0 : i32
    return %c0_i32, %c0_i32_0 : i32, i32
  }
  func.func @transform_11(%arg0: i32) -> (i32, i32) {
    %c0_i32 = arith.constant 0 : i32
    %c0_i32_0 = arith.constant 0 : i32
    %c0_i32_1 = arith.constant 0 : i32
    return %c0_i32, %c0_i32_0 : i32, i32
  }
  func.func @transform_12(%arg0: i32) -> (i32, i32) {
    %c0_i32 = arith.constant 0 : i32
    %c0_i32_0 = arith.constant 0 : i32
    %c0_i32_1 = arith.constant 0 : i32
    return %c0_i32, %c0_i32_0 : i32, i32
  }
  func.func @transform_13(%arg0: i32) -> (i32, i32) {
    %c0_i32 = arith.constant 0 : i32
    %c0_i32_0 = arith.constant 0 : i32
    %c0_i32_1 = arith.constant 0 : i32
    return %c0_i32, %c0_i32_0 : i32, i32
  }
  func.func @transform_14(%arg0: i32) -> (i32, i32) {
    %c0_i32 = arith.constant 0 : i32
    %c0_i32_0 = arith.constant 0 : i32
    %c0_i32_1 = arith.constant 0 : i32
    return %c0_i32, %c0_i32_0 : i32, i32
  }
  func.func @transform_15(%arg0: i32) -> (i32, i32) {
    %c0_i32 = arith.constant 0 : i32
    %c0_i32_0 = arith.constant 0 : i32
    %c0_i32_1 = arith.constant 0 : i32
    return %c0_i32, %c0_i32_0 : i32, i32
  }
  func.func @transform_16(%arg0: i32) -> (i32, i32) {
    %c0_i32 = arith.constant 0 : i32
    %c0_i32_0 = arith.constant 0 : i32
    %c0_i32_1 = arith.constant 0 : i32
    return %c0_i32, %c0_i32_0 : i32, i32
  }
  func.func @transform_17(%arg0: i32) -> (i32, i32) {
    %c0_i32 = arith.constant 0 : i32
    %c0_i32_0 = arith.constant 0 : i32
    return %arg0, %c0_i32 : i32, i32
  }
}

</mosaic_0001>

<bundles_post_ra>
// kernel: fully_connected_forward.1
= control target key start
LH: loop header
LB: loop body
LE: loop exit
PB: predicated region body
PF: predicated region fallthrough
CT: control target
= control target key end

     0   :  { %s6815_s0 = inlined_call_operand.vmem [shape: f32[300,51], index: 0, kind: input, shape index: {}]   ;;  %s6816_s1 = inlined_call_operand.hbm [shape: bf16[64,512], index: 1, kind: input, shape index: {}]   ;;  %s6817_s2 = inlined_call_operand.vmem [shape: f32[1,512], index: 2, kind: input, shape index: {}]   ;;  %s6818_s3 = inlined_call_operand.vmem [shape: f32[1,512], index: 3, kind: input, shape index: {}]   ;;  %s6819_s4 = inlined_call_operand.vmem [shape: f32[1,512], index: 4, kind: input, shape index: {}]   ;;  %s6820_s5 = inlined_call_operand.vmem [shape: bf16[512,256], index: 5, kind: input, shape index: {}]   ;;  %s6821_s6 = inlined_call_operand.vmem [shape: f32[1,256], index: 6, kind: input, shape index: {}]   ;;  %s6822_s7 = inlined_call_operand.hbm [shape: bf16[256,128], index: 7, kind: input, shape index: {}]   ;;  %s6823_s8 = inlined_call_operand.vmem [shape: f32[1,128], index: 8, kind: input, shape index: {}]   ;;  %s6824_s9 = inlined_call_operand.vmem [shape: bf16[128,64], index: 9, kind: input, shape index: {}]   ;;  %s6825_s10 = inlined_call_operand.vmem [shape: f32[1,64], index: 10, kind: input, shape index: {}]   ;;  %s6826_s11 = inlined_call_operand.vmem [shape: f32[1,64], index: 11, kind: input, shape index: {}]   ;;  %s6827_s12 = inlined_call_operand.vmem [shape: f32[1,64], index: 12, kind: input, shape index: {}]   ;;  %s6828_s13 = inlined_call_operand.vmem [shape: bf16[64,128], index: 13, kind: input, shape index: {}]   ;;  %s6829_s14 = inlined_call_operand.vmem [shape: f32[1,128], index: 14, kind: input, shape index: {}]   ;;  %s6830_s15 = inlined_call_operand.vmem [shape: f32[1,128], index: 15, kind: input, shape index: {}]   ;;  %s6831_s16 = inlined_call_operand.<no memory space> [shape: f32[1,1], index: 16, kind: input, shape index: {}]   ;;  %s6832_s17 = inlined_call_operand.vmem [shape: f32[300,1], index: 17, kind: output, shape index: {}]  }
   0x1   :  { %6916 = sst [smem:[#allocation58_spill]] %s6815_s0  ;;  %v22_v0 = vstv %s6831_s16 }
   0x2   :  { %6917 = sst [smem:[#allocation59_spill]] %s6816_s1  ;;  %23 = vst [vmem:[#allocation2] sm:$0x1] %v22_v0 }
   0x3   :  { %6918 = sst [smem:[#allocation60_spill]] %s6832_s17 }
   0x4   :  { %24 = vsyncpa [#allocation4], 0 }
   0x5   :  { %25 = vsyncpa [#allocation6], 0  ;;  %s4914_s26 = smov 0   ;;  %s4916_s27 = smov 0  }
   0x6   :  { %s4918_s28 = smov 0  }
   0x7 LB: > { %6919 = sst [smem:[#allocation10_spill]] %s4776_s27  ;;  %s4927_s16 = sadd.s32 4294967295, %s4780_s28   ;;  %s4780_s28 = sphi %s4918_s28, %s7102_s28   ;;  %s4776_s27 = sphi %s4916_s27, %s7104_s27   ;;  %s4772_s26 = sphi %s4914_s26, %s7103_s26  }
   0x8   : > { %s4929_s29 = sadd.s32 1, %s4780_s28   ;;  %s400_s30 = sadd.s32 1, %s4776_s27 }
   0x9   : > { %6920 = sst [smem:[#allocation11_spill]] %s4929_s29  ;;  %s397_s0 = ssub.s32 %s4780_s28, %s4929_s29 }
   0xa   : > { %p398_p0 = scmp.eq.s32.totalorder %s397_s0, 0  ;;  %p410_p1 = scmp.ne.s32.totalorder %s4776_s27, %s4772_s26 }
   0xb   : > { %p411_p2 = scmp.eq.s32.totalorder %s4927_s16, 2  ;;  %p4023_p3 = scmp.ge.s32.totalorder %s4780_s28, 1 }
   0xc   : > { %s4937_s18 = scalar_select %p398_p0, %s4776_s27, %s400_s30  }
   0xd   : > { %p4939_p4 = por %p411_p2, %p410_p1  ;;  %p424_p5 = scmp.lt.s32.totalorder %s4780_s28, 4 }
   0xe   : > { %6921 = sst [smem:[#allocation12_spill]] %s4937_s18  ;;  %p6833_p6 = scmp.eq.s32.totalorder %s4927_s16, 0 }
   0xf   : > { %p4944_p7 = pnand %p4023_p3, %p424_p5  ;;  %s4814_s20 = smov [#allocation3]  }
  0x10   : > { %s436_s21 = sshll.u32 %s4814_s20, 4  ;;  %s4815_s23 = smov [#allocation5]   ;;  %s437_s21 = int_to_ptr.vmem [resolvable:$true] %s436_s21 }
  0x11   : > { %p4348_p8 = pneg %p4944_p7  ;;  %s464_s24 = sshll.u32 %s4815_s23, 4  ;;  %s465_s24 = int_to_ptr.vmem [resolvable:$true] %s464_s24 }
  0x12   : > { %s4677_s25 = scalar_lea.vmem %s437_s21, 2048  ;;  %p4685_p0 = scmp.lt.s32.totalorder %s437_s21, %s437_s21 }
  0x13   : > { %p4952_p9 = pnand %p6833_p6, %p4348_p8  ;;  %p4678_p11 = scmp.ne.s32.totalorder %s437_s21, %s4677_s25 }
  0x14   : > { %p4686_p1 = scmp.lt.s32.totalorder %s4677_s25, %s4677_s25 }
  0x15   : > { %p4668_p10 = pneg %p4952_p9 }
  0x16   : > { %p4687_p2 = por %p4686_p1, %p4685_p0 }
  0x17   : > { %p4680_p12 = pnand %p4678_p11, %p4668_p10 }
  0x19   : > { %p4681_p13 = pneg %p4680_p12 }
  0x1b   : > { %p4688_p3 = pnand %p4687_p2, %p4681_p13 }
  0x1d   : > { %4691 = shalt.err (!%p4688_p3)
}
  0x1e   : > { %s4816_s28 = smov 256   ;;  %s4817_s0 = smov 16  }
  0x1f   : > { %s6925_s23 = sld [smem:[#allocation59_spill]]  ;;  %s4703_s18 = scalar_lea.vmem %s465_s24, 2048 }
  0x20   : > { %p4704_p5 = scmp.ne.s32.totalorder %s465_s24, %s4703_s18  ;;  %p4711_p12 = scmp.lt.s32.totalorder %s465_s24, %s465_s24 }
  0x21   : > { %p4712_p6 = scmp.lt.s32.totalorder %s4703_s18, %s4703_s18 }
  0x22   : > { %p4706_p8 = pnand %p4704_p5, %p4668_p10 }
  0x23   : > { %p4713_p0 = por %p4712_p6, %p4711_p12 }
  0x24   : > { %p4707_p11 = pneg %p4706_p8 }
  0x25   : > { %4351 = dma.hbm_to_vmem [thread:$0]  (!%p4952_p9), %s6925_s23, 2048, %s437_s21, [#allocation4], %s4816_s28, %s4816_s28, %s4817_s0  }
  0x26   : > { %p4714_p13 = pnand %p4713_p0, %p4707_p11 }
  0x28   : > { %4717 = shalt.err (!%p4714_p13)
}
  0x29   : > { %s4818_s25 = smov 64   ;;  %s4819_s27 = smov 4  }
  0x2a   : > { %4354 = dma.hbm_to_vmem [thread:$0]  (!%p4952_p9), %s6822_s7, 2048, %s465_s24, [#allocation6], %s4818_s25, %s4818_s25, %s4819_s27  }
  0x2b   : > { %524 = sbr.rel (%p4944_p7) target bundleno = 1777 (0x6f1), region = 88 }
  0x30   : > { %p6926_p1 = scmp.eq.s32.totalorder %s4927_s16, 0 }
  0x32   : > { %4763 = dma.done.wait (%p6926_p1), [#allocation4], 2048   ;;  %p6927_p10 = pmov %p6926_p1 }
  0x33   : > { %p6928_p6 = pmov %p6926_p1 }
  0x34   : > { %4765 = vsyncadd (%p6927_p10), [#allocation4], 4294965248 }
  0x35   : > { %4767 = dma.done.wait (%p6928_p6), [#allocation6], 2048   ;;  %p6929_p2 = pmov %p6926_p1 }
  0x36   : > { %s4985_s18 = sshll.u32 %s4927_s16, 4  ;;  %v4820_v1 = vmov 0   ;;  %v4454_v2 = vld [vmem:[#allocation3 + $0x64] ss:$16 sps:$4 sm:$0xff]   ;;  %v4456_v3 = vld [vmem:[#allocation3 + $0x6c] ss:$16 sps:$4 sm:$0xff]  }
  0x37   : > { %4769 = vsyncadd (%p6929_p2), [#allocation6], 4294965248  ;;  %819 = vmatprep.mubr.bf16.mxu0 %v4820_v1  ;;  %932 = vmatprep.mubr.bf16.mxu1 %v4820_v1  ;;  %p588_p7 = scmp.lt.s32.totalorder %s4985_s18, 37  ;;  %v4458_v4 = vld [vmem:[#allocation3 + $0x60] ss:$16 sps:$4 sm:$0xff]   ;;  %s6930_s21 = sld [smem:[#allocation58_spill]] }
  0x38   : > { %795 = vmatprep.subr.bf16.mxu0 %v4454_v2  ;;  %v4459_v5 = vld [vmem:[#allocation3 + $0x68] ss:$16 sps:$4 sm:$0xff]   ;;  %908 = vmatprep.subr.bf16.mxu1 %v4456_v3  ;;  %v4460_v6 = vld [vmem:[#allocation3 + $0x44] ss:$16 sps:$4 sm:$0xff]   ;;  %v4462_v7 = vld [vmem:[#allocation3 + $0x4c] ss:$16 sps:$4 sm:$0xff]  }
  0x39   : > { %s589_s17 = scalar_select %p588_p7, %s4985_s18, 37  ;;  %796 = vmatpush1.bf16.msra.mxu0 %v4458_v4  ;;  %909 = vmatpush1.bf16.msra.mxu1 %v4459_v5  ;;  %v4464_v8 = vld [vmem:[#allocation3 + $0x40] ss:$16 sps:$4 sm:$0xff]   ;;  %v4465_v9 = vld [vmem:[#allocation3 + $0x48] ss:$16 sps:$4 sm:$0xff]   ;;  %vm619_vm0 = vcmask 416768  }
  0x3a   : > { %797 = vmatprep.subr.bf16.mxu0 %v4460_v6  ;;  %910 = vmatprep.subr.bf16.mxu1 %v4462_v7  ;;  %v4466_v10 = vld [vmem:[#allocation3 + $0x24] ss:$16 sps:$4 sm:$0xff]   ;;  %v4468_v11 = vld [vmem:[#allocation3 + $0x2c] ss:$16 sps:$4 sm:$0xff]   ;;  %v4470_v12 = vld [vmem:[#allocation3 + $0x20] ss:$16 sps:$4 sm:$0xff]  }
  0x3b   : > { %s4032_s27 = sshll.u32 %s589_s17, 3  ;;  %v4471_v13 = vld [vmem:[#allocation3 + $0x28] ss:$16 sps:$4 sm:$0xff]   ;;  %v4472_v14 = vld [vmem:[#allocation3 + $0x4] ss:$16 sps:$4 sm:$0xff]   ;;  %vm762_vm1 = vcmask 523264  }
  0x3c   : > { %v4474_v15 = vld [vmem:[#allocation3 + $0xc] ss:$16 sps:$4 sm:$0xff]   ;;  %v4476_v18 = vld [vmem:[#allocation3] ss:$16 sps:$4 sm:$0xff]   ;;  %v4477_v19 = vld [vmem:[#allocation3 + $0x8] ss:$16 sps:$4 sm:$0xff]  }
  0x3d   : > { %s4994_s22 = scalar_lea.vmem %s6930_s21, %s4032_s27  ;;  %798 = vmatpush1.bf16.msra.mxu0 %v4464_v8  ;;  %911 = vmatpush1.bf16.msra.mxu1 %v4465_v9  ;;  %v4478_v58 = vld [vmem:[%s6820_s5 + $0x70] ss:$8 sps:$4 sm:$0xff]   ;;  %v4480_v59 = vld [vmem:[%s6820_s5 + $0x74] ss:$8 sps:$4 sm:$0xff]   ;;  %v4486_v62 = vld [vmem:[%s6820_s5 + $0x64] ss:$8 sps:$4 sm:$0xff]  }
  0x3e   : > { %799 = vmatprep.subr.bf16.mxu0 %v4466_v10  ;;  %912 = vmatprep.subr.bf16.mxu1 %v4468_v11  ;;  %v603_v16 = vld [vmem:[%s4994_s22] sm:$0xff]  ;;  %v604_v17 = vld [vmem:[%s4994_s22 + $0x8] sm:$0xff]  ;;  %v605_v23 = vld [vmem:[%s4994_s22 + $0x10] sm:$0xff]  ;;  %s580_s30 = sand.u32 1, %s4772_s26   ;;  %s3732_s26 = ssub.s32 (%p4939_p4), 38, %s4985_s18 }
  0x3f   : > { %v620_v20 = vsel %vm619_vm0, %v603_v16, 0.0  ;;  %v621_v21 = vsel %vm619_vm0, %v604_v17, 0.0  ;;  %v606_v24 = vld [vmem:[%s4994_s22 + $0x18] sm:$0xff]  ;;  %v622_v25 = vsel %vm619_vm0, %v605_v23, 0.0  ;;  %v607_v28 = vld [vmem:[%s4994_s22 + $0x20] sm:$0xff]  ;;  %v608_v29 = vld [vmem:[%s4994_s22 + $0x28] sm:$0xff] }
  0x40   : > { %v636_v22 = vpack.c.bf16 %v621_v21, %v620_v20  ;;  %v623_v26 = vsel %vm619_vm0, %v606_v24, 0.0  ;;  %v624_v30 = vsel %vm619_vm0, %v607_v28, 0.0  ;;  %v625_v31 = vsel %vm619_vm0, %v608_v29, 0.0  ;;  %v609_v32 = vld [vmem:[%s4994_s22 + $0x30] sm:$0xff]  ;;  %v610_v34 = vld [vmem:[%s4994_s22 + $0x38] sm:$0xff]  ;;  %v611_v35 = vld [vmem:[%s4994_s22 + $0x40] sm:$0xff] }
  0x41   : > { %800 = vmatpush1.bf16.msra.mxu0 %v4470_v12  ;;  %913 = vmatpush1.bf16.msra.mxu1 %v4471_v13  ;;  %v637_v27 = vpack.c.bf16 %v623_v26, %v622_v25  ;;  %v638_v33 = vpack.c.bf16 %v625_v31, %v624_v30  ;;  %v612_v36 = vld [vmem:[%s4994_s22 + $0x48] sm:$0xff]  ;;  %v613_v37 = vld [vmem:[%s4994_s22 + $0x50] sm:$0xff]  ;;  %v614_v38 = vld [vmem:[%s4994_s22 + $0x58] sm:$0xff]  ;;  %v626_v39 = vsel %vm619_vm0, %v609_v32, 0.0  ;;  %v627_v40 = vsel %vm619_vm0, %v610_v34, 0.0  ;;  %s4030_s20 = sshll.u32 %s580_s30, 7 }
  0x42   : > { %801 = vmatprep.subr.bf16.mxu0 %v4472_v14  ;;  %914 = vmatprep.subr.bf16.mxu1 %v4474_v15  ;;  %v628_v41 = vsel %vm619_vm0, %v611_v35, 0.0  ;;  %v629_v42 = vsel %vm619_vm0, %v612_v36, 0.0  ;;  %v630_v43 = vsel %vm619_vm0, %v613_v37, 0.0  ;;  %v631_v44 = vsel %vm619_vm0, %v614_v38, 0.0  ;;  %v615_v48 = vld [vmem:[%s4994_s22 + $0x60] sm:$0xff]  ;;  %v616_v49 = vld [vmem:[%s4994_s22 + $0x68] sm:$0xff] }
  0x43   : > { %v639_v45 = vpack.c.bf16 %v627_v40, %v626_v39  ;;  %v640_v46 = vpack.c.bf16 %v629_v42, %v628_v41  ;;  %v641_v47 = vpack.c.bf16 %v631_v44, %v630_v43  ;;  %v632_v50 = vsel %vm619_vm0, %v615_v48, 0.0  ;;  %v617_v53 = vld [vmem:[%s4994_s22 + $0x70] sm:$0xff]  ;;  %v618_v54 = vld [vmem:[%s4994_s22 + $0x78] sm:$0xff]  ;;  %v4489_v63 = vld [vmem:[%s6820_s5 + $0x164] ss:$8 sps:$4 sm:$0xff]   ;;  %s6681_s23 = scalar_lea.vmem [#allocation7], %s4030_s20  }
  0x44   : > { %v633_v51 = vsel %vm619_vm0, %v616_v49, 0.0  ;;  %v634_v55 = vsel %vm619_vm0, %v617_v53, 0.0  ;;  %v635_v56 = vsel %vm619_vm0, %v618_v54, 0.0  ;;  %v4481_v60 = vld [vmem:[%s6820_s5 + $0x170] ss:$8 sps:$4 sm:$0xff]   ;;  %s4189_s25 = sshll.u32 (%p4939_p4), %s4927_s16, 7 }
  0x45   : > { %802 = vmatpush1.bf16.msra.mxu0 %v4476_v18  ;;  %915 = vmatpush1.bf16.msra.mxu1 %v4477_v19  ;;  %v642_v52 = vpack.c.bf16 %v633_v51, %v632_v50  ;;  %v643_v57 = vpack.c.bf16 %v635_v56, %v634_v55  ;;  %v4483_v61 = vld [vmem:[%s6820_s5 + $0x174] ss:$8 sps:$4 sm:$0xff]   ;;  %v4484_v0 = vld [vmem:[%s6820_s5 + $0x60] ss:$8 sps:$4 sm:$0xff]   ;;  %v4490_v4 = vld [vmem:[%s6820_s5 + $0x50] ss:$8 sps:$4 sm:$0xff]   ;;  %v662_v18 = vlaneseq }
  0x46   : > { %2269 = vmatprep.subr.bf16.mxu0 %v4480_v59  ;;  %2382 = vmatprep.subr.bf16.mxu1 %v4483_v61  ;;  %v4492_v2 = vld [vmem:[%s6820_s5 + $0x54] ss:$8 sps:$4 sm:$0xff]   ;;  %v4493_v5 = vld [vmem:[%s6820_s5 + $0x150] ss:$8 sps:$4 sm:$0xff]   ;;  %v4498_v6 = vld [vmem:[%s6820_s5 + $0x44] ss:$8 sps:$4 sm:$0xff]  }
  0x47   : > { %v4495_v3 = vld [vmem:[%s6820_s5 + $0x154] ss:$8 sps:$4 sm:$0xff]   ;;  %v4501_v7 = vld [vmem:[%s6820_s5 + $0x144] ss:$8 sps:$4 sm:$0xff]   ;;  %v4496_v8 = vld [vmem:[%s6820_s5 + $0x40] ss:$8 sps:$4 sm:$0xff]  }
  0x48   : > { %4049 = vmatmul.mubr.msk.bf16.vlgmr.msra.gmra.mxu0 %vm762_vm1, %v636_v22  ;;  %4057 = vmatmul.mubr.msk.bf16.vlgmr.msra.gmra.mxu1 %vm762_vm1, %v636_v22  ;;  %v4499_v9 = vld [vmem:[%s6820_s5 + $0x140] ss:$8 sps:$4 sm:$0xff]   ;;  %v4504_v10 = vld [vmem:[%s6820_s5 + $0x34] ss:$8 sps:$4 sm:$0xff]   ;;  %v4502_v12 = vld [vmem:[%s6820_s5 + $0x30] ss:$8 sps:$4 sm:$0xff]  }
  0x49   : > { %829 = vmatprep.mubr.bf16.mxu0 %v4820_v1  ;;  %942 = vmatprep.mubr.bf16.mxu1 %v4820_v1  ;;  %v4507_v11 = vld [vmem:[%s6820_s5 + $0x134] ss:$8 sps:$4 sm:$0xff]   ;;  %v4505_v13 = vld [vmem:[%s6820_s5 + $0x130] ss:$8 sps:$4 sm:$0xff]   ;;  %v4510_v14 = vld [vmem:[%s6820_s5 + $0x24] ss:$8 sps:$4 sm:$0xff]  }
  0x4a   : > { %2270 = vmatpush1.bf16.msra.mxu0 %v4478_v58  ;;  %2383 = vmatpush1.bf16.msra.mxu1 %v4481_v60  ;;  %v4513_v15 = vld [vmem:[%s6820_s5 + $0x124] ss:$8 sps:$4 sm:$0xff]   ;;  %v4508_v16 = vld [vmem:[%s6820_s5 + $0x20] ss:$8 sps:$4 sm:$0xff]   ;;  %v663_v19 = vshrl.u32 %v662_v18, 7  ;;  %p3733_p9 = scmp.lt.s32.totalorder (%p4939_p4), %s3732_s26, 16 }
  0x4b   : > { %2271 = vmatprep.subr.bf16.mxu0 %v4486_v62  ;;  %2384 = vmatprep.subr.bf16.mxu1 %v4489_v63  ;;  %v4511_v17 = vld [vmem:[%s6820_s5 + $0x120] ss:$8 sps:$4 sm:$0xff]   ;;  %s7098_s29 = sld [smem:[#allocation60_spill]] (%p4939_p4) }
  0x4c   : > { %v5130_v20 = vsub.s32 0, %v663_v19  ;;  %v5132_v21 = vsub.s32 2, %v663_v19  ;;  %v660_v22 = vld [vmem:[%s6817_s2] sm:$0xf]  ;;  %v5137_v23 = vsub.s32 1, %v663_v19  ;;  %v5139_v24 = vsub.s32 3, %v663_v19 }
  0x4e   : > { %2272 = vmatpush1.bf16.msra.mxu0 %v4484_v0  ;;  %6931 = vst [vmem:[#allocation13_spill] sm:$0xff] %v5130_v20  ;;  %6932 = vst [vmem:[#allocation14_spill] sm:$0xff] %v5137_v23  ;;  %v5142_v25 = vrot.slane %v660_v22, %v5130_v20  ;;  %v5145_v26 = vrot.slane %v660_v22, %v5132_v21  ;;  %v5151_v30 = vrot.slane %v660_v22, %v5139_v24 }
  0x4f   : > { %2273 = vmatprep.subr.bf16.mxu0 %v4492_v2 }
  0x50   : > { %4050 = vmatmul.mubr.msk.bf16.gmra.mxu0 %vm762_vm1, %v637_v27  ;;  %4058 = vmatmul.mubr.msk.bf16.gmra.mxu1 %vm762_vm1, %v637_v27  ;;  %v5148_v27 = vrot.slane %v660_v22, %v5137_v23 }
  0x51   : > { %839 = vmatprep.mubr.bf16.mxu0 %v4820_v1  ;;  %952 = vmatprep.mubr.bf16.mxu1 %v4820_v1  ;;  %s6722_s1 = scalar_lea.vmem (%p4939_p4), %s7098_s29, %s4189_s25  }
  0x52   : > { %2274 = vmatpush1.bf16.msra.mxu0 %v4490_v4 }
  0x53   : > { %2275 = vmatprep.subr.bf16.mxu0 %v4498_v6 }
  0x56   : > { %2276 = vmatpush1.bf16.msra.mxu0 %v4496_v8 }
  0x57   : > { %2277 = vmatprep.subr.bf16.mxu0 %v4504_v10 }
  0x58   : > { %4051 = vmatmul.mubr.msk.bf16.gmra.mxu0 %vm762_vm1, %v638_v33  ;;  %4059 = vmatmul.mubr.msk.bf16.gmra.mxu1 %vm762_vm1, %v638_v33 }
  0x59   : > { %849 = vmatprep.mubr.bf16.mxu0 %v4820_v1  ;;  %962 = vmatprep.mubr.bf16.mxu1 %v4820_v1 }
  0x5a   : > { %2278 = vmatpush1.bf16.msra.mxu0 %v4502_v12 }
  0x5b   : > { %2279 = vmatprep.subr.bf16.mxu0 %v4510_v14 }
  0x5e   : > { %2280 = vmatpush1.bf16.msra.mxu0 %v4508_v16 }
  0x60   : > { %4052 = vmatmul.mubr.msk.bf16.gmra.mxu0 %vm762_vm1, %v639_v45  ;;  %4060 = vmatmul.mubr.msk.bf16.gmra.mxu1 %vm762_vm1, %v639_v45 }
  0x61   : > { %859 = vmatprep.mubr.bf16.mxu0 %v4820_v1  ;;  %972 = vmatprep.mubr.bf16.mxu1 %v4820_v1 }
  0x68   : > { %4053 = vmatmul.mubr.msk.bf16.gmra.mxu0 %vm762_vm1, %v640_v46  ;;  %4061 = vmatmul.mubr.msk.bf16.gmra.mxu1 %vm762_vm1, %v640_v46 }
  0x69   : > { %869 = vmatprep.mubr.bf16.mxu0 %v4820_v1  ;;  %982 = vmatprep.mubr.bf16.mxu1 %v4820_v1 }
  0x70   : > { %4054 = vmatmul.mubr.msk.bf16.gmra.mxu0 %vm762_vm1, %v641_v47  ;;  %4062 = vmatmul.mubr.msk.bf16.gmra.mxu1 %vm762_vm1, %v641_v47 }
  0x71   : > { %879 = vmatprep.mubr.bf16.mxu0 %v4820_v1  ;;  %992 = vmatprep.mubr.bf16.mxu1 %v4820_v1 }
  0x78   : > { %4055 = vmatmul.mubr.msk.bf16.gmra.mxu0 %vm762_vm1, %v642_v52  ;;  %4063 = vmatmul.mubr.msk.bf16.gmra.mxu1 %vm762_vm1, %v642_v52 }
  0x79   : > { %889 = vmatprep.mubr.bf16.mxu0 %v4820_v1  ;;  %1002 = vmatprep.mubr.bf16.mxu1 %v4820_v1  ;;  %v4487_v1 = vld [vmem:[%s6820_s5 + $0x160] ss:$8 sps:$4 sm:$0xff]  }
  0x7a   : > { %2385 = vmatpush1.bf16.msra.mxu1 %v4487_v1 }
  0x7b   : > { %2386 = vmatprep.subr.bf16.mxu1 %v4495_v3 }
  0x7e   : > { %2387 = vmatpush1.bf16.msra.mxu1 %v4493_v5 }
  0x7f   : > { %2388 = vmatprep.subr.bf16.mxu1 %v4501_v7 }
  0x80   : > { %4056 = vmatmul.mubr.msk.bf16.gmra.mxu0 %vm762_vm1, %v643_v57  ;;  %4064 = vmatmul.mubr.msk.bf16.gmra.mxu1 %vm762_vm1, %v643_v57 }
  0x82   : > { %2389 = vmatpush1.bf16.msra.mxu1 %v4499_v9 }
  0x83   : > { %2390 = vmatprep.subr.bf16.mxu1 %v4507_v11 }
  0x86   : > { %2391 = vmatpush1.bf16.msra.mxu1 %v4505_v13 }
  0x87   : > { %2392 = vmatprep.subr.bf16.mxu1 %v4513_v15 }
  0x8a   : > { %2393 = vmatpush1.bf16.msra.mxu1 %v4511_v17 }
 0x108   : > { %v821_v28 = vpop.f32.mrf.mxu0  ;;  %v934_v29 = vpop.f32.mrf.mxu1 }
 0x109   : > { %v5154_v31 = vadd.f32 %v821_v28, %v5142_v25  ;;  %v5157_v32 = vadd.f32 %v934_v29, %v5145_v26 }
 0x10a   : > { %v823_v33 = vpop.f32.mrf.mxu0  ;;  %v936_v34 = vpop.f32.mrf.mxu1 }
 0x10b   : > { %v5160_v35 = vadd.f32 %v823_v33, %v5148_v27  ;;  %v5163_v36 = vadd.f32 %v936_v34, %v5151_v30  ;;  %v1095_v41 = vmul.f32 %v5154_v31, %v5154_v31  ;;  %v1097_v45 = vmul.f32 %v5157_v32, %v5157_v32 }
 0x10c   : > { %v825_v37 = vpop.f32.mrf.mxu0  ;;  %v938_v38 = vpop.f32.mrf.mxu1 }
 0x10d   : > { %v1096_v39 = vmul.f32 %v5160_v35, %v5160_v35  ;;  %v1015_v40 = vadd.f32 %v5160_v35, %v5154_v31  ;;  %v5172_v42 = vadd.f32 %v825_v37, %v5142_v25  ;;  %v5180_v47 = vadd.f32 %v938_v38, %v5145_v26 }
 0x10e   : > { %v827_v43 = vpop.f32.mrf.mxu0  ;;  %v940_v44 = vpop.f32.mrf.mxu1  ;;  %v1098_v51 = vmul.f32 %v5163_v36, %v5163_v36 }
 0x10f   : > { %v5177_v46 = vadd.f32 %v827_v43, %v5148_v27  ;;  %v1016_v50 = vadd.f32 %v1015_v40, %v5157_v32  ;;  %v1159_v52 = vadd.f32 %v1096_v39, %v1095_v41  ;;  %v5190_v55 = vadd.f32 %v940_v44, %v5151_v30 }
 0x110   : > { %v831_v48 = vpop.f32.mrf.mxu0  ;;  %v944_v49 = vpop.f32.mrf.mxu1  ;;  %v1099_v57 = vmul.f32 %v5172_v42, %v5172_v42  ;;  %v1101_v0 = vmul.f32 %v5180_v47, %v5180_v47 }
 0x111   : > { %v1020_v53 = vadd.f32 %v5177_v46, %v5172_v42  ;;  %v1100_v54 = vmul.f32 %v5177_v46, %v5177_v46  ;;  %v5193_v56 = vadd.f32 %v831_v48, %v5142_v25  ;;  %v5198_v58 = vadd.f32 %v944_v49, %v5145_v26 }
 0x112   : > { %v833_v59 = vpop.f32.mrf.mxu0  ;;  %v946_v60 = vpop.f32.mrf.mxu1  ;;  %v1017_v61 = vadd.f32 %v1016_v50, %v5163_v36  ;;  %v1160_v62 = vadd.f32 %v1159_v52, %v1097_v45  ;;  %v1102_v9 = vmul.f32 %v5190_v55, %v5190_v55 }
 0x113   : > { %v5202_v63 = vadd.f32 %v833_v59, %v5148_v27  ;;  %v1021_v4 = vadd.f32 %v1020_v53, %v5180_v47  ;;  %v1164_v5 = vadd.f32 %v1100_v54, %v1099_v57  ;;  %v1103_v6 = vmul.f32 %v5193_v56, %v5193_v56 }
 0x114   : > { %1018 = vadd.xlane.f32.xlu0 %v1017_v61  ;;  %v835_v1 = vpop.f32.mrf.mxu0  ;;  %v948_v2 = vpop.f32.mrf.mxu1  ;;  %v1161_v3 = vadd.f32 %v1160_v62, %v1098_v51  ;;  %v1105_v10 = vmul.f32 %v5198_v58, %v5198_v58  ;;  %v5222_v16 = vadd.f32 %v946_v60, %v5151_v30  ;;  %v4516_v60 = vld [vmem:[%s6820_s5 + $0x14] ss:$8 sps:$4 sm:$0xff]  }
 0x115   : > { %v1025_v7 = vadd.f32 %v5202_v63, %v5193_v56  ;;  %v1104_v8 = vmul.f32 %v5202_v63, %v5202_v63  ;;  %v5218_v11 = vadd.f32 %v835_v1, %v5142_v25  ;;  %v1022_v14 = vadd.f32 %v1021_v4, %v5190_v55  ;;  %v4519_v61 = vld [vmem:[%s6820_s5 + $0x114] ss:$8 sps:$4 sm:$0xff]   ;;  %v4517_v4 = vld [vmem:[%s6820_s5 + $0x110] ss:$8 sps:$4 sm:$0xff]   ;;  %2281 = vmatprep.subr.bf16.mxu0 %v4516_v60 }
 0x116   : > { %1162 = vadd.xlane.f32.xlu1 %v1161_v3  ;;  %v837_v12 = vpop.f32.mrf.mxu0  ;;  %v950_v13 = vpop.f32.mrf.mxu1  ;;  %v1165_v15 = vadd.f32 %v1164_v5, %v1101_v0  ;;  %v5225_v17 = vadd.f32 %v948_v2, %v5145_v26  ;;  %v1106_v50 = vmul.f32 %v5222_v16, %v5222_v16  ;;  %v4514_v3 = vld [vmem:[%s6820_s5 + $0x10] ss:$8 sps:$4 sm:$0xff]   ;;  %2394 = vmatprep.subr.bf16.mxu1 %v4519_v61 }
 0x117   : > { %v5228_v18 = vadd.f32 %v837_v12, %v5148_v27  ;;  %v1026_v29 = vadd.f32 %v1025_v7, %v5198_v58  ;;  %v1169_v33 = vadd.f32 %v1104_v8, %v1103_v6  ;;  %v1107_v40 = vmul.f32 %v5218_v11, %v5218_v11  ;;  %2282 = vmatpush1.bf16.msra.mxu0 %v4514_v3 }
 0x118   : > { %1023 = vadd.xlane.f32.xlu0 %v1022_v14  ;;  %v841_v19 = vpop.f32.mrf.mxu0  ;;  %v954_v22 = vpop.f32.mrf.mxu1  ;;  %v1166_v28 = vadd.f32 %v1165_v15, %v1102_v9  ;;  %v1109_v48 = vmul.f32 %v5225_v17, %v5225_v17  ;;  %v5252_v51 = vadd.f32 %v950_v13, %v5151_v30  ;;  %2395 = vmatpush1.bf16.msra.mxu1 %v4517_v4 }
 0x119   : > { %v1030_v34 = vadd.f32 %v5228_v18, %v5218_v11  ;;  %v1108_v37 = vmul.f32 %v5228_v18, %v5228_v18  ;;  %v5236_v38 = vadd.f32 %v841_v19, %v5142_v25  ;;  %v5239_v39 = vadd.f32 %v954_v22, %v5145_v26 }
 0x11a   : > { %1167 = vadd.xlane.f32.xlu1 %v1166_v28  ;;  %v843_v41 = vpop.f32.mrf.mxu0  ;;  %v956_v43 = vpop.f32.mrf.mxu1  ;;  %v1027_v44 = vadd.f32 %v1026_v29, %v5222_v16  ;;  %v1170_v45 = vadd.f32 %v1169_v33, %v1105_v10  ;;  %v1110_v19 = vmul.f32 %v5252_v51, %v5252_v51 }
 0x11b   : > { %6933 = vst [vmem:[#allocation15_spill] sm:$0xff] %v5236_v38  ;;  %6934 = vst [vmem:[#allocation16_spill] sm:$0xff] %v5239_v39  ;;  %v5247_v49 = vadd.f32 %v843_v41, %v5148_v27  ;;  %v1111_v52 = vmul.f32 %v5236_v38, %v5236_v38  ;;  %v1031_v57 = vadd.f32 %v1030_v34, %v5225_v17  ;;  %v4525_v41 = vld [vmem:[%s6820_s5 + $0x104] ss:$8 sps:$4 sm:$0xff]  }
 0x11c   : > { %1028 = vadd.xlane.f32.xlu0 %v1027_v44  ;;  %v845_v53 = vpop.f32.mrf.mxu0  ;;  %v958_v54 = vpop.f32.mrf.mxu1  ;;  %v1174_v59 = vadd.f32 %v1108_v37, %v1107_v40  ;;  %v1113_v62 = vmul.f32 %v5239_v39, %v5239_v39  ;;  %v1171_v2 = vadd.f32 %v1170_v45, %v1106_v50  ;;  %v5280_v10 = vadd.f32 %v956_v43, %v5151_v30  ;;  %v4522_v40 = vld [vmem:[%s6820_s5 + $0x4] ss:$8 sps:$4 sm:$0xff]  }
 0x11d   : > { %v1035_v0 = vadd.f32 %v5247_v49, %v5236_v38  ;;  %v1112_v1 = vmul.f32 %v5247_v49, %v5247_v49  ;;  %v5276_v5 = vadd.f32 %v845_v53, %v5142_v25  ;;  %v1032_v8 = vadd.f32 %v1031_v57, %v5252_v51  ;;  %v4520_v53 = vld [vmem:[%s6820_s5] ss:$8 sps:$4 sm:$0xff]   ;;  %2283 = vmatprep.subr.bf16.mxu0 %v4522_v40  ;;  %v4529_v40 = vld [vmem:[%s6820_s5 + $0x1f0] ss:$8 sps:$4 sm:$0xff]  }
 0x11e   : > { %v847_v6 = vpop.f32.mrf.mxu0  ;;  %v960_v7 = vpop.f32.mrf.mxu1  ;;  %v1175_v9 = vadd.f32 %v1174_v59, %v1109_v48  ;;  %v5283_v12 = vadd.f32 %v958_v54, %v5145_v26  ;;  %v4523_v54 = vld [vmem:[%s6820_s5 + $0x100] ss:$8 sps:$4 sm:$0xff]   ;;  %v1114_v61 = vmul.f32 %v5280_v10, %v5280_v10  ;;  %2396 = vmatprep.subr.bf16.mxu1 %v4525_v41  ;;  %2284 = vmatpush1.bf16.msra.mxu0 %v4520_v53 }
 0x11f   : > { %6935 = vst [vmem:[#allocation17_spill] sm:$0xff] %v5276_v5  ;;  %v5286_v13 = vadd.f32 %v847_v6, %v5148_v27  ;;  %1033 = vadd.xlane.f32.xlu1 %v1032_v8  ;;  %v1036_v22 = vadd.f32 %v1035_v0, %v5239_v39  ;;  %v1179_v28 = vadd.f32 %v1112_v1, %v1111_v52 }
 0x120   : > { %6936 = vst [vmem:[#allocation18_spill] sm:$0xff] %v5283_v12  ;;  %1172 = vadd.xlane.f32.xlu0 %v1171_v2  ;;  %v851_v14 = vpop.f32.mrf.mxu0  ;;  %v964_v15 = vpop.f32.mrf.mxu1  ;;  %v1115_v43 = vmul.f32 %v5276_v5, %v5276_v5  ;;  %v1176_v48 = vadd.f32 %v1175_v9, %v1110_v19  ;;  %v1117_v57 = vmul.f32 %v5283_v12, %v5283_v12  ;;  %v4528_v9 = vld [vmem:[%s6820_s5 + $0xf4] ss:$8 sps:$4 sm:$0xff]  }
 0x121   : > { %v1040_v29 = vadd.f32 %v5286_v13, %v5276_v5  ;;  %v1116_v33 = vmul.f32 %v5286_v13, %v5286_v13  ;;  %v5296_v34 = vadd.f32 %v851_v14, %v5142_v25  ;;  %v5299_v37 = vadd.f32 %v964_v15, %v5145_v26  ;;  %v4531_v14 = vld [vmem:[%s6820_s5 + $0x1f4] ss:$8 sps:$4 sm:$0xff]   ;;  %2397 = vmatpush1.bf16.msra.mxu1 %v4523_v54 }
 0x122   : > { %v853_v44 = vpop.f32.mrf.mxu0  ;;  %v966_v45 = vpop.f32.mrf.mxu1  ;;  %v1037_v50 = vadd.f32 %v1036_v22, %v5280_v10  ;;  %v1180_v52 = vadd.f32 %v1179_v28, %v1113_v62  ;;  %v5319_v59 = vadd.f32 %v960_v7, %v5151_v30  ;;  %2285 = vmatprep.subr.bf16.mxu0 %v4528_v9  ;;  %2398 = vmatprep.subr.bf16.mxu1 %v4531_v14  ;;  %v4532_v14 = vld [vmem:[%s6820_s5 + $0xe0] ss:$8 sps:$4 sm:$0xff]  }
 0x123   : > { %6937 = vst [vmem:[#allocation19_spill] sm:$0xff] %v5296_v34  ;;  %6938 = vst [vmem:[#allocation20_spill] sm:$0xff] %v5299_v37  ;;  %v5322_v60 = vadd.f32 %v853_v44, %v5148_v27  ;;  %v1119_v62 = vmul.f32 %v5296_v34, %v5296_v34  ;;  %1177 = vadd.xlane.f32.xlu1 %v1176_v48  ;;  %v1041_v2 = vadd.f32 %v1040_v29, %v5283_v12 }
 0x124   : > { %1038 = vadd.xlane.f32.xlu0 %v1037_v50  ;;  %v855_v0 = vpop.f32.mrf.mxu0  ;;  %v968_v1 = vpop.f32.mrf.mxu1  ;;  %v1184_v3 = vadd.f32 %v1116_v33, %v1115_v43  ;;  %v1121_v4 = vmul.f32 %v5299_v37, %v5299_v37  ;;  %v1181_v28 = vadd.f32 %v1180_v52, %v1114_v61  ;;  %v4526_v33 = vld [vmem:[%s6820_s5 + $0xf0] ss:$8 sps:$4 sm:$0xff]   ;;  %v5352_v41 = vadd.f32 %v966_v45, %v5151_v30 }
 0x125   : > { %6939 = vst [vmem:[#allocation21_spill] sm:$0xff] %v5322_v60  ;;  %v1045_v6 = vadd.f32 %v5322_v60, %v5296_v34  ;;  %v1120_v7 = vmul.f32 %v5322_v60, %v5322_v60  ;;  %v5336_v8 = vadd.f32 %v855_v0, %v5142_v25  ;;  %v1042_v22 = vadd.f32 %v1041_v2, %v5319_v59  ;;  %v4534_v2 = vld [vmem:[%s6820_s5 + $0xe4] ss:$8 sps:$4 sm:$0xff]  }
 0x126   : > { %v857_v15 = vpop.f32.mrf.mxu0  ;;  %v970_v19 = vpop.f32.mrf.mxu1  ;;  %v1185_v29 = vadd.f32 %v1184_v3, %v1117_v57  ;;  %6941 = vst [vmem:[#allocation23_spill] sm:$0xff] %v5352_v41  ;;  %v5355_v43 = vadd.f32 %v968_v1, %v5145_v26  ;;  %v1118_v48 = vmul.f32 %v5319_v59, %v5319_v59  ;;  %2286 = vmatpush2.bf16.msra.mxu0 %v4526_v33 }
 0x127   : > { %6940 = vst [vmem:[#allocation22_spill] sm:$0xff] %v5336_v8  ;;  %v5358_v44 = vadd.f32 %v857_v15, %v5148_v27  ;;  %v1123_v50 = vmul.f32 %v5336_v8, %v5336_v8  ;;  %1043 = vadd.xlane.f32.xlu1 %v1042_v22  ;;  %v1046_v45 = vadd.f32 %v1045_v6, %v5299_v37  ;;  %v4535_v22 = vld [vmem:[%s6820_s5 + $0x1e0] ss:$8 sps:$4 sm:$0xff]  }
 0x128   : > { %6942 = vst [vmem:[#allocation24_spill] sm:$0xff] %v5355_v43  ;;  %1182 = vadd.xlane.f32.xlu0 %v1181_v28  ;;  %v861_v52 = vpop.f32.mrf.mxu0  ;;  %v974_v53 = vpop.f32.mrf.mxu1  ;;  %v1189_v54 = vadd.f32 %v1120_v7, %v1119_v62  ;;  %v4537_v62 = vld [vmem:[%s6820_s5 + $0x1e4] ss:$8 sps:$4 sm:$0xff]   ;;  %v1186_v7 = vadd.f32 %v1185_v29, %v1118_v48  ;;  %2399 = vmatpush2.bf16.msra.mxu1 %v4529_v40 }
 0x129   : > { %6943 = vst [vmem:[#allocation25_spill] sm:$0xff] %v5358_v44  ;;  %v1050_v57 = vadd.f32 %v5358_v44, %v5336_v8  ;;  %v1124_v61 = vmul.f32 %v5358_v44, %v5358_v44  ;;  %v5370_v0 = vadd.f32 %v861_v52, %v5142_v25  ;;  %v5373_v1 = vadd.f32 %v974_v53, %v5145_v26 }
 0x12a   : > { %v863_v3 = vpop.f32.mrf.mxu0  ;;  %v976_v6 = vpop.f32.mrf.mxu1  ;;  %v1047_v9 = vadd.f32 %v1046_v45, %v5352_v41  ;;  %v1190_v15 = vadd.f32 %v1189_v54, %v1121_v4  ;;  %v1125_v28 = vmul.f32 %v5355_v43, %v5355_v43  ;;  %v5391_v52 = vadd.f32 %v970_v19, %v5151_v30  ;;  %2287 = vmatprep.subr.bf16.mxu0 %v4534_v2 }
 0x12b   : > { %6944 = vst [vmem:[#allocation26_spill] sm:$0xff] %v5370_v0  ;;  %6945 = vst [vmem:[#allocation27_spill] sm:$0xff] %v5373_v1  ;;  %v5394_v29 = vadd.f32 %v863_v3, %v5148_v27  ;;  %v1122_v4 = vmul.f32 %v5352_v41, %v5352_v41  ;;  %v1127_v33 = vmul.f32 %v5370_v0, %v5370_v0  ;;  %1187 = vadd.xlane.f32.xlu1 %v1186_v7  ;;  %v4540_v7 = vld [vmem:[%s6820_s5 + $0xd4] ss:$8 sps:$4 sm:$0xff]  }
 0x12c   : > { %6946 = vst [vmem:[#allocation28_spill] sm:$0xff] %v5391_v52  ;;  %1048 = vadd.xlane.f32.xlu0 %v1047_v9  ;;  %v865_v40 = vpop.f32.mrf.mxu0  ;;  %v978_v48 = vpop.f32.mrf.mxu1  ;;  %v1051_v53 = vadd.f32 %v1050_v57, %v5355_v43  ;;  %v1194_v45 = vadd.f32 %v1124_v61, %v1123_v50  ;;  %v1129_v19 = vmul.f32 %v5373_v1, %v5373_v1  ;;  %v4543_v50 = vld [vmem:[%s6820_s5 + $0x1d4] ss:$8 sps:$4 sm:$0xff]  }
 0x12d   : > { %6947 = vst [vmem:[#allocation29_spill] sm:$0xff] %v5394_v29  ;;  %v1055_v54 = vadd.f32 %v5394_v29, %v5370_v0  ;;  %v1128_v3 = vmul.f32 %v5394_v29, %v5394_v29  ;;  %v5408_v2 = vadd.f32 %v865_v40, %v5142_v25  ;;  %2400 = vmatprep.subr.bf16.mxu1 %v4537_v62  ;;  %v4538_v62 = vld [vmem:[%s6820_s5 + $0xd0] ss:$8 sps:$4 sm:$0xff]  }
 0x12e   : > { %v867_v57 = vpop.f32.mrf.mxu0  ;;  %v980_v61 = vpop.f32.mrf.mxu1  ;;  %v1052_v9 = vadd.f32 %v1051_v53, %v5391_v52  ;;  %v1191_v0 = vadd.f32 %v1190_v15, %v1122_v4  ;;  %v1195_v43 = vadd.f32 %v1194_v45, %v1125_v28  ;;  %2288 = vmatpush2.bf16.msra.mxu0 %v4532_v14  ;;  %2401 = vmatpush2.bf16.msra.mxu1 %v4535_v22  ;;  %v4541_v40 = vld [vmem:[%s6820_s5 + $0x1d0] ss:$8 sps:$4 sm:$0xff]  }
 0x12f   : > { %6948 = vst [vmem:[#allocation30_spill] sm:$0xff] %v5408_v2  ;;  %v5424_v29 = vadd.f32 %v976_v6, %v5151_v30  ;;  %v5427_v44 = vadd.f32 %v978_v48, %v5145_v26  ;;  %v5430_v53 = vadd.f32 %v867_v57, %v5148_v27  ;;  %v1126_v15 = vmul.f32 %v5391_v52, %v5391_v52 }
 0x130   : > { %2289 = vmatprep.subr.bf16.mxu0 %v4540_v7  ;;  %v1131_v14 = vmul.f32 %v5408_v2, %v5408_v2  ;;  %1053 = vadd.xlane.f32.xlu1 %v1052_v9  ;;  %v871_v22 = vpop.f32.mrf.mxu0  ;;  %v984_v28 = vpop.f32.mrf.mxu1  ;;  %v1056_v6 = vadd.f32 %v1055_v54, %v5373_v1  ;;  %v1199_v4 = vadd.f32 %v1128_v3, %v1127_v33  ;;  %v4549_v33 = vld [vmem:[%s6820_s5 + $0x1c4] ss:$8 sps:$4 sm:$0xff]  }
 0x131   : > { %6949 = vst [vmem:[#allocation31_spill] sm:$0xff] %v5424_v29  ;;  %6950 = vst [vmem:[#allocation32_spill] sm:$0xff] %v5427_v44  ;;  %1192 = vadd.xlane.f32.xlu0 %v1191_v0  ;;  %v1060_v48 = vadd.f32 %v5430_v53, %v5408_v2  ;;  %v1132_v45 = vmul.f32 %v5430_v53, %v5430_v53  ;;  %v5442_v57 = vadd.f32 %v871_v22, %v5142_v25  ;;  %v4546_v0 = vld [vmem:[%s6820_s5 + $0xc4] ss:$8 sps:$4 sm:$0xff]   ;;  %v4547_v22 = vld [vmem:[%s6820_s5 + $0x1c0] ss:$8 sps:$4 sm:$0xff]  }
 0x132   : > { %6951 = vst [vmem:[#allocation33_spill] sm:$0xff] %v5430_v53  ;;  %v5445_v7 = vadd.f32 %v984_v28, %v5145_v26  ;;  %2402 = vmatprep.subr.bf16.mxu1 %v4543_v50  ;;  %v873_v54 = vpop.f32.mrf.mxu0  ;;  %v986_v3 = vpop.f32.mrf.mxu1  ;;  %v1196_v9 = vadd.f32 %v1195_v43, %v1126_v15  ;;  %v1057_v53 = vadd.f32 %v1056_v6, %v5424_v29  ;;  %v4544_v50 = vld [vmem:[%s6820_s5 + $0xc0] ss:$8 sps:$4 sm:$0xff]  }
 0x133   : > { %6952 = vst [vmem:[#allocation34_spill] sm:$0xff] %v5442_v57  ;;  %v1200_v2 = vadd.f32 %v1199_v4, %v1129_v19  ;;  %2290 = vmatpush2.bf16.msra.mxu0 %v4538_v62  ;;  %2403 = vmatpush2.bf16.msra.mxu1 %v4541_v40  ;;  %v1133_v28 = vmul.f32 %v5427_v44, %v5427_v44 }
 0x134   : > { %6953 = vst [vmem:[#allocation35_spill] sm:$0xff] %v5445_v7  ;;  %v5463_v1 = vadd.f32 %v980_v61, %v5151_v30  ;;  %v5466_v43 = vadd.f32 %v873_v54, %v5148_v27  ;;  %v1130_v19 = vmul.f32 %v5424_v29, %v5424_v29  ;;  %2291 = vmatprep.subr.bf16.mxu0 %v4546_v0  ;;  %v875_v40 = vpop.f32.mrf.mxu0  ;;  %v988_v15 = vpop.f32.mrf.mxu1 }
 0x135   : > { %v1135_v62 = vmul.f32 %v5442_v57, %v5442_v57  ;;  %1197 = vadd.xlane.f32.xlu1 %v1196_v9  ;;  %1058 = vadd.xlane.f32.xlu0 %v1057_v53  ;;  %v1061_v6 = vadd.f32 %v1060_v48, %v5427_v44  ;;  %v1204_v4 = vadd.f32 %v1132_v45, %v1131_v14  ;;  %v4552_v53 = vld [vmem:[%s6820_s5 + $0xb4] ss:$8 sps:$4 sm:$0xff]  }
 0x136   : > { %6954 = vst [vmem:[#allocation36_spill] sm:$0xff] %v5463_v1  ;;  %6955 = vst [vmem:[#allocation37_spill] sm:$0xff] %v5466_v43  ;;  %v1137_v61 = vmul.f32 %v5445_v7, %v5445_v7  ;;  %v1065_v54 = vadd.f32 %v5466_v43, %v5442_v57  ;;  %v1136_v29 = vmul.f32 %v5466_v43, %v5466_v43  ;;  %2404 = vmatprep.subr.bf16.mxu1 %v4549_v33  ;;  %v4555_v14 = vld [vmem:[%s6820_s5 + $0x1b4] ss:$8 sps:$4 sm:$0xff]   ;;  %v877_v48 = vpop.f32.mrf.mxu0  ;;  %v990_v45 = vpop.f32.mrf.mxu1  ;;  %v4550_v33 = vld [vmem:[%s6820_s5 + $0xb0] ss:$8 sps:$4 sm:$0xff]  }
 0x137   : > { %v5480_v0 = vadd.f32 %v875_v40, %v5142_v25  ;;  %v1062_v9 = vadd.f32 %v1061_v6, %v5463_v1  ;;  %v1201_v57 = vadd.f32 %v1200_v2, %v1130_v19  ;;  %v1205_v44 = vadd.f32 %v1204_v4, %v1133_v28  ;;  %2292 = vmatpush2.bf16.msra.mxu0 %v4544_v50  ;;  %v4553_v40 = vld [vmem:[%s6820_s5 + $0x1b0] ss:$8 sps:$4 sm:$0xff]  }
 0x138   : > { %2405 = vmatpush2.bf16.msra.mxu1 %v4547_v22  ;;  %v5496_v43 = vadd.f32 %v986_v3, %v5151_v30  ;;  %v5499_v52 = vadd.f32 %v988_v15, %v5145_v26  ;;  %v5502_v6 = vadd.f32 %v877_v48, %v5148_v27  ;;  %v1134_v2 = vmul.f32 %v5463_v1, %v5463_v1  ;;  %v881_v22 = vpop.f32.mrf.mxu0  ;;  %v994_v28 = vpop.f32.mrf.mxu1 }
 0x139   : > { %6956 = vst [vmem:[#allocation38_spill] sm:$0xff] %v5480_v0  ;;  %2293 = vmatprep.subr.bf16.mxu0 %v4552_v53  ;;  %v1139_v50 = vmul.f32 %v5480_v0, %v5480_v0  ;;  %1063 = vadd.xlane.f32.xlu1 %v1062_v9  ;;  %v1066_v3 = vadd.f32 %v1065_v54, %v5445_v7 }
 0x13a   : > { %6957 = vst [vmem:[#allocation39_spill] sm:$0xff] %v5496_v43  ;;  %6958 = vst [vmem:[#allocation40_spill] sm:$0xff] %v5499_v52  ;;  %1202 = vadd.xlane.f32.xlu0 %v1201_v57  ;;  %v1209_v19 = vadd.f32 %v1136_v29, %v1135_v62  ;;  %v1070_v15 = vadd.f32 %v5502_v6, %v5480_v0  ;;  %v1140_v4 = vmul.f32 %v5502_v6, %v5502_v6  ;;  %v4558_v57 = vld [vmem:[%s6820_s5 + $0xa4] ss:$8 sps:$4 sm:$0xff]   ;;  %v883_v62 = vpop.f32.mrf.mxu0  ;;  %v996_v54 = vpop.f32.mrf.mxu1 }
 0x13b   : > { %6959 = vst [vmem:[#allocation41_spill] sm:$0xff] %v5502_v6  ;;  %v5514_v48 = vadd.f32 %v881_v22, %v5142_v25  ;;  %v5517_v53 = vadd.f32 %v994_v28, %v5145_v26  ;;  %2406 = vmatprep.subr.bf16.mxu1 %v4555_v14  ;;  %v4561_v29 = vld [vmem:[%s6820_s5 + $0x1a4] ss:$8 sps:$4 sm:$0xff]   ;;  %v1206_v9 = vadd.f32 %v1205_v44, %v1134_v2  ;;  %v4556_v14 = vld [vmem:[%s6820_s5 + $0xa0] ss:$8 sps:$4 sm:$0xff]  }
 0x13c   : > { %v1067_v6 = vadd.f32 %v1066_v3, %v5496_v43  ;;  %v1210_v0 = vadd.f32 %v1209_v19, %v1137_v61  ;;  %2294 = vmatpush2.bf16.msra.mxu0 %v4550_v33  ;;  %2407 = vmatpush2.bf16.msra.mxu1 %v4553_v40  ;;  %v4559_v22 = vld [vmem:[%s6820_s5 + $0x1a0] ss:$8 sps:$4 sm:$0xff]   ;;  %v1141_v28 = vmul.f32 %v5499_v52, %v5499_v52  ;;  %v885_v40 = vpop.f32.mrf.mxu0  ;;  %v998_v2 = vpop.f32.mrf.mxu1 }
 0x13d   : > { %6960 = vst [vmem:[#allocation42_spill] sm:$0xff] %v5514_v48  ;;  %6961 = vst [vmem:[#allocation43_spill] sm:$0xff] %v5517_v53  ;;  %v5535_v7 = vadd.f32 %v990_v45, %v5151_v30  ;;  %v5538_v44 = vadd.f32 %v883_v62, %v5148_v27  ;;  %v1138_v61 = vmul.f32 %v5496_v43, %v5496_v43  ;;  %2295 = vmatprep.subr.bf16.mxu0 %v4558_v57 }
 0x13e   : > { %v1143_v33 = vmul.f32 %v5514_v48, %v5514_v48  ;;  %1207 = vadd.xlane.f32.xlu1 %v1206_v9  ;;  %1068 = vadd.xlane.f32.xlu0 %v1067_v6  ;;  %v1071_v3 = vadd.f32 %v1070_v15, %v5499_v52  ;;  %v1214_v19 = vadd.f32 %v1140_v4, %v1139_v50  ;;  %v4564_v6 = vld [vmem:[%s6820_s5 + $0x94] ss:$8 sps:$4 sm:$0xff]   ;;  %v887_v15 = vpop.f32.mrf.mxu0  ;;  %v1000_v4 = vpop.f32.mrf.mxu1 }
 0x13f   : > { %6962 = vst [vmem:[#allocation44_spill] sm:$0xff] %v5535_v7  ;;  %6963 = vst [vmem:[#allocation45_spill] sm:$0xff] %v5538_v44  ;;  %v1145_v45 = vmul.f32 %v5517_v53, %v5517_v53  ;;  %v1075_v62 = vadd.f32 %v5538_v44, %v5514_v48  ;;  %v1144_v43 = vmul.f32 %v5538_v44, %v5538_v44  ;;  %2408 = vmatprep.subr.bf16.mxu1 %v4561_v29  ;;  %v4567_v50 = vld [vmem:[%s6820_s5 + $0x194] ss:$8 sps:$4 sm:$0xff]   ;;  %v4562_v29 = vld [vmem:[%s6820_s5 + $0x90] ss:$8 sps:$4 sm:$0xff]  }
 0x140   : > { %v5552_v57 = vadd.f32 %v885_v40, %v5142_v25  ;;  %v1072_v9 = vadd.f32 %v1071_v3, %v5535_v7  ;;  %v1211_v48 = vadd.f32 %v1210_v0, %v1138_v61  ;;  %v1215_v52 = vadd.f32 %v1214_v19, %v1141_v28  ;;  %2296 = vmatpush2.bf16.msra.mxu0 %v4556_v14  ;;  %v4565_v40 = vld [vmem:[%s6820_s5 + $0x190] ss:$8 sps:$4 sm:$0xff]   ;;  %v1004_v28 = vpop.f32.mrf.mxu1 }
 0x141   : > { %2409 = vmatpush2.bf16.msra.mxu1 %v4559_v22  ;;  %v5568_v44 = vadd.f32 %v996_v54, %v5151_v30  ;;  %v5571_v1 = vadd.f32 %v998_v2, %v5145_v26  ;;  %v5574_v3 = vadd.f32 %v887_v15, %v5148_v27  ;;  %v1142_v0 = vmul.f32 %v5535_v7, %v5535_v7  ;;  %v891_v22 = vpop.f32.mrf.mxu0 }
 0x142   : > { %6964 = vst [vmem:[#allocation46_spill] sm:$0xff] %v5552_v57  ;;  %2297 = vmatprep.subr.bf16.mxu0 %v4564_v6  ;;  %v1147_v14 = vmul.f32 %v5552_v57, %v5552_v57  ;;  %1073 = vadd.xlane.f32.xlu1 %v1072_v9  ;;  %v1076_v54 = vadd.f32 %v1075_v62, %v5517_v53  ;;  %v1006_v62 = vpop.f32.mrf.mxu1 }
 0x143   : > { %6965 = vst [vmem:[#allocation47_spill] sm:$0xff] %v5568_v44  ;;  %6966 = vst [vmem:[#allocation48_spill] sm:$0xff] %v5574_v3  ;;  %1212 = vadd.xlane.f32.xlu0 %v1211_v48  ;;  %v1219_v61 = vadd.f32 %v1144_v43, %v1143_v33  ;;  %v1080_v2 = vadd.f32 %v5574_v3, %v5552_v57  ;;  %v1148_v19 = vmul.f32 %v5574_v3, %v5574_v3  ;;  %v4570_v48 = vld [vmem:[%s6820_s5 + $0x84] ss:$8 sps:$4 sm:$0xff]   ;;  %v893_v33 = vpop.f32.mrf.mxu0 }
 0x144   : > { %v5586_v15 = vadd.f32 %v891_v22, %v5142_v25  ;;  %v5589_v6 = vadd.f32 %v1004_v28, %v5145_v26  ;;  %2410 = vmatprep.subr.bf16.mxu1 %v4567_v50  ;;  %v4573_v43 = vld [vmem:[%s6820_s5 + $0x184] ss:$8 sps:$4 sm:$0xff]   ;;  %v1216_v9 = vadd.f32 %v1215_v52, %v1142_v0  ;;  %v1077_v3 = vadd.f32 %v1076_v54, %v5568_v44  ;;  %v4568_v50 = vld [vmem:[%s6820_s5 + $0x80] ss:$8 sps:$4 sm:$0xff]   ;;  %v1008_v0 = vpop.f32.mrf.mxu1 }
 0x145   : > { %v1220_v57 = vadd.f32 %v1219_v61, %v1145_v45  ;;  %2298 = vmatpush2.bf16.msra.mxu0 %v4562_v29  ;;  %2411 = vmatpush2.bf16.msra.mxu1 %v4565_v40  ;;  %v4571_v22 = vld [vmem:[%s6820_s5 + $0x180] ss:$8 sps:$4 sm:$0xff]   ;;  %v1149_v28 = vmul.f32 %v5571_v1, %v5571_v1  ;;  %v5607_v53 = vadd.f32 %v1000_v4, %v5151_v30  ;;  %v895_v40 = vpop.f32.mrf.mxu0 }
 0x146   : > { %6967 = vst [vmem:[#allocation49_spill] sm:$0xff] %v5589_v6  ;;  %v5610_v52 = vadd.f32 %v893_v33, %v5148_v27  ;;  %v1146_v45 = vmul.f32 %v5568_v44, %v5568_v44  ;;  %2299 = vmatprep.subr.bf16.mxu0 %v4570_v48  ;;  %v1151_v29 = vmul.f32 %v5586_v15, %v5586_v15 }
 0x147   : > { %1217 = vadd.xlane.f32.xlu1 %v1216_v9  ;;  %1078 = vadd.xlane.f32.xlu0 %v1077_v3  ;;  %v1081_v54 = vadd.f32 %v1080_v2, %v5571_v1  ;;  %v1224_v61 = vadd.f32 %v1148_v19, %v1147_v14  ;;  %v1153_v4 = vmul.f32 %v5589_v6, %v5589_v6  ;;  %v897_v9 = vpop.f32.mrf.mxu0 }
 0x148   : > { %v1085_v33 = vadd.f32 %v5610_v52, %v5586_v15  ;;  %v1152_v44 = vmul.f32 %v5610_v52, %v5610_v52  ;;  %v5624_v48 = vadd.f32 %v895_v40, %v5142_v25  ;;  %2412 = vmatprep.subr.bf16.mxu1 %v4573_v43  ;;  %v1221_v7 = vadd.f32 %v1220_v57, %v1146_v45  ;;  %v1010_v43 = vpop.f32.mrf.mxu1 }
 0x149   : > { %v1082_v3 = vadd.f32 %v1081_v54, %v5607_v53  ;;  %v1225_v8 = vadd.f32 %v1224_v61, %v1149_v28  ;;  %2300 = vmatpush2.bf16.msra.mxu0 %v4568_v50  ;;  %2413 = vmatpush2.bf16.msra.mxu1 %v4571_v22  ;;  %v5628_v14 = vadd.f32 %v1006_v62, %v5151_v30 }
 0x14a   : > { %6968 = vst [vmem:[#allocation50_spill] sm:$0xff] %v5624_v48  ;;  %v5631_v2 = vadd.f32 %v897_v9, %v5148_v27  ;;  %v1150_v19 = vmul.f32 %v5607_v53, %v5607_v53  ;;  %v5636_v25 = vadd.f32 %v1008_v0, %v5145_v26  ;;  %v1086_v57 = vadd.f32 %v1085_v33, %v5589_v6 }
 0x14b   : > { %1083 = vadd.xlane.f32.xlu1 %v1082_v3  ;;  %1222 = vadd.xlane.f32.xlu0 %v1221_v7  ;;  %v1229_v28 = vadd.f32 %v1152_v44, %v1151_v29  ;;  %v1155_v50 = vmul.f32 %v5624_v48, %v5624_v48  ;;  %v5647_v40 = vadd.f32 %v1010_v43, %v5151_v30 }
 0x14c   : > { %6969 = vst [vmem:[#allocation51_spill] sm:$0xff] %v5631_v2  ;;  %6970 = vst [vmem:[#allocation52_spill] sm:$0xff] %v5636_v25  ;;  %v1090_v62 = vadd.f32 %v5631_v2, %v5624_v48  ;;  %v1156_v27 = vmul.f32 %v5631_v2, %v5631_v2  ;;  %v1226_v22 = vadd.f32 %v1225_v8, %v1150_v19 }
 0x14d   : > { %v1087_v45 = vadd.f32 %v1086_v57, %v5628_v14  ;;  %v1230_v26 = vadd.f32 %v1229_v28, %v1153_v4  ;;  %6971 = vst [vmem:[#allocation53_spill] sm:$0xff] %v5647_v40  ;;  %v1157_v44 = vmul.f32 %v5636_v25, %v5636_v25  ;;  %v1154_v29 = vmul.f32 %v5628_v14, %v5628_v14 }
 0x14e   : > { %v1091_v7 = vadd.f32 %v1090_v62, %v5636_v25  ;;  %v1234_v0 = vadd.f32 %v1156_v27, %v1155_v50  ;;  %v1158_v30 = vmul.f32 %v5647_v40, %v5647_v40  ;;  %v1013_v27 = vld [vmem:[%s6818_s3] sm:$0xf] }
 0x14f   : > { %1227 = vadd.xlane.f32.xlu1 %v1226_v22  ;;  %1088 = vadd.xlane.f32.xlu0 %v1087_v45  ;;  %v1231_v8 = vadd.f32 %v1230_v26, %v1154_v29 }
 0x150   : > { %v1092_v54 = vadd.f32 %v1091_v7, %v5647_v40  ;;  %v1235_v61 = vadd.f32 %v1234_v0, %v1157_v44  ;;  %v1014_v0 = vld [vmem:[%s6819_s4] sm:$0xf] }
 0x152   : > { %v1236_v4 = vadd.f32 %v1235_v61, %v1158_v30  ;;  %v5677_v61 = vrot.slane %v1013_v27, %v5132_v21  ;;  %v5680_v30 = vrot.slane %v1014_v0, %v5132_v21  ;;  %v5693_v21 = vrot.slane %v1014_v0, %v5137_v23 }
 0x153   : > { %1093 = vadd.xlane.f32.xlu1 %v1092_v54  ;;  %1232 = vadd.xlane.f32.xlu0 %v1231_v8  ;;  %v5674_v8 = vrot.slane %v1013_v27, %v5130_v20 }
 0x157   : > { %1237 = vadd.xlane.f32.xlu1 %v1236_v4 }
 0x19d   : > { %v1019_v33 = vpop.xlane.xlu0 %1018 }
 0x19e   : > { %v5657_v9 = vmul.f32 0.001953125, %v1019_v33 }
 0x19f   : > { %v1163_v3 = vpop.xlane.xlu1 %1162 }
 0x1a0   : > { %v1255_v19 = vmul.f32 0.001953125, %v1163_v3  ;;  %v1271_v43 = vmul.f32 %v5657_v9, %v5657_v9 }
 0x1a1   : > { %v1024_v57 = vpop.xlane.xlu0 %1023 }
 0x1a2   : > { %v5661_v28 = vmul.f32 0.001953125, %v1024_v57  ;;  %v1287_v50 = vsub.f32 %v1255_v19, %v1271_v43  ;;  %v5683_v19 = vrot.slane %v1013_v27, %v5139_v24 }
 0x1a3   : > { %v1168_v62 = vpop.xlane.xlu1 %1167 }
 0x1a4   : > { %v1303_v22 = vmax.f32 %v1287_v50, 0.0  ;;  %v1256_v45 = vmul.f32 0.001953125, %v1168_v62  ;;  %v1272_v26 = vmul.f32 %v5661_v28, %v5661_v28  ;;  %v5688_v50 = vrot.slane %v1013_v27, %v5137_v23 }
 0x1a5   : > { %v1029_v7 = vpop.xlane.xlu0 %1028 }
 0x1a6   : > { %v1383_v44 = vadd.f32 1e-05, %v1303_v22  ;;  %v1288_v29 = vsub.f32 %v1256_v45, %v1272_v26  ;;  %v5671_v54 = vmul.f32 0.001953125, %v1029_v7  ;;  %v5696_v45 = vrot.slane %v1014_v0, %v5139_v24 }
 0x1a7   : > { %v1319_v26 = vsub.f32 %v5154_v31, %v5657_v9  ;;  %v1320_v7 = vsub.f32 %v5160_v35, %v5657_v9  ;;  %v1324_v31 = vsub.f32 %v5177_v46, %v5661_v28 }
 0x1a8   : > { %4602 = vrsqrt.f32 %v1383_v44  ;;  %v1304_v4 = vmax.f32 %v1288_v29, 0.0  ;;  %v1034_v33 = vpop.xlane.xlu1 %1033  ;;  %v1273_v22 = vmul.f32 %v5671_v54, %v5671_v54  ;;  %v5705_v44 = vrot.slane %v1014_v0, %v5130_v20 }
 0x1a9   : > { %v1173_v3 = vpop.xlane.xlu0 %1172  ;;  %v5685_v43 = vmul.f32 0.001953125, %v1034_v33  ;;  %v1322_v29 = vsub.f32 %v5163_v36, %v5657_v9  ;;  %v1326_v36 = vsub.f32 %v5190_v55, %v5661_v28 }
 0x1aa   : > { %v1257_v57 = vmul.f32 0.001953125, %v1173_v3  ;;  %v1384_v62 = vadd.f32 1e-05, %v1304_v4 }
 0x1ab   : > { %v1274_v0 = vmul.f32 %v5685_v43, %v5685_v43 }
 0x1ac   : > { %4604 = vrsqrt.f32 %v1384_v62  ;;  %v1289_v24 = vsub.f32 %v1257_v57, %v1273_v22  ;;  %v1178_v33 = vpop.xlane.xlu1 %1177 }
 0x1ad   : > { %v1039_v3 = vpop.xlane.xlu0 %1038  ;;  %v1258_v27 = vmul.f32 0.001953125, %v1178_v33 }
 0x1ae   : > { %v1305_v62 = vmax.f32 %v1289_v24, 0.0  ;;  %v5721_v57 = vmul.f32 0.001953125, %v1039_v3 }
 0x1af   : > { %v1290_v23 = vsub.f32 %v1258_v27, %v1274_v0 }
 0x1b0   : > { %v1385_v3 = vadd.f32 1e-05, %v1305_v62  ;;  %v1044_v4 = vpop.xlane.xlu1 %1043  ;;  %v1275_v62 = vmul.f32 %v5721_v57, %v5721_v57 }
 0x1b1   : > { %v1183_v20 = vpop.xlane.xlu0 %1182  ;;  %v1306_v46 = vmax.f32 %v1290_v23, 0.0  ;;  %v5737_v40 = vmul.f32 0.001953125, %v1044_v4 }
 0x1b2   : > { %v1259_v35 = vmul.f32 0.001953125, %v1183_v20  ;;  %4606 = vrsqrt.f32 %v1385_v3 }
 0x1b3   : > { %v1386_v24 = vadd.f32 1e-05, %v1306_v46  ;;  %v1276_v46 = vmul.f32 %v5737_v40, %v5737_v40 }
 0x1b4   : > { %v1291_v0 = vsub.f32 %v1259_v35, %v1275_v62  ;;  %v1188_v22 = vpop.xlane.xlu1 %1187 }
 0x1b5   : > { %v1049_v55 = vpop.xlane.xlu0 %1048  ;;  %v5757_v3 = vpop.eup %4602  ;;  %4608 = vrsqrt.f32 %v1386_v24  ;;  %v1260_v23 = vmul.f32 0.001953125, %v1188_v22 }
 0x1b6   : > { %v5761_v20 = vmul.f32 0.001953125, %v1049_v55  ;;  %v1307_v25 = vmax.f32 %v1291_v0, 0.0  ;;  %v1416_v4 = vmul.f32 %v5757_v3, %v1320_v7  ;;  %v1418_v27 = vmul.f32 %v5757_v3, %v1322_v29 }
 0x1b7   : > { %v5766_v2 = vmul.f32 %v5757_v3, %v1319_v26  ;;  %v1292_v35 = vsub.f32 %v1260_v23, %v1276_v46 }
 0x1b8   : > { %6972 = vst [vmem:[#allocation54_spill] sm:$0xff] %v5761_v20  ;;  %v1387_v55 = vadd.f32 1e-05, %v1307_v25  ;;  %v1277_v29 = vmul.f32 %v5761_v20, %v5761_v20  ;;  %v1501_v23 = vmul.f32 %v5688_v50, %v1416_v4  ;;  %v1503_v34 = vmul.f32 %v5683_v19, %v1418_v27 }
 0x1b9   : > { %v1054_v7 = vpop.xlane.xlu1 %1053  ;;  %v5779_v46 = vpop.eup %4604  ;;  %v1308_v62 = vmax.f32 %v1292_v35, 0.0 }
 0x1ba   : > { %v1193_v26 = vpop.xlane.xlu0 %1192  ;;  %v5781_v33 = vmul.f32 0.001953125, %v1054_v7  ;;  %4610 = vrsqrt.f32 %v1387_v55  ;;  %v1420_v25 = vmul.f32 %v5779_v46, %v1324_v31  ;;  %v1586_v22 = vadd.f32 %v5693_v21, %v1501_v23 }
 0x1bb   : > { %v1261_v24 = vmul.f32 0.001953125, %v1193_v26  ;;  %v1422_v0 = vmul.f32 %v5779_v46, %v1326_v36  ;;  %v1388_v37 = vadd.f32 1e-05, %v1308_v62  ;;  %v4574_v26 = vld [vmem:[#allocation5 + $0x78] sm:$0xff]  }
 0x1bc   : > { %6973 = vst [vmem:[#allocation55_spill] sm:$0xff] %v5781_v33  ;;  %v1278_v31 = vmul.f32 %v5781_v33, %v5781_v33  ;;  %v1505_v36 = vmul.f32 %v5688_v50, %v1420_v25  ;;  %vm1650_vm2 = vcmp.gt.f32.partialorder %v1586_v22, 0.0  ;;  %v1714_v7 = vmul.f32 0.02, %v1586_v22  ;;  %4192 = vmatprep.subr.bf16.mxu0 %v4574_v26 }
 0x1bd   : > { %v1293_v55 = vsub.f32 %v1261_v24, %v1277_v29  ;;  %4612 = vrsqrt.f32 %v1388_v37  ;;  %v1507_v35 = vmul.f32 %v5683_v19, %v1422_v0  ;;  %v1588_v37 = vadd.f32 %v5696_v45, %v1503_v34 }
 0x1be   : > { %v1198_v23 = vpop.xlane.xlu1 %1197  ;;  %v1059_v48 = vpop.xlane.xlu0 %1058  ;;  %v1590_v41 = vadd.f32 %v5693_v21, %v1505_v36 }
 0x1bf   : > { %v1262_v62 = vmul.f32 0.001953125, %v1198_v23  ;;  %v5798_v20 = vmul.f32 0.001953125, %v1059_v48  ;;  %v1309_v60 = vmax.f32 %v1293_v55, 0.0  ;;  %v5808_v23 = vpop.eup %4606  ;;  %v1592_v4 = vadd.f32 %v5696_v45, %v1507_v35 }
 0x1c0   : > { %vm1654_vm3 = vcmp.gt.f32.partialorder %v1590_v41, 0.0  ;;  %v1718_v33 = vmul.f32 0.02, %v1590_v41  ;;  %vm1652_vm4 = vcmp.gt.f32.partialorder %v1588_v37, 0.0  ;;  %v1716_v55 = vmul.f32 0.02, %v1588_v37 }
 0x1c1   : > { %6978 = vst [vmem:[#allocation56_spill] sm:$0xff] %v5798_v20  ;;  %v1294_v27 = vsub.f32 %v1262_v62, %v1278_v31  ;;  %v1389_v48 = vadd.f32 1e-05, %v1309_v60  ;;  %v1279_v0 = vmul.f32 %v5798_v20, %v5798_v20  ;;  %v1778_v60 = vsel %vm1650_vm2, %v1586_v22, %v1714_v7 }
 0x1c2   : > { %v1064_v36 = vpop.xlane.xlu1 %1063  ;;  %v5816_v12 = vpop.eup %4608  ;;  %v1782_v35 = vsel %vm1654_vm3, %v1590_v41, %v1718_v33  ;;  %vm1656_vm5 = vcmp.gt.f32.partialorder %v1592_v4, 0.0  ;;  %v1720_v39 = vmul.f32 0.02, %v1592_v4  ;;  %v1500_v33 = vmul.f32 %v5674_v8, %v5766_v2 }
 0x1c3   : > { %v1203_v31 = vpop.xlane.xlu0 %1202  ;;  %v1310_v62 = vmax.f32 %v1294_v27, 0.0  ;;  %v5814_v29 = vmul.f32 0.001953125, %v1064_v36  ;;  %4614 = vrsqrt.f32 %v1389_v48  ;;  %v6985_v27 = vld [vmem:[#allocation33_spill] sm:$0xff]  ;;  %v1842_v20 = vpack.c.bf16 %v1782_v35, %v1778_v60 }
 0x1c4   : > { %v1263_v24 = vmul.f32 0.001953125, %v1203_v31  ;;  %v1780_v60 = vsel %vm1652_vm4, %v1588_v37, %v1716_v55  ;;  %v1585_v37 = vadd.f32 %v5705_v44, %v1500_v33  ;;  %v6994_v55 = vsub.f32 %v5180_v47, %v5661_v28 }
 0x1c5   : > { %6983 = vst [vmem:[#allocation57_spill] sm:$0xff] %v5814_v29  ;;  %v1390_v25 = vadd.f32 1e-05, %v1310_v62  ;;  %v1280_v34 = vmul.f32 %v5814_v29, %v5814_v29  ;;  %2301 = vmatprep.mubr.bf16.mxu0 %v1842_v20  ;;  %v6999_v48 = vsub.f32 %v5202_v63, %v5671_v54  ;;  %v4581_v63 = vld [vmem:[#allocation5 + $0x20] sm:$0xff]  }
 0x1c6   : > { %v1295_v38 = vsub.f32 %v1263_v24, %v1279_v0  ;;  %v6988_v0 = vsub.f32 %v5172_v42, %v5661_v28  ;;  %v6991_v42 = vld [vmem:[#allocation37_spill] sm:$0xff]  ;;  %vm1649_vm6 = vcmp.gt.f32.partialorder %v1585_v37, 0.0 }
 0x1c7   : > { %v1208_v22 = vpop.xlane.xlu1 %1207  ;;  %v1069_v7 = vpop.xlane.xlu0 %1068  ;;  %4616 = vrsqrt.f32 %v1390_v25 }
 0x1c8   : > { %v1264_v62 = vmul.f32 0.001953125, %v1208_v22  ;;  %v1311_v36 = vmax.f32 %v1295_v38, 0.0  ;;  %v5832_v26 = vpop.eup %4610  ;;  %v5834_v24 = vmul.f32 0.001953125, %v1069_v7  ;;  %v1419_v41 = vmul.f32 %v5779_v46, %v6988_v0 }
 0x1c9   : > { %v1784_v38 = vsel %vm1656_vm5, %v1592_v4, %v1720_v39  ;;  %v6989_v22 = vsub.f32 %v5157_v32, %v5657_v9  ;;  %v6993_v32 = vld [vmem:[#allocation39_spill] sm:$0xff] }
 0x1ca   : > { %v1296_v31 = vsub.f32 %v1264_v62, %v1280_v34  ;;  %v1391_v25 = vadd.f32 1e-05, %v1311_v36  ;;  %v1844_v20 = vpack.c.bf16 %v1784_v38, %v1780_v60  ;;  %v5850_v29 = vpop.eup %4612  ;;  %v1421_v36 = vmul.f32 %v5779_v46, %v6994_v55  ;;  %v4575_v46 = vld [vmem:[#allocation5 + $0x38] sm:$0xff]  }
 0x1cb   : > { %v1417_v35 = vmul.f32 %v5757_v3, %v6989_v22  ;;  %v1074_v0 = vpop.xlane.xlu1 %1073  ;;  %v1504_v3 = vmul.f32 %v5674_v8, %v1419_v41  ;;  %v1281_v38 = vmul.f32 %v5834_v24, %v5834_v24  ;;  %v1713_v41 = vmul.f32 0.02, %v1585_v37 }
 0x1cc   : > { %v1312_v34 = vmax.f32 %v1296_v31, 0.0  ;;  %v1213_v5 = vpop.xlane.xlu0 %1212  ;;  %4618 = vrsqrt.f32 %v1391_v25  ;;  %2414 = vmatprep.mubr.bf16.mxu1 %v1844_v20  ;;  %v5864_v60 = vmul.f32 0.001953125, %v1074_v0  ;;  %v1506_v33 = vmul.f32 %v5677_v61, %v1421_v36 }
 0x1cd   : > { %v1502_v31 = vmul.f32 %v5677_v61, %v1417_v35  ;;  %v1589_v25 = vadd.f32 %v5705_v44, %v1504_v3  ;;  %v1265_v22 = vmul.f32 0.001953125, %v1213_v5  ;;  %v1777_v20 = vsel %vm1649_vm6, %v1585_v37, %v1713_v41  ;;  %v6996_v3 = vld [vmem:[#allocation41_spill] sm:$0xff] }
 0x1ce   : > { %v1392_v4 = vadd.f32 1e-05, %v1312_v34  ;;  %v1591_v0 = vadd.f32 %v5680_v30, %v1506_v33  ;;  %v4576_v33 = vld [vmem:[#allocation5 + $0x70] sm:$0xff]   ;;  %v1282_v55 = vmul.f32 %v5864_v60, %v5864_v60 }
 0x1cf   : > { %vm1653_vm7 = vcmp.gt.f32.partialorder %v1589_v25, 0.0  ;;  %v1717_v34 = vmul.f32 0.02, %v1589_v25  ;;  %v1587_v47 = vadd.f32 %v5680_v30, %v1502_v31  ;;  %v1297_v41 = vsub.f32 %v1265_v22, %v1281_v38 }
 0x1d0   : > { %4620 = vrsqrt.f32 %v1392_v4  ;;  %v5872_v35 = vpop.eup %4614  ;;  %v1218_v2 = vpop.xlane.xlu1 %1217  ;;  %vm1655_vm9 = vcmp.gt.f32.partialorder %v1591_v0, 0.0  ;;  %v1719_v37 = vmul.f32 0.02, %v1591_v0  ;;  %v7000_v38 = vsub.f32 %v5228_v18, %v5685_v43 }
 0x1d1   : > { %v1079_v36 = vpop.xlane.xlu0 %1078  ;;  %v1781_v62 = vsel %vm1653_vm7, %v1589_v25, %v1717_v34  ;;  %vm1651_vm8 = vcmp.gt.f32.partialorder %v1587_v47, 0.0  ;;  %v1715_v9 = vmul.f32 0.02, %v1587_v47  ;;  %v1266_v4 = vmul.f32 0.001953125, %v1218_v2  ;;  %v4580_v2 = vld [vmem:[#allocation5 + $0x60] sm:$0xff]  }
 0x1d2   : > { %v1841_v39 = vpack.c.bf16 %v1781_v62, %v1777_v20  ;;  %v5885_v7 = vmul.f32 0.001953125, %v1079_v36  ;;  %v1783_v25 = vsel %vm1655_vm9, %v1591_v0, %v1719_v37  ;;  %v1313_v34 = vmax.f32 %v1297_v41, 0.0  ;;  %v7001_v20 = vld [vmem:[#allocation42_spill] sm:$0xff]  ;;  %v7002_v36 = vld [vmem:[#allocation45_spill] sm:$0xff]  ;;  %v4577_v0 = vld [vmem:[#allocation5 + $0x30] sm:$0xff]  }
 0x1d3   : > { %v1779_v5 = vsel %vm1651_vm8, %v1587_v47, %v1715_v9  ;;  %v1424_v62 = vmul.f32 %v5808_v23, %v6999_v48  ;;  %v1428_v22 = vmul.f32 %v5816_v12, %v7000_v38  ;;  %v1298_v47 = vsub.f32 %v1266_v4, %v1282_v55  ;;  %v7004_v48 = vld [vmem:[#allocation47_spill] sm:$0xff] }
 0x1d4   : > { %v5881_v28 = vpop.eup %4616  ;;  %2302 = vmatmul.mubr.bf16.vlgmr.msra.gmra.mxu0 %v1841_v39  ;;  %v1843_v9 = vpack.c.bf16 %v1783_v25, %v1779_v5  ;;  %v1393_v37 = vadd.f32 1e-05, %v1313_v34  ;;  %v4578_v5 = vld [vmem:[#allocation5 + $0x68] sm:$0xff]   ;;  %v7005_v25 = vsub.f32 %v5222_v16, %v5671_v54  ;;  %v7006_v34 = vsub.f32 %v5252_v51, %v5685_v43  ;;  %v1084_v31 = vpop.xlane.xlu1 %1083 }
 0x1d5   : > { %4193 = vmatpush3.bf16.msra.mxu0 %v4575_v46  ;;  %v1509_v18 = vmul.f32 %v5688_v50, %v1424_v62  ;;  %v1314_v4 = vmax.f32 %v1298_v47, 0.0  ;;  %v1513_v55 = vmul.f32 %v5688_v50, %v1428_v22  ;;  %v7007_v62 = vsub.f32 %v5193_v56, %v5671_v54 }
 0x1d6   : > { %4194 = vmatprep.subr.bf16.mxu0 %v4576_v33  ;;  %2415 = vmatmul.mubr.bf16.vlgmr.msra.gmra.mxu1 %v1843_v9  ;;  %v1426_v46 = vmul.f32 %v5808_v23, %v7005_v25  ;;  %v1430_v38 = vmul.f32 %v5816_v12, %v7006_v34  ;;  %4622 = vrsqrt.f32 %v1393_v37  ;;  %v7008_v16 = vsub.f32 %v5218_v11, %v5685_v43  ;;  %v4579_v37 = vld [vmem:[#allocation5 + $0x28] sm:$0xff]  }
 0x1d7   : > { %v1594_v33 = vadd.f32 %v5693_v21, %v1509_v18  ;;  %v1423_v22 = vmul.f32 %v5808_v23, %v7007_v62  ;;  %v1394_v47 = vadd.f32 1e-05, %v1314_v4  ;;  %v1598_v51 = vadd.f32 %v5693_v21, %v1513_v55 }
 0x1d8   : > { %v1427_v9 = vmul.f32 %v5816_v12, %v7008_v16  ;;  %v1511_v25 = vmul.f32 %v5683_v19, %v1426_v46  ;;  %v1515_v34 = vmul.f32 %v5683_v19, %v1430_v38 }
 0x1d9   : > { %v5913_v41 = vpop.eup %4618  ;;  %4195 = vmatpush3.bf16.msra.mxu0 %v4577_v0  ;;  %vm1658_vm10 = vcmp.gt.f32.partialorder %v1594_v33, 0.0  ;;  %v1722_v18 = vmul.f32 0.02, %v1594_v33  ;;  %v1508_v56 = vmul.f32 %v5674_v8, %v1423_v22  ;;  %4624 = vrsqrt.f32 %v1394_v47  ;;  %v1223_v22 = vpop.xlane.xlu0 %1222 }
 0x1da   : > { %v1512_v62 = vmul.f32 %v5674_v8, %v1427_v9  ;;  %4196 = vmatprep.subr.bf16.mxu0 %v4578_v5  ;;  %vm1662_vm11 = vcmp.gt.f32.partialorder %v1598_v51, 0.0  ;;  %v1726_v4 = vmul.f32 0.02, %v1598_v51  ;;  %v1596_v55 = vadd.f32 %v5696_v45, %v1511_v25 }
 0x1db   : > { %v1786_v46 = vsel %vm1658_vm10, %v1594_v33, %v1722_v18  ;;  %v1600_v38 = vadd.f32 %v5696_v45, %v1515_v34  ;;  %v1593_v0 = vadd.f32 %v5705_v44, %v1508_v56  ;;  %v7009_v9 = vsub.f32 %v5198_v58, %v5671_v54  ;;  %v4582_v34 = vld [vmem:[#allocation5 + $0x58] sm:$0xff]  }
 0x1dc   : > { %v1597_v16 = vadd.f32 %v5705_v44, %v1512_v62  ;;  %v1790_v39 = vsel %vm1662_vm11, %v1598_v51, %v1726_v4  ;;  %vm1660_vm12 = vcmp.gt.f32.partialorder %v1596_v55, 0.0  ;;  %v1724_v5 = vmul.f32 0.02, %v1596_v55 }
 0x1dd   : > { %v5929_v11 = vpop.eup %4620  ;;  %v1425_v47 = vmul.f32 %v5808_v23, %v7009_v9  ;;  %4197 = vmatpush3.bf16.msra.mxu0 %v4579_v37  ;;  %v1846_v25 = vpack.c.bf16 %v1790_v39, %v1786_v46  ;;  %vm1664_vm13 = vcmp.gt.f32.partialorder %v1600_v38, 0.0  ;;  %v1728_v33 = vmul.f32 0.02, %v1600_v38 }
 0x1de   : > { %vm1657_vm14 = vcmp.gt.f32.partialorder %v1593_v0, 0.0  ;;  %4198 = vmatprep.subr.bf16.mxu0 %v4580_v2  ;;  %v1788_v18 = vsel %vm1660_vm12, %v1596_v55, %v1724_v5  ;;  %vm1661_vm15 = vcmp.gt.f32.partialorder %v1597_v16, 0.0  ;;  %v1721_v56 = vmul.f32 0.02, %v1593_v0  ;;  %v4583_v55 = vld [vmem:[#allocation5 + $0x18] sm:$0xff]  }
 0x1df   : > { %v1725_v62 = vmul.f32 0.02, %v1597_v16  ;;  %2311 = vmatprep.mubr.bf16.mxu0 %v1846_v25  ;;  %v1792_v51 = vsel %vm1664_vm13, %v1600_v38, %v1728_v33  ;;  %v7010_v4 = vsub.f32 %v5225_v17, %v5685_v43  ;;  %v1510_v54 = vmul.f32 %v5677_v61, %v1425_v47  ;;  %v7011_v17 = vld [vmem:[#allocation46_spill] sm:$0xff]  ;;  %v1228_v43 = vpop.xlane.xlu1 %1227  ;;  %v1089_v47 = vpop.xlane.xlu0 %1088 }
 0x1e0   : > { %v5944_v23 = vmul.f32 0.001953125, %v1084_v31  ;;  %v1848_v39 = vpack.c.bf16 %v1792_v51, %v1788_v18  ;;  %v1785_v37 = vsel %vm1657_vm14, %v1593_v0, %v1721_v56  ;;  %v1283_v2 = vmul.f32 %v5885_v7, %v5885_v7  ;;  %v4584_v31 = vld [vmem:[#allocation5 + $0x50] sm:$0xff]   ;;  %v7012_v0 = vld [vmem:[#allocation48_spill] sm:$0xff] }
 0x1e1   : > { %v1429_v58 = vmul.f32 %v5816_v12, %v7010_v4  ;;  %v1789_v46 = vsel %vm1661_vm15, %v1597_v16, %v1725_v62  ;;  %4199 = vmatpush3.bf16.msra.mxu0 %v4581_v63  ;;  %v1595_v9 = vadd.f32 %v5680_v30, %v1510_v54  ;;  %v1267_v33 = vmul.f32 0.001953125, %v1223_v22  ;;  %v4585_v22 = vld [vmem:[#allocation5 + $0x10] sm:$0xff]  }
 0x1e2   : > { %v1845_v5 = vpack.c.bf16 %v1789_v46, %v1785_v37  ;;  %4200 = vmatprep.subr.bf16.mxu0 %v4582_v34  ;;  %2424 = vmatprep.mubr.bf16.mxu1 %v1848_v39  ;;  %v1284_v34 = vmul.f32 %v5944_v23, %v5944_v23  ;;  %v1268_v4 = vmul.f32 0.001953125, %v1228_v43  ;;  %v7013_v54 = vsub.f32 %v5247_v49, %v5721_v57  ;;  %v7035_v12 = vld [vmem:[#allocation23_spill] sm:$0xff] }
 0x1e3   : > { %v1514_v38 = vmul.f32 %v5677_v61, %v1429_v58  ;;  %vm1659_vm0 = vcmp.gt.f32.partialorder %v1595_v9, 0.0  ;;  %v1723_v56 = vmul.f32 0.02, %v1595_v9  ;;  %v5961_v62 = vpop.eup %4622  ;;  %v1299_v51 = vsub.f32 %v1267_v33, %v1283_v2 }
 0x1e4   : > { %2312 = vmatmul.mubr.bf16.gmra.mxu0 %v1845_v5  ;;  %v5963_v58 = vmul.f32 0.001953125, %v1089_v47  ;;  %v1432_v39 = vmul.f32 %v5832_v26, %v7013_v54  ;;  %v7014_v5 = vsub.f32 %v5286_v13, %v5737_v40  ;;  %v1300_v43 = vsub.f32 %v1268_v4, %v1284_v34  ;;  %v7017_v47 = vld [vmem:[#allocation15_spill] sm:$0xff] }
 0x1e5   : > { %v1599_v18 = vadd.f32 %v5680_v30, %v1514_v38  ;;  %4201 = vmatpush3.bf16.msra.mxu0 %v4583_v55  ;;  %v1787_v46 = vsel %vm1659_vm0, %v1595_v9, %v1723_v56  ;;  %v1315_v2 = vmax.f32 %v1299_v51, 0.0  ;;  %v7033_v13 = vld [vmem:[#allocation55_spill] sm:$0xff] }
 0x1e6   : > { %v1436_v38 = vmul.f32 %v5850_v29, %v7014_v5  ;;  %4202 = vmatprep.subr.bf16.mxu0 %v4584_v31  ;;  %v5977_v33 = vpop.eup %4624  ;;  %v1517_v56 = vmul.f32 %v5688_v50, %v1432_v39  ;;  %v1316_v34 = vmax.f32 %v1300_v43, 0.0  ;;  %v7015_v5 = vsub.f32 %v5280_v10, %v5721_v57 }
 0x1e7   : > { %vm1663_vm2 = vcmp.gt.f32.partialorder %v1599_v18, 0.0  ;;  %v1727_v37 = vmul.f32 0.02, %v1599_v18  ;;  %v1395_v51 = vadd.f32 1e-05, %v1315_v2  ;;  %v7018_v39 = vsub.f32 %v7017_v47, %v5721_v57  ;;  %v7019_v2 = vld [vmem:[#allocation17_spill] sm:$0xff] }
 0x1e8   : > { %v1521_v4 = vmul.f32 %v5688_v50, %v1436_v38  ;;  %v1602_v54 = vadd.f32 %v5693_v21, %v1517_v56  ;;  %v7020_v10 = vsub.f32 %v7019_v2, %v5737_v40  ;;  %v7021_v2 = vld [vmem:[#allocation16_spill] sm:$0xff] }
 0x1e9   : > { %v1791_v55 = vsel %vm1663_vm2, %v1599_v18, %v1727_v37  ;;  %4203 = vmatpush3.bf16.msra.mxu0 %v4585_v22  ;;  %v1434_v18 = vmul.f32 %v5832_v26, %v7015_v5  ;;  %v7016_v37 = vsub.f32 %v5319_v59, %v5737_v40  ;;  %4626 = vrsqrt.f32 %v1395_v51 }
 0x1ea   : > { %v1847_v31 = vpack.c.bf16 %v1791_v55, %v1787_v46  ;;  %v1431_v46 = vmul.f32 %v5832_v26, %v7018_v39  ;;  %v1396_v22 = vadd.f32 1e-05, %v1316_v34  ;;  %v1606_v38 = vadd.f32 %v5693_v21, %v1521_v4 }
 0x1eb   : > { %v1438_v9 = vmul.f32 %v5850_v29, %v7016_v37  ;;  %v1435_v43 = vmul.f32 %v5850_v29, %v7020_v10  ;;  %vm1666_vm3 = vcmp.gt.f32.partialorder %v1602_v54, 0.0  ;;  %v1730_v55 = vmul.f32 0.02, %v1602_v54 }
 0x1ec   : > { %2425 = vmatmul.mubr.bf16.gmra.mxu1 %v1847_v31  ;;  %v1519_v59 = vmul.f32 %v5683_v19, %v1434_v18  ;;  %4628 = vrsqrt.f32 %v1396_v22  ;;  %vm1670_vm4 = vcmp.gt.f32.partialorder %v1606_v38, 0.0  ;;  %v1734_v47 = vmul.f32 0.02, %v1606_v38  ;;  %v7023_v22 = vld [vmem:[#allocation18_spill] sm:$0xff] }
 0x1ed   : > { %v1523_v56 = vmul.f32 %v5683_v19, %v1438_v9  ;;  %v1516_v31 = vmul.f32 %v5674_v8, %v1431_v46  ;;  %v1794_v51 = vsel %vm1666_vm3, %v1602_v54, %v1730_v55  ;;  %v1520_v5 = vmul.f32 %v5674_v8, %v1435_v43  ;;  %v1094_v54 = vpop.xlane.xlu1 %1093 }
 0x1ee   : > { %v1604_v34 = vadd.f32 %v5696_v45, %v1519_v59  ;;  %v1798_v37 = vsel %vm1670_vm4, %v1606_v38, %v1734_v47  ;;  %v7022_v18 = vsub.f32 %v7021_v2, %v5721_v57  ;;  %v7024_v10 = vsub.f32 %v7023_v22, %v5737_v40  ;;  %v7029_v22 = vld [vmem:[#allocation21_spill] sm:$0xff] }
 0x1ef   : > { %v1608_v4 = vadd.f32 %v5696_v45, %v1523_v56  ;;  %v1601_v39 = vadd.f32 %v5705_v44, %v1516_v31  ;;  %v1850_v55 = vpack.c.bf16 %v1798_v37, %v1794_v51  ;;  %v1605_v38 = vadd.f32 %v5705_v44, %v1520_v5  ;;  %v7025_v5 = vld [vmem:[#allocation50_spill] sm:$0xff] }
 0x1f0   : > { %v1433_v9 = vmul.f32 %v5832_v26, %v7022_v18  ;;  %v1437_v46 = vmul.f32 %v5850_v29, %v7024_v10  ;;  %vm1668_vm5 = vcmp.gt.f32.partialorder %v1604_v34, 0.0  ;;  %v1732_v59 = vmul.f32 0.02, %v1604_v34  ;;  %v1233_v10 = vpop.xlane.xlu0 %1232 }
 0x1f1   : > { %vm1672_vm6 = vcmp.gt.f32.partialorder %v1608_v4, 0.0  ;;  %v1736_v56 = vmul.f32 0.02, %v1608_v4  ;;  %vm1665_vm7 = vcmp.gt.f32.partialorder %v1601_v39, 0.0  ;;  %v1729_v43 = vmul.f32 0.02, %v1601_v39  ;;  %2321 = vmatprep.mubr.bf16.mxu0 %v1850_v55 }
 0x1f2   : > { %v1796_v47 = vsel %vm1668_vm5, %v1604_v34, %v1732_v59  ;;  %v1518_v57 = vmul.f32 %v5677_v61, %v1433_v9  ;;  %v1522_v26 = vmul.f32 %v5677_v61, %v1437_v46  ;;  %v6021_v31 = vmul.f32 0.001953125, %v1094_v54  ;;  %v7026_v9 = vld [vmem:[#allocation51_spill] sm:$0xff]  ;;  %v7030_v59 = vld [vmem:[#allocation54_spill] sm:$0xff]  ;;  %v7045_v46 = vld [vmem:[#allocation24_spill] sm:$0xff] }
 0x1f3   : > { %v1800_v40 = vsel %vm1672_vm6, %v1608_v4, %v1736_v56  ;;  %vm1669_vm8 = vcmp.gt.f32.partialorder %v1605_v38, 0.0  ;;  %v1733_v29 = vmul.f32 0.02, %v1605_v38  ;;  %v1793_v51 = vsel %vm1665_vm7, %v1601_v39, %v1729_v43  ;;  %v7028_v4 = vld [vmem:[#allocation53_spill] sm:$0xff]  ;;  %v1238_v39 = vpop.xlane.xlu1 %1237 }
 0x1f4   : > { %v1852_v37 = vpack.c.bf16 %v1800_v40, %v1796_v47  ;;  %v1603_v2 = vadd.f32 %v5680_v30, %v1518_v57  ;;  %v1607_v18 = vadd.f32 %v5680_v30, %v1522_v26  ;;  %v1285_v57 = vmul.f32 %v5963_v58, %v5963_v58 }
 0x1f5   : > { %v1797_v34 = vsel %vm1669_vm8, %v1605_v38, %v1733_v29  ;;  %v1269_v38 = vmul.f32 0.001953125, %v1233_v10  ;;  %v1286_v26 = vmul.f32 %v6021_v31, %v6021_v31  ;;  %v1270_v54 = vmul.f32 0.001953125, %v1238_v39 }
 0x1f6   : > { %2434 = vmatprep.mubr.bf16.mxu1 %v1852_v37  ;;  %v1849_v56 = vpack.c.bf16 %v1797_v34, %v1793_v51  ;;  %vm1667_vm9 = vcmp.gt.f32.partialorder %v1603_v2, 0.0  ;;  %vm1671_vm10 = vcmp.gt.f32.partialorder %v1607_v18, 0.0  ;;  %v1731_v43 = vmul.f32 0.02, %v1603_v2  ;;  %v6037_v40 = vpop.eup %4626  ;;  %v7032_v34 = vld [vmem:[#allocation25_spill] sm:$0xff] }
 0x1f7   : > { %v1735_v47 = vmul.f32 0.02, %v1607_v18  ;;  %v7031_v37 = vsub.f32 %v7029_v22, %v7030_v59  ;;  %v7034_v55 = vsub.f32 %v7032_v34, %v7033_v13  ;;  %v1301_v10 = vsub.f32 %v1269_v38, %v1285_v57  ;;  %v7039_v57 = vld [vmem:[#allocation19_spill] sm:$0xff] }
 0x1f8   : > { %2322 = vmatmul.mubr.bf16.gmra.mxu0 %v1849_v56  ;;  %v1795_v29 = vsel %vm1667_vm9, %v1603_v2, %v1731_v43  ;;  %v7036_v25 = vsub.f32 %v7035_v12, %v7030_v59  ;;  %v7037_v56 = vld [vmem:[#allocation28_spill] sm:$0xff]  ;;  %v7046_v6 = vsub.f32 %v7045_v46, %v7033_v13 }
 0x1f9   : > { %v1440_v51 = vmul.f32 %v5872_v35, %v7031_v37  ;;  %v1444_v49 = vmul.f32 %v5881_v28, %v7034_v55  ;;  %v1799_v63 = vsel %vm1671_vm10, %v1607_v18, %v1735_v47  ;;  %v7038_v2 = vsub.f32 %v7037_v56, %v7033_v13  ;;  %v6055_v22 = vpop.eup %4628 }
 0x1fa   : > { %v1442_v16 = vmul.f32 %v5872_v35, %v7036_v25  ;;  %v1851_v43 = vpack.c.bf16 %v1799_v63, %v1795_v29  ;;  %v1302_v37 = vsub.f32 %v1270_v54, %v1286_v26  ;;  %v1317_v18 = vmax.f32 %v1301_v10, 0.0  ;;  %v7041_v54 = vld [vmem:[#allocation22_spill] sm:$0xff] }
 0x1fb   : > { %v1446_v39 = vmul.f32 %v5881_v28, %v7038_v2  ;;  %v1525_v34 = vmul.f32 %v5688_v50, %v1440_v51  ;;  %v1529_v55 = vmul.f32 %v5688_v50, %v1444_v49  ;;  %v7040_v25 = vsub.f32 %v7039_v57, %v7030_v59 }
 0x1fc   : > { %v1527_v47 = vmul.f32 %v5683_v19, %v1442_v16  ;;  %2435 = vmatmul.mubr.bf16.gmra.mxu1 %v1851_v43  ;;  %v1318_v56 = vmax.f32 %v1302_v37, 0.0  ;;  %v7042_v26 = vsub.f32 %v7041_v54, %v7033_v13  ;;  %v1397_v29 = vadd.f32 1e-05, %v1317_v18 }
 0x1fd   : > { %v1531_v12 = vmul.f32 %v5683_v19, %v1446_v39  ;;  %v1439_v38 = vmul.f32 %v5872_v35, %v7040_v25  ;;  %v1610_v2 = vadd.f32 %v5693_v21, %v1525_v34  ;;  %v1614_v63 = vadd.f32 %v5693_v21, %v1529_v55 }
 0x1fe   : > { %v1443_v49 = vmul.f32 %v5881_v28, %v7042_v26  ;;  %v1612_v16 = vadd.f32 %v5696_v45, %v1527_v47  ;;  %v1398_v39 = vadd.f32 1e-05, %v1318_v56  ;;  %4630 = vrsqrt.f32 %v1397_v29 }
 0x1ff   : > { %v1616_v51 = vadd.f32 %v5696_v45, %v1531_v12  ;;  %v1524_v10 = vmul.f32 %v5674_v8, %v1439_v38  ;;  %vm1674_vm11 = vcmp.gt.f32.partialorder %v1610_v2, 0.0  ;;  %vm1678_vm12 = vcmp.gt.f32.partialorder %v1614_v63, 0.0  ;;  %v7043_v12 = vld [vmem:[#allocation20_spill] sm:$0xff] }
 0x200   : > { %v1738_v43 = vmul.f32 0.02, %v1610_v2  ;;  %v1742_v37 = vmul.f32 0.02, %v1614_v63  ;;  %vm1676_vm13 = vcmp.gt.f32.partialorder %v1612_v16, 0.0  ;;  %4632 = vrsqrt.f32 %v1398_v39 }
 0x201   : > { %vm1680_vm14 = vcmp.gt.f32.partialorder %v1616_v51, 0.0  ;;  %v1740_v55 = vmul.f32 0.02, %v1612_v16  ;;  %v1744_v57 = vmul.f32 0.02, %v1616_v51  ;;  %v1528_v18 = vmul.f32 %v5674_v8, %v1443_v49 }
 0x202   : > { %v1802_v34 = vsel %vm1674_vm11, %v1610_v2, %v1738_v43  ;;  %v1806_v25 = vsel %vm1678_vm12, %v1614_v63, %v1742_v37  ;;  %v1609_v47 = vadd.f32 %v5705_v44, %v1524_v10  ;;  %v7044_v38 = vsub.f32 %v7043_v12, %v7030_v59  ;;  %v7047_v43 = vld [vmem:[#allocation29_spill] sm:$0xff] }
 0x203   : > { %v1854_v54 = vpack.c.bf16 %v1806_v25, %v1802_v34  ;;  %v1804_v26 = vsel %vm1676_vm13, %v1612_v16, %v1740_v55  ;;  %v1808_v29 = vsel %vm1680_vm14, %v1616_v51, %v1744_v57  ;;  %v1445_v2 = vmul.f32 %v5881_v28, %v7046_v6  ;;  %v7050_v51 = vld [vmem:[#allocation57_spill] sm:$0xff]  ;;  %v7052_v34 = vld [vmem:[#allocation31_spill] sm:$0xff] }
 0x204   : > { %v1441_v56 = vmul.f32 %v5872_v35, %v7044_v38  ;;  %v1856_v39 = vpack.c.bf16 %v1808_v29, %v1804_v26  ;;  %v1613_v63 = vadd.f32 %v5705_v44, %v1528_v18  ;;  %vm1673_vm15 = vcmp.gt.f32.partialorder %v1609_v47, 0.0  ;;  %v7048_v35 = vld [vmem:[#allocation56_spill] sm:$0xff]  ;;  %v7056_v29 = vld [vmem:[#allocation26_spill] sm:$0xff] }
 0x205   : > { %v1737_v49 = vmul.f32 0.02, %v1609_v47  ;;  %2331 = vmatprep.mubr.bf16.mxu0 %v1854_v54  ;;  %v1530_v59 = vmul.f32 %v5677_v61, %v1445_v2  ;;  %v7049_v37 = vsub.f32 %v7047_v43, %v7048_v35  ;;  %v7051_v13 = vsub.f32 %v6985_v27, %v7050_v51 }
 0x206   : > { %v1526_v10 = vmul.f32 %v5677_v61, %v1441_v56  ;;  %2444 = vmatprep.mubr.bf16.mxu1 %v1856_v39  ;;  %vm1677_vm0 = vcmp.gt.f32.partialorder %v1613_v63, 0.0  ;;  %v1741_v28 = vmul.f32 0.02, %v1613_v63  ;;  %v7053_v55 = vsub.f32 %v7052_v34, %v7048_v35  ;;  %v7054_v56 = vld [vmem:[#allocation36_spill] sm:$0xff] }
 0x207   : > { %v1448_v16 = vmul.f32 %v5913_v41, %v7049_v37  ;;  %v1452_v6 = vmul.f32 %v5929_v11, %v7051_v13  ;;  %v1801_v46 = vsel %vm1673_vm15, %v1609_v47, %v1737_v49  ;;  %v1615_v18 = vadd.f32 %v5680_v30, %v1530_v59 }
 0x208   : > { %v1450_v57 = vmul.f32 %v5913_v41, %v7053_v55  ;;  %v1611_v25 = vadd.f32 %v5680_v30, %v1526_v10  ;;  %v1805_v27 = vsel %vm1677_vm0, %v1613_v63, %v1741_v28  ;;  %v7055_v54 = vsub.f32 %v7054_v56, %v7050_v51 }
 0x209   : > { %v1533_v12 = vmul.f32 %v5688_v50, %v1448_v16  ;;  %v1537_v38 = vmul.f32 %v5688_v50, %v1452_v6  ;;  %v7057_v2 = vsub.f32 %v7056_v29, %v7048_v35  ;;  %v1853_v49 = vpack.c.bf16 %v1805_v27, %v1801_v46  ;;  %v7058_v6 = vld [vmem:[#allocation30_spill] sm:$0xff] }
 0x20a   : > { %v1454_v26 = vmul.f32 %v5929_v11, %v7055_v54  ;;  %v1535_v47 = vmul.f32 %v5683_v19, %v1450_v57  ;;  %vm1675_vm2 = vcmp.gt.f32.partialorder %v1611_v25, 0.0  ;;  %vm1679_vm3 = vcmp.gt.f32.partialorder %v1615_v18, 0.0 }
 0x20b   : > { %v1447_v39 = vmul.f32 %v5913_v41, %v7057_v2  ;;  %v1739_v10 = vmul.f32 0.02, %v1611_v25  ;;  %v1743_v59 = vmul.f32 0.02, %v1615_v18  ;;  %v1618_v43 = vadd.f32 %v5693_v21, %v1533_v12  ;;  %2332 = vmatmul.mubr.bf16.gmra.mxu0 %v1853_v49  ;;  %v6121_v12 = vpop.eup %4630 }
 0x20c   : > { %v1622_v63 = vadd.f32 %v5693_v21, %v1537_v38  ;;  %v1539_v37 = vmul.f32 %v5683_v19, %v1454_v26  ;;  %v1620_v13 = vadd.f32 %v5696_v45, %v1535_v47  ;;  %v7059_v28 = vsub.f32 %v7058_v6, %v7050_v51 }
 0x20d   : > { %v1803_v16 = vsel %vm1675_vm2, %v1611_v25, %v1739_v10  ;;  %v1532_v46 = vmul.f32 %v5674_v8, %v1447_v39  ;;  %v1807_v55 = vsel %vm1679_vm3, %v1615_v18, %v1743_v59  ;;  %vm1682_vm4 = vcmp.gt.f32.partialorder %v1618_v43, 0.0  ;;  %v6124_v25 = vpop.eup %4632  ;;  %v7060_v39 = vld [vmem:[#allocation27_spill] sm:$0xff] }
 0x20e   : > { %v1451_v34 = vmul.f32 %v5929_v11, %v7059_v28  ;;  %vm1686_vm5 = vcmp.gt.f32.partialorder %v1622_v63, 0.0  ;;  %v1746_v57 = vmul.f32 0.02, %v1618_v43  ;;  %v1855_v38 = vpack.c.bf16 %v1807_v55, %v1803_v16  ;;  %v7062_v28 = vld [vmem:[#allocation32_spill] sm:$0xff] }
 0x20f   : > { %v1750_v27 = vmul.f32 0.02, %v1622_v63  ;;  %v1624_v56 = vadd.f32 %v5696_v45, %v1539_v37  ;;  %vm1684_vm6 = vcmp.gt.f32.partialorder %v1620_v13, 0.0  ;;  %v1748_v26 = vmul.f32 0.02, %v1620_v13 }
 0x210   : > { %v1810_v54 = vsel %vm1682_vm4, %v1618_v43, %v1746_v57  ;;  %v1536_v47 = vmul.f32 %v5674_v8, %v1451_v34  ;;  %v1617_v29 = vadd.f32 %v5705_v44, %v1532_v46  ;;  %2445 = vmatmul.mubr.bf16.gmra.mxu1 %v1855_v38  ;;  %v7061_v49 = vsub.f32 %v7060_v39, %v7048_v35 }
 0x211   : > { %v1814_v18 = vsel %vm1686_vm5, %v1622_v63, %v1750_v27  ;;  %vm1688_vm7 = vcmp.gt.f32.partialorder %v1624_v56, 0.0  ;;  %v1752_v2 = vmul.f32 0.02, %v1624_v56  ;;  %v1812_v37 = vsel %vm1684_vm6, %v1620_v13, %v1748_v26 }
 0x212   : > { %v1449_v10 = vmul.f32 %v5913_v41, %v7061_v49  ;;  %v1858_v59 = vpack.c.bf16 %v1814_v18, %v1810_v54  ;;  %v1621_v16 = vadd.f32 %v5705_v44, %v1536_v47  ;;  %vm1681_vm8 = vcmp.gt.f32.partialorder %v1617_v29, 0.0  ;;  %v7067_v47 = vld [vmem:[#allocation44_spill] sm:$0xff] }
 0x213   : > { %v1816_v43 = vsel %vm1688_vm7, %v1624_v56, %v1752_v2  ;;  %v1745_v6 = vmul.f32 0.02, %v1617_v29  ;;  %v7063_v34 = vsub.f32 %v7062_v28, %v7050_v51  ;;  %v7064_v41 = vsub.f32 %v6991_v42, %v5834_v24 }
 0x214   : > { %v1534_v63 = vmul.f32 %v5677_v61, %v1449_v10  ;;  %2341 = vmatprep.mubr.bf16.mxu0 %v1858_v59  ;;  %v1860_v55 = vpack.c.bf16 %v1816_v43, %v1812_v37  ;;  %vm1685_vm9 = vcmp.gt.f32.partialorder %v1621_v16, 0.0  ;;  %v1749_v35 = vmul.f32 0.02, %v1621_v16  ;;  %v7069_v43 = vld [vmem:[#allocation34_spill] sm:$0xff] }
 0x215   : > { %v1453_v46 = vmul.f32 %v5929_v11, %v7063_v34  ;;  %v1456_v13 = vmul.f32 %v5961_v62, %v7064_v41  ;;  %v1809_v57 = vsel %vm1681_vm8, %v1617_v29, %v1745_v6  ;;  %v7065_v51 = vsub.f32 %v6996_v3, %v5864_v60  ;;  %v7071_v41 = vld [vmem:[#allocation38_spill] sm:$0xff] }
 0x216   : > { %v1619_v27 = vadd.f32 %v5680_v30, %v1534_v63  ;;  %2454 = vmatprep.mubr.bf16.mxu1 %v1860_v55  ;;  %v1813_v56 = vsel %vm1685_vm9, %v1621_v16, %v1749_v35  ;;  %v7066_v26 = vsub.f32 %v6993_v32, %v5834_v24  ;;  %v7068_v29 = vsub.f32 %v7067_v47, %v5864_v60 }
 0x217   : > { %v1538_v38 = vmul.f32 %v5677_v61, %v1453_v46  ;;  %v1460_v11 = vmul.f32 %v5977_v33, %v7065_v51  ;;  %v1541_v54 = vmul.f32 %v5688_v50, %v1456_v13  ;;  %v1857_v2 = vpack.c.bf16 %v1813_v56, %v1809_v57 }
 0x218   : > { %v1458_v42 = vmul.f32 %v5961_v62, %v7066_v26  ;;  %v1462_v18 = vmul.f32 %v5977_v33, %v7068_v29  ;;  %vm1683_vm10 = vcmp.gt.f32.partialorder %v1619_v27, 0.0  ;;  %v1747_v3 = vmul.f32 0.02, %v1619_v27  ;;  %v7073_v29 = vld [vmem:[#allocation35_spill] sm:$0xff] }
 0x219   : > { %v1623_v39 = vadd.f32 %v5680_v30, %v1538_v38  ;;  %v1545_v49 = vmul.f32 %v5688_v50, %v1460_v11  ;;  %v1626_v10 = vadd.f32 %v5693_v21, %v1541_v54  ;;  %2342 = vmatmul.mubr.bf16.gmra.mxu0 %v1857_v2  ;;  %v7070_v6 = vsub.f32 %v7069_v43, %v5834_v24 }
 0x21a   : > { %v1543_v59 = vmul.f32 %v5683_v19, %v1458_v42  ;;  %v1547_v32 = vmul.f32 %v5683_v19, %v1462_v18  ;;  %v1811_v16 = vsel %vm1683_vm10, %v1619_v27, %v1747_v3  ;;  %v7072_v13 = vsub.f32 %v7071_v41, %v5864_v60 }
 0x21b   : > { %vm1687_vm11 = vcmp.gt.f32.partialorder %v1623_v39, 0.0  ;;  %v1751_v37 = vmul.f32 0.02, %v1623_v39  ;;  %v1455_v28 = vmul.f32 %v5961_v62, %v7070_v6  ;;  %v1630_v34 = vadd.f32 %v5693_v21, %v1545_v49 }
 0x21c   : > { %vm1690_vm12 = vcmp.gt.f32.partialorder %v1626_v10, 0.0  ;;  %v1754_v46 = vmul.f32 0.02, %v1626_v10  ;;  %v1628_v63 = vadd.f32 %v5696_v45, %v1543_v59  ;;  %v1632_v35 = vadd.f32 %v5696_v45, %v1547_v32  ;;  %v7075_v59 = vld [vmem:[#allocation40_spill] sm:$0xff] }
 0x21d   : > { %v1815_v55 = vsel %vm1687_vm11, %v1623_v39, %v1751_v37  ;;  %v1459_v57 = vmul.f32 %v5977_v33, %v7072_v13  ;;  %v1540_v38 = vmul.f32 %v5674_v8, %v1455_v28  ;;  %vm1694_vm13 = vcmp.gt.f32.partialorder %v1630_v34, 0.0  ;;  %v4586_v37 = vld [vmem:[#allocation5 + $0x48] sm:$0xff]  }
 0x21e   : > { %v1859_v27 = vpack.c.bf16 %v1815_v55, %v1811_v16  ;;  %v1758_v51 = vmul.f32 0.02, %v1630_v34  ;;  %v1818_v11 = vsel %vm1690_vm12, %v1626_v10, %v1754_v46  ;;  %vm1692_vm14 = vcmp.gt.f32.partialorder %v1628_v63, 0.0  ;;  %v4587_v16 = vld [vmem:[#allocation5 + $0x8] sm:$0xff]   ;;  %4204 = vmatprep.subr.bf16.mxu0 %v4586_v37 }
 0x21f   : > { %vm1696_vm15 = vcmp.gt.f32.partialorder %v1632_v35, 0.0  ;;  %v1756_v56 = vmul.f32 0.02, %v1628_v63  ;;  %v1760_v54 = vmul.f32 0.02, %v1632_v35  ;;  %v1544_v42 = vmul.f32 %v5674_v8, %v1459_v57  ;;  %4205 = vmatpush3.bf16.msra.mxu0 %v4587_v16 }
 0x220   : > { %2455 = vmatmul.mubr.bf16.gmra.mxu1 %v1859_v27  ;;  %v1822_v26 = vsel %vm1694_vm13, %v1630_v34, %v1758_v51  ;;  %v1625_v47 = vadd.f32 %v5705_v44, %v1540_v38  ;;  %v7074_v18 = vsub.f32 %v7073_v29, %v5834_v24  ;;  %v7076_v10 = vsub.f32 %v7075_v59, %v5864_v60 }
 0x221   : > { %v1862_v39 = vpack.c.bf16 %v1822_v26, %v1818_v11  ;;  %v1820_v3 = vsel %vm1692_vm14, %v1628_v63, %v1756_v56  ;;  %v1824_v49 = vsel %vm1696_vm15, %v1632_v35, %v1760_v54  ;;  %v1629_v6 = vadd.f32 %v5705_v44, %v1544_v42 }
 0x222   : > { %v1457_v2 = vmul.f32 %v5961_v62, %v7074_v18  ;;  %v1461_v32 = vmul.f32 %v5977_v33, %v7076_v10  ;;  %v1864_v43 = vpack.c.bf16 %v1824_v49, %v1820_v3  ;;  %vm1689_vm0 = vcmp.gt.f32.partialorder %v1625_v47, 0.0 }
 0x223   : > { %v1753_v28 = vmul.f32 0.02, %v1625_v47  ;;  %2351 = vmatprep.mubr.bf16.mxu0 %v1862_v39  ;;  %v7077_v34 = vsub.f32 %v7002_v36, %v5885_v7  ;;  %v7078_v60 = vsub.f32 %v7012_v0, %v5944_v23  ;;  %vm1693_vm2 = vcmp.gt.f32.partialorder %v1629_v6, 0.0 }
 0x224   : > { %v1542_v24 = vmul.f32 %v5677_v61, %v1457_v2  ;;  %v1546_v62 = vmul.f32 %v5677_v61, %v1461_v32  ;;  %2464 = vmatprep.mubr.bf16.mxu1 %v1864_v43  ;;  %v1757_v63 = vmul.f32 0.02, %v1629_v6  ;;  %v7079_v35 = vsub.f32 %v7004_v48, %v5885_v7 }
 0x225   : > { %v1464_v46 = vmul.f32 %v6037_v40, %v7077_v34  ;;  %v1468_v33 = vmul.f32 %v6055_v22, %v7078_v60  ;;  %v1817_v55 = vsel %vm1689_vm0, %v1625_v47, %v1753_v28  ;;  %v7080_v27 = vsub.f32 %v5607_v53, %v5944_v23 }
 0x226   : > { %v1466_v41 = vmul.f32 %v6037_v40, %v7079_v35  ;;  %v1627_v13 = vadd.f32 %v5680_v30, %v1542_v24  ;;  %v1631_v36 = vadd.f32 %v5680_v30, %v1546_v62  ;;  %v1821_v38 = vsel %vm1693_vm2, %v1629_v6, %v1757_v63  ;;  %v7083_v62 = vld [vmem:[#allocation43_spill] sm:$0xff] }
 0x227   : > { %v1549_v57 = vmul.f32 %v5688_v50, %v1464_v46  ;;  %v1553_v0 = vmul.f32 %v5688_v50, %v1468_v33  ;;  %v1470_v51 = vmul.f32 %v6055_v22, %v7080_v27  ;;  %v7081_v11 = vsub.f32 %v7001_v20, %v5885_v7 }
 0x228   : > { %v1551_v48 = vmul.f32 %v5683_v19, %v1466_v41  ;;  %v1861_v54 = vpack.c.bf16 %v1821_v38, %v1817_v55  ;;  %vm1691_vm3 = vcmp.gt.f32.partialorder %v1627_v13, 0.0  ;;  %vm1695_vm4 = vcmp.gt.f32.partialorder %v1631_v36, 0.0 }
 0x229   : > { %v1463_v56 = vmul.f32 %v6037_v40, %v7081_v11  ;;  %v1755_v26 = vmul.f32 0.02, %v1627_v13  ;;  %v1759_v42 = vmul.f32 0.02, %v1631_v36  ;;  %v1634_v47 = vadd.f32 %v5693_v21, %v1549_v57 }
 0x22a   : > { %v1638_v29 = vadd.f32 %v5693_v21, %v1553_v0  ;;  %v1555_v53 = vmul.f32 %v5683_v19, %v1470_v51  ;;  %2352 = vmatmul.mubr.bf16.gmra.mxu0 %v1861_v54  ;;  %v1636_v2 = vadd.f32 %v5696_v45, %v1551_v48  ;;  %v7082_v20 = vsub.f32 %v7011_v17, %v5944_v23 }
 0x22b   : > { %v1819_v18 = vsel %vm1691_vm3, %v1627_v13, %v1755_v26  ;;  %v1548_v3 = vmul.f32 %v5674_v8, %v1463_v56  ;;  %v1823_v49 = vsel %vm1695_vm4, %v1631_v36, %v1759_v42  ;;  %vm1698_vm5 = vcmp.gt.f32.partialorder %v1634_v47, 0.0 }
 0x22c   : > { %v1467_v39 = vmul.f32 %v6055_v22, %v7082_v20  ;;  %vm1702_vm6 = vcmp.gt.f32.partialorder %v1638_v29, 0.0  ;;  %v1762_v59 = vmul.f32 0.02, %v1634_v47  ;;  %v1863_v10 = vpack.c.bf16 %v1823_v49, %v1819_v18 }
 0x22d   : > { %v1766_v32 = vmul.f32 0.02, %v1638_v29  ;;  %v1640_v37 = vadd.f32 %v5696_v45, %v1555_v53  ;;  %vm1700_vm7 = vcmp.gt.f32.partialorder %v1636_v2, 0.0  ;;  %v1764_v43 = vmul.f32 0.02, %v1636_v2 }
 0x22e   : > { %v1826_v16 = vsel %vm1698_vm5, %v1634_v47, %v1762_v59  ;;  %v1552_v6 = vmul.f32 %v5674_v8, %v1467_v39  ;;  %v1633_v28 = vadd.f32 %v5705_v44, %v1548_v3  ;;  %2465 = vmatmul.mubr.bf16.gmra.mxu1 %v1863_v10  ;;  %v7084_v34 = vsub.f32 %v7083_v62, %v5885_v7  ;;  %v4588_v47 = vld [vmem:[#allocation5 + $0x40] sm:$0xff]  }
 0x22f   : > { %v1830_v17 = vsel %vm1702_vm6, %v1638_v29, %v1766_v32  ;;  %vm1704_vm8 = vcmp.gt.f32.partialorder %v1640_v37, 0.0  ;;  %v1768_v24 = vmul.f32 0.02, %v1640_v37  ;;  %v1828_v33 = vsel %vm1700_vm7, %v1636_v2, %v1764_v43  ;;  %v4589_v29 = vld [vmem:[#allocation5] sm:$0xff]   ;;  %4206 = vmatprep.subr.bf16.mxu0 %v4588_v47 }
 0x230   : > { %v1465_v46 = vmul.f32 %v6037_v40, %v7084_v34  ;;  %v1866_v60 = vpack.c.bf16 %v1830_v17, %v1826_v16  ;;  %v1637_v63 = vadd.f32 %v5705_v44, %v1552_v6  ;;  %vm1697_vm9 = vcmp.gt.f32.partialorder %v1633_v28, 0.0  ;;  %4207 = vmatpush3.bf16.msra.mxu0 %v4589_v29  ;;  %v7092_v62 = vld [vmem:[#allocation49_spill] sm:$0xff] }
 0x231   : > { %v1832_v55 = vsel %vm1704_vm8, %v1640_v37, %v1768_v24  ;;  %v1761_v35 = vmul.f32 0.02, %v1633_v28  ;;  %v7085_v41 = vsub.f32 %v5571_v1, %v5944_v23  ;;  %v7086_v40 = vsub.f32 %v5610_v52, %v5963_v58 }
 0x232   : > { %v1550_v36 = vmul.f32 %v5677_v61, %v1465_v46  ;;  %2361 = vmatprep.mubr.bf16.mxu0 %v1866_v60  ;;  %v1868_v57 = vpack.c.bf16 %v1832_v55, %v1828_v33  ;;  %vm1701_vm10 = vcmp.gt.f32.partialorder %v1637_v63, 0.0  ;;  %v1765_v7 = vmul.f32 0.02, %v1637_v63 }
 0x233   : > { %v1469_v13 = vmul.f32 %v6055_v22, %v7085_v41  ;;  %v1472_v0 = vmul.f32 %v6121_v12, %v7086_v40  ;;  %v1825_v38 = vsel %vm1697_vm9, %v1633_v28, %v1761_v35  ;;  %v7087_v1 = vsub.f32 %v7026_v9, %v6021_v31 }
 0x234   : > { %v1635_v51 = vadd.f32 %v5680_v30, %v1550_v36  ;;  %2474 = vmatprep.mubr.bf16.mxu1 %v1868_v57  ;;  %v1829_v22 = vsel %vm1701_vm10, %v1637_v63, %v1765_v7  ;;  %v7088_v11 = vsub.f32 %v5628_v14, %v5963_v58  ;;  %v7089_v56 = vsub.f32 %v7028_v4, %v6021_v31  ;;  %v7094_v63 = vld [vmem:[#allocation52_spill] sm:$0xff] }
 0x235   : > { %v1554_v27 = vmul.f32 %v5677_v61, %v1469_v13  ;;  %v1476_v23 = vmul.f32 %v6124_v25, %v7087_v1  ;;  %v1557_v48 = vmul.f32 %v5688_v50, %v1472_v0  ;;  %v1865_v26 = vpack.c.bf16 %v1829_v22, %v1825_v38  ;;  %v4591_v1 = vld [vmem:[%s6824_s9 + $0x30] sm:$0xff]  }
 0x236   : > { %v1474_v52 = vmul.f32 %v6121_v12, %v7088_v11  ;;  %v1478_v54 = vmul.f32 %v6124_v25, %v7089_v56  ;;  %vm1699_vm11 = vcmp.gt.f32.partialorder %v1635_v51, 0.0  ;;  %v1763_v9 = vmul.f32 0.02, %v1635_v51  ;;  %v4592_v56 = vld [vmem:[%s6824_s9 + $0x28] sm:$0xff]  }
 0x237   : > { %v1639_v42 = vadd.f32 %v5680_v30, %v1554_v27  ;;  %v1561_v53 = vmul.f32 %v5688_v50, %v1476_v23  ;;  %v1642_v18 = vadd.f32 %v5693_v21, %v1557_v48  ;;  %2362 = vmatmul.mubr.bf16.gmra.mxu0 %v1865_v26  ;;  %v7090_v39 = vsub.f32 %v5586_v15, %v5963_v58  ;;  %v7096_v23 = vld [vmem:[#allocation13_spill] sm:$0xff]  ;;  %v7097_v48 = vld [vmem:[#allocation14_spill] sm:$0xff] }
 0x238   : > { %v1559_v14 = vmul.f32 %v5683_v19, %v1474_v52  ;;  %v1563_v2 = vmul.f32 %v5683_v19, %v1478_v54  ;;  %v1827_v20 = vsel %vm1699_vm11, %v1635_v51, %v1763_v9  ;;  %v7091_v32 = vsub.f32 %v7025_v5, %v6021_v31 }
 0x239   : > { %vm1703_vm12 = vcmp.gt.f32.partialorder %v1639_v42, 0.0  ;;  %v1767_v4 = vmul.f32 0.02, %v1639_v42  ;;  %v1471_v3 = vmul.f32 %v6121_v12, %v7090_v39  ;;  %v1646_v49 = vadd.f32 %v5693_v21, %v1561_v53 }
 0x23a   : > { %vm1706_vm13 = vcmp.gt.f32.partialorder %v1642_v18, 0.0  ;;  %v1770_v50 = vmul.f32 0.02, %v1642_v18  ;;  %v1644_v59 = vadd.f32 %v5696_v45, %v1559_v14  ;;  %v1648_v19 = vadd.f32 %v5696_v45, %v1563_v2 }
 0x23b   : > { %v1831_v10 = vsel %vm1703_vm12, %v1639_v42, %v1767_v4  ;;  %v1475_v37 = vmul.f32 %v6124_v25, %v7091_v32  ;;  %v1556_v15 = vmul.f32 %v5674_v8, %v1471_v3  ;;  %vm1710_vm14 = vcmp.gt.f32.partialorder %v1646_v49, 0.0 }
 0x23c   : > { %v1867_v16 = vpack.c.bf16 %v1831_v10, %v1827_v20  ;;  %v1774_v43 = vmul.f32 0.02, %v1646_v49  ;;  %v1834_v6 = vsel %vm1706_vm13, %v1642_v18, %v1770_v50  ;;  %vm1708_vm15 = vcmp.gt.f32.partialorder %v1644_v59, 0.0  ;;  %v4593_v18 = vld [vmem:[%s6824_s9 + $0x20] sm:$0xff]   ;;  %v4594_v50 = vld [vmem:[%s6824_s9 + $0x18] sm:$0xff]  }
 0x23d   : > { %vm1712_vm0 = vcmp.gt.f32.partialorder %v1648_v19, 0.0  ;;  %v1772_v21 = vmul.f32 0.02, %v1644_v59  ;;  %v1776_v28 = vmul.f32 0.02, %v1648_v19  ;;  %v1560_v24 = vmul.f32 %v5674_v8, %v1475_v37 }
 0x23e   : > { %2475 = vmatmul.mubr.bf16.gmra.mxu1 %v1867_v16  ;;  %v1838_v17 = vsel %vm1710_vm14, %v1646_v49, %v1774_v43  ;;  %v1641_v45 = vadd.f32 %v5705_v44, %v1556_v15  ;;  %v7093_v5 = vsub.f32 %v7092_v62, %v5963_v58  ;;  %v7095_v55 = vsub.f32 %v7094_v63, %v6021_v31 }
 0x23f   : > { %v1870_v46 = vpack.c.bf16 %v1838_v17, %v1834_v6  ;;  %v1836_v60 = vsel %vm1708_vm15, %v1644_v59, %v1772_v21  ;;  %v1840_v33 = vsel %vm1712_vm0, %v1648_v19, %v1776_v28  ;;  %v1645_v13 = vadd.f32 %v5705_v44, %v1560_v24 }
 0x240   : > { %v1473_v34 = vmul.f32 %v6121_v12, %v7093_v5  ;;  %v1477_v35 = vmul.f32 %v6124_v25, %v7095_v55  ;;  %v1872_v41 = vpack.c.bf16 %v1840_v33, %v1836_v60  ;;  %v1769_v36 = vmul.f32 0.02, %v1641_v45 }
 0x241   : > { %2371 = vmatprep.mubr.bf16.mxu0 %v1870_v46  ;;  %vm1705_vm2 = vcmp.gt.f32.partialorder %v1641_v45, 0.0  ;;  %vm1709_vm3 = vcmp.gt.f32.partialorder %v1645_v13, 0.0  ;;  %v1773_v12 = vmul.f32 0.02, %v1645_v13 }
 0x242   : > { %v1558_v8 = vmul.f32 %v5677_v61, %v1473_v34  ;;  %v1562_v58 = vmul.f32 %v5677_v61, %v1477_v35  ;;  %2484 = vmatprep.mubr.bf16.mxu1 %v1872_v41  ;;  %v1833_v31 = vsel %vm1705_vm2, %v1641_v45, %v1769_v36  ;;  %v1937_v61 = vld [vmem:[%s6821_s6] sm:$0x3] }
 0x243   : > { %v1837_v40 = vsel %vm1709_vm3, %v1645_v13, %v1773_v12  ;;  %v6295_v22 = vrot.slane %v1937_v61, %v7096_v23  ;;  %v6298_v11 = vrot.slane %v1937_v61, %v7097_v48 }
 0x244   : > { %v1643_v57 = vadd.f32 %v5680_v30, %v1558_v8  ;;  %v1647_v7 = vadd.f32 %v5680_v30, %v1562_v58  ;;  %v1869_v25 = vpack.c.bf16 %v1837_v40, %v1833_v31  ;;  %v4590_v30 = vld [vmem:[%s6824_s9 + $0x38] sm:$0xff]  }
 0x245   : > { %4284 = vmatprep.subr.bf16.mxu1 %v4590_v30 }
 0x246   : > { %vm1707_vm4 = vcmp.gt.f32.partialorder %v1643_v57, 0.0  ;;  %vm1711_vm5 = vcmp.gt.f32.partialorder %v1647_v7, 0.0  ;;  %v1771_v44 = vmul.f32 0.02, %v1643_v57  ;;  %v1775_v0 = vmul.f32 0.02, %v1647_v7  ;;  %2372 = vmatmul.mubr.bf16.gmra.mxu0 %v1869_v25  ;;  %4285 = vmatpush3.bf16.msra.mxu1 %v4590_v30 }
 0x247   : > { %4286 = vmatprep.subr.bf16.mxu1 %v4591_v1 }
 0x248   : > { %v1835_v38 = vsel %vm1707_vm4, %v1643_v57, %v1771_v44  ;;  %v1839_v27 = vsel %vm1711_vm5, %v1647_v7, %v1775_v0 }
 0x249   : > { %v1871_v51 = vpack.c.bf16 %v1839_v27, %v1835_v38 }
 0x24a   : > { %4287 = vmatpush3.bf16.msra.mxu1 %v4591_v1 }
 0x24b   : > { %2485 = vmatmul.mubr.bf16.gmra.mxu1 %v1871_v51  ;;  %4288 = vmatprep.subr.bf16.mxu1 %v4592_v56 }
 0x24e   : > { %4289 = vmatpush3.bf16.msra.mxu1 %v4592_v56 }
 0x24f   : > { %4290 = vmatprep.subr.bf16.mxu1 %v4593_v18 }
 0x252   : > { %4291 = vmatpush3.bf16.msra.mxu1 %v4593_v18 }
 0x253   : > { %4292 = vmatprep.subr.bf16.mxu1 %v4594_v50 }
 0x256   : > { %4293 = vmatpush3.bf16.msra.mxu1 %v4594_v50 }
 0x294   : > { %v2303_v52 = vpop.f32.mrf.mxu0 }
 0x295   : > { %v2304_v26 = vadd.f32 %v2303_v52, %v6295_v22 }
 0x296   : > { %v2305_v54 = vpop.f32.mrf.mxu0  ;;  %v2416_v42 = vpop.f32.mrf.mxu1 }
 0x297   : > { %v2306_v9 = vadd.f32 %v2305_v54, %v6298_v11  ;;  %v2417_v4 = vadd.f32 %v2416_v42, %v2304_v26 }
 0x298   : > { %v2307_v47 = vpop.f32.mrf.mxu0  ;;  %v2418_v29 = vpop.f32.mrf.mxu1 }
 0x299   : > { %v2308_v53 = vadd.f32 %v2307_v47, %v6295_v22  ;;  %v2419_v14 = vadd.f32 %v2418_v29, %v2306_v9  ;;  %v2527_v32 = vmul.f32 0.02, %v2417_v4  ;;  %vm2495_vm8 = vcmp.gt.f32.partialorder %v2417_v4, 0.0 }
 0x29a   : > { %v2309_v2 = vpop.f32.mrf.mxu0  ;;  %v2420_v20 = vpop.f32.mrf.mxu1 }
 0x29b   : > { %v2310_v39 = vadd.f32 %v2309_v2, %v6298_v11  ;;  %v2421_v3 = vadd.f32 %v2420_v20, %v2308_v53  ;;  %v2528_v59 = vmul.f32 0.02, %v2419_v14  ;;  %vm2496_vm7 = vcmp.gt.f32.partialorder %v2419_v14, 0.0 }
 0x29c   : > { %v2422_v49 = vpop.f32.mrf.mxu1  ;;  %v2559_v6 = vsel %vm2495_vm8, %v2417_v4, %v2527_v32 }
 0x29d   : > { %vm2497_vm6 = vcmp.gt.f32.partialorder %v2421_v3, 0.0  ;;  %v2529_v10 = vmul.f32 0.02, %v2421_v3  ;;  %v2423_v19 = vadd.f32 %v2422_v49, %v2310_v39  ;;  %v2560_v16 = vsel %vm2496_vm7, %v2419_v14, %v2528_v59 }
 0x29f   : > { %vm2498_vm9 = vcmp.gt.f32.partialorder %v2423_v19, 0.0  ;;  %v2530_v37 = vmul.f32 0.02, %v2423_v19  ;;  %v2561_v15 = vsel %vm2497_vm6, %v2421_v3, %v2529_v10 }
 0x2a0   : > { %v2591_v28 = vpack.c.bf16 %v2561_v15, %v2559_v6 }
 0x2a1   : > { %v2562_v43 = vsel %vm2498_vm9, %v2423_v19, %v2530_v37 }
 0x2a2   : > { %v2592_v21 = vpack.c.bf16 %v2562_v43, %v2560_v16 }
 0x2a4   : > { %v2313_v17 = vpop.f32.mrf.mxu0  ;;  %2774 = vmatprep.mubr.bf16.mxu0 %v2592_v21 }
 0x2a5   : > { %2775 = vmatmul.mubr.bf16.vlgmr.msra.gmra.mxu0 %v2591_v28  ;;  %v2314_v5 = vadd.f32 %v2313_v17, %v6295_v22 }
 0x2a6   : > { %v2315_v24 = vpop.f32.mrf.mxu0 }
 0x2a7   : > { %v2316_v62 = vadd.f32 %v2315_v24, %v6298_v11 }
 0x2a8   : > { %v2317_v45 = vpop.f32.mrf.mxu0 }
 0x2a9   : > { %v2318_v60 = vadd.f32 %v2317_v45, %v6295_v22 }
 0x2aa   : > { %v2319_v46 = vpop.f32.mrf.mxu0 }
 0x2ab   : > { %v2320_v55 = vadd.f32 %v2319_v46, %v6298_v11 }
 0x2ac   : > { %v2426_v34 = vpop.f32.mrf.mxu1 }
 0x2ad   : > { %v2427_v35 = vadd.f32 %v2426_v34, %v2314_v5 }
 0x2ae   : > { %v2428_v33 = vpop.f32.mrf.mxu1 }
 0x2af   : > { %v2429_v63 = vadd.f32 %v2428_v33, %v2316_v62  ;;  %v2531_v57 = vmul.f32 0.02, %v2427_v35  ;;  %vm2499_vm12 = vcmp.gt.f32.partialorder %v2427_v35, 0.0 }
 0x2b0   : > { %v2430_v41 = vpop.f32.mrf.mxu1 }
 0x2b1   : > { %v2431_v13 = vadd.f32 %v2430_v41, %v2318_v60  ;;  %v2532_v8 = vmul.f32 0.02, %v2429_v63  ;;  %vm2500_vm11 = vcmp.gt.f32.partialorder %v2429_v63, 0.0  ;;  %v2563_v0 = vsel %vm2499_vm12, %v2427_v35, %v2531_v57 }
 0x2b2   : > { %v2432_v36 = vpop.f32.mrf.mxu1 }
 0x2b3   : > { %vm2501_vm10 = vcmp.gt.f32.partialorder %v2431_v13, 0.0  ;;  %v2533_v58 = vmul.f32 0.02, %v2431_v13  ;;  %v2433_v12 = vadd.f32 %v2432_v36, %v2320_v55  ;;  %v2564_v40 = vsel %vm2500_vm11, %v2429_v63, %v2532_v8 }
 0x2b5   : > { %vm2502_vm13 = vcmp.gt.f32.partialorder %v2433_v12, 0.0  ;;  %v2534_v7 = vmul.f32 0.02, %v2433_v12  ;;  %v2565_v31 = vsel %vm2501_vm10, %v2431_v13, %v2533_v58 }
 0x2b6   : > { %v2593_v27 = vpack.c.bf16 %v2565_v31, %v2563_v0 }
 0x2b7   : > { %v2566_v25 = vsel %vm2502_vm13, %v2433_v12, %v2534_v7 }
 0x2b8   : > { %v2594_v44 = vpack.c.bf16 %v2566_v25, %v2564_v40  ;;  %v2323_v38 = vpop.f32.mrf.mxu0 }
 0x2b9   : > { %v2324_v30 = vadd.f32 %v2323_v38, %v6295_v22 }
 0x2ba   : > { %2782 = vmatprep.mubr.bf16.mxu0 %v2594_v44  ;;  %v2325_v51 = vpop.f32.mrf.mxu0 }
 0x2bb   : > { %2783 = vmatmul.mubr.bf16.gmra.mxu0 %v2593_v27  ;;  %v2326_v61 = vadd.f32 %v2325_v51, %v6298_v11 }
 0x2bc   : > { %v2436_v1 = vpop.f32.mrf.mxu1  ;;  %v2327_v23 = vpop.f32.mrf.mxu0 }
 0x2bd   : > { %v2328_v48 = vadd.f32 %v2327_v23, %v6295_v22  ;;  %v2437_v42 = vadd.f32 %v2436_v1, %v2324_v30 }
 0x2be   : > { %v2438_v52 = vpop.f32.mrf.mxu1  ;;  %v2329_v56 = vpop.f32.mrf.mxu0 }
 0x2bf   : > { %v2439_v54 = vadd.f32 %v2438_v52, %v2326_v61  ;;  %v2330_v26 = vadd.f32 %v2329_v56, %v6298_v11  ;;  %v2535_v2 = vmul.f32 0.02, %v2437_v42  ;;  %vm2503_vm0 = vcmp.gt.f32.partialorder %v2437_v42, 0.0 }
 0x2c0   : > { %v2440_v9 = vpop.f32.mrf.mxu1 }
 0x2c1   : > { %v2441_v47 = vadd.f32 %v2440_v9, %v2328_v48  ;;  %v2536_v53 = vmul.f32 0.02, %v2439_v54  ;;  %vm2504_vm15 = vcmp.gt.f32.partialorder %v2439_v54, 0.0  ;;  %v2567_v50 = vsel %vm2503_vm0, %v2437_v42, %v2535_v2 }
 0x2c2   : > { %v2442_v29 = vpop.f32.mrf.mxu1 }
 0x2c3   : > { %vm2505_vm14 = vcmp.gt.f32.partialorder %v2441_v47, 0.0  ;;  %v2537_v18 = vmul.f32 0.02, %v2441_v47  ;;  %v2443_v14 = vadd.f32 %v2442_v29, %v2330_v26  ;;  %v2568_v39 = vsel %vm2504_vm15, %v2439_v54, %v2536_v53  ;;  %v4595_v53 = vld [vmem:[%s6824_s9 + $0x10] sm:$0xff]  }
 0x2c4   : > { %4294 = vmatprep.subr.bf16.mxu1 %v4595_v53 }
 0x2c5   : > { %vm2506_vm2 = vcmp.gt.f32.partialorder %v2443_v14, 0.0  ;;  %v2538_v4 = vmul.f32 0.02, %v2443_v14  ;;  %v2569_v20 = vsel %vm2505_vm14, %v2441_v47, %v2537_v18  ;;  %4295 = vmatpush3.bf16.msra.mxu1 %v4595_v53 }
 0x2c6   : > { %v2595_v59 = vpack.c.bf16 %v2569_v20, %v2567_v50 }
 0x2c7   : > { %v2570_v3 = vsel %vm2506_vm2, %v2443_v14, %v2538_v4 }
 0x2c8   : > { %v2596_v49 = vpack.c.bf16 %v2570_v3, %v2568_v39 }
 0x2ca   : > { %2790 = vmatprep.mubr.bf16.mxu0 %v2596_v49 }
 0x2cb   : > { %v2333_v10 = vpop.f32.mrf.mxu0  ;;  %2791 = vmatmul.mubr.bf16.gmra.mxu0 %v2595_v59 }
 0x2cc   : > { %v2334_v37 = vadd.f32 %v2333_v10, %v6295_v22 }
 0x2cd   : > { %v2335_v19 = vpop.f32.mrf.mxu0 }
 0x2ce   : > { %v2336_v32 = vadd.f32 %v2335_v19, %v6298_v11 }
 0x2cf   : > { %v2337_v16 = vpop.f32.mrf.mxu0 }
 0x2d0   : > { %v2446_v15 = vpop.f32.mrf.mxu1  ;;  %v2338_v43 = vadd.f32 %v2337_v16, %v6295_v22 }
 0x2d1   : > { %v2339_v21 = vpop.f32.mrf.mxu0  ;;  %v2447_v24 = vadd.f32 %v2446_v15, %v2334_v37 }
 0x2d2   : > { %v2448_v6 = vpop.f32.mrf.mxu1  ;;  %v2340_v17 = vadd.f32 %v2339_v21, %v6298_v11 }
 0x2d3   : > { %v2449_v28 = vadd.f32 %v2448_v6, %v2336_v32  ;;  %v2539_v33 = vmul.f32 0.02, %v2447_v24  ;;  %vm2507_vm5 = vcmp.gt.f32.partialorder %v2447_v24, 0.0 }
 0x2d4   : > { %v2450_v45 = vpop.f32.mrf.mxu1 }
 0x2d5   : > { %v2451_v62 = vadd.f32 %v2450_v45, %v2338_v43  ;;  %v2540_v34 = vmul.f32 0.02, %v2449_v28  ;;  %vm2508_vm4 = vcmp.gt.f32.partialorder %v2449_v28, 0.0  ;;  %v2571_v57 = vsel %vm2507_vm5, %v2447_v24, %v2539_v33  ;;  %v4596_v45 = vld [vmem:[%s6824_s9 + $0x8] sm:$0xff]  }
 0x2d6   : > { %v2452_v5 = vpop.f32.mrf.mxu1  ;;  %4296 = vmatprep.subr.bf16.mxu1 %v4596_v45 }
 0x2d7   : > { %vm2509_vm3 = vcmp.gt.f32.partialorder %v2451_v62, 0.0  ;;  %v2541_v46 = vmul.f32 0.02, %v2451_v62  ;;  %v2453_v60 = vadd.f32 %v2452_v5, %v2340_v17  ;;  %v2572_v13 = vsel %vm2508_vm4, %v2449_v28, %v2540_v34  ;;  %4297 = vmatpush3.bf16.msra.mxu1 %v4596_v45 }
 0x2d9   : > { %v2343_v63 = vpop.f32.mrf.mxu0  ;;  %vm2510_vm6 = vcmp.gt.f32.partialorder %v2453_v60, 0.0  ;;  %v2542_v55 = vmul.f32 0.02, %v2453_v60  ;;  %v2573_v41 = vsel %vm2509_vm3, %v2451_v62, %v2541_v46 }
 0x2da   : > { %v2344_v7 = vadd.f32 %v2343_v63, %v6295_v22  ;;  %v2597_v40 = vpack.c.bf16 %v2573_v41, %v2571_v57 }
 0x2db   : > { %v2345_v35 = vpop.f32.mrf.mxu0  ;;  %v2574_v36 = vsel %vm2510_vm6, %v2453_v60, %v2542_v55 }
 0x2dc   : > { %v2346_v8 = vadd.f32 %v2345_v35, %v6298_v11  ;;  %v2598_v12 = vpack.c.bf16 %v2574_v36, %v2572_v13 }
 0x2dd   : > { %v2347_v58 = vpop.f32.mrf.mxu0 }
 0x2de   : > { %v2348_v25 = vadd.f32 %v2347_v58, %v6295_v22  ;;  %2798 = vmatprep.mubr.bf16.mxu0 %v2598_v12 }
 0x2df   : > { %v2349_v44 = vpop.f32.mrf.mxu0  ;;  %2799 = vmatmul.mubr.bf16.gmra.mxu0 %v2597_v40 }
 0x2e0   : > { %v2456_v31 = vpop.f32.mrf.mxu1  ;;  %v2350_v27 = vadd.f32 %v2349_v44, %v6298_v11 }
 0x2e1   : > { %v2457_v51 = vadd.f32 %v2456_v31, %v2344_v7 }
 0x2e2   : > { %v2458_v0 = vpop.f32.mrf.mxu1 }
 0x2e3   : > { %v2459_v38 = vadd.f32 %v2458_v0, %v2346_v8  ;;  %v2543_v56 = vmul.f32 0.02, %v2457_v51  ;;  %vm2511_vm9 = vcmp.gt.f32.partialorder %v2457_v51, 0.0 }
 0x2e4   : > { %v2460_v61 = vpop.f32.mrf.mxu1 }
 0x2e5   : > { %v2461_v30 = vadd.f32 %v2460_v61, %v2348_v25  ;;  %v2544_v23 = vmul.f32 0.02, %v2459_v38  ;;  %vm2512_vm8 = vcmp.gt.f32.partialorder %v2459_v38, 0.0  ;;  %v2575_v2 = vsel %vm2511_vm9, %v2457_v51, %v2543_v56 }
 0x2e6   : > { %v2462_v1 = vpop.f32.mrf.mxu1 }
 0x2e7   : > { %vm2513_vm7 = vcmp.gt.f32.partialorder %v2461_v30, 0.0  ;;  %v2545_v48 = vmul.f32 0.02, %v2461_v30  ;;  %v2463_v52 = vadd.f32 %v2462_v1, %v2350_v27  ;;  %v2576_v47 = vsel %vm2512_vm8, %v2459_v38, %v2544_v23 }
 0x2e9   : > { %vm2514_vm10 = vcmp.gt.f32.partialorder %v2463_v52, 0.0  ;;  %v2546_v54 = vmul.f32 0.02, %v2463_v52  ;;  %v2577_v42 = vsel %vm2513_vm7, %v2461_v30, %v2545_v48 }
 0x2ea   : > { %v2353_v26 = vpop.f32.mrf.mxu0  ;;  %v2599_v3 = vpack.c.bf16 %v2577_v42, %v2575_v2 }
 0x2eb   : > { %v2578_v29 = vsel %vm2514_vm10, %v2463_v52, %v2546_v54  ;;  %v2354_v4 = vadd.f32 %v2353_v26, %v6295_v22 }
 0x2ec   : > { %v2355_v9 = vpop.f32.mrf.mxu0  ;;  %v2600_v14 = vpack.c.bf16 %v2578_v29, %v2576_v47 }
 0x2ed   : > { %v2356_v18 = vadd.f32 %v2355_v9, %v6298_v11 }
 0x2ee   : > { %v2466_v20 = vpop.f32.mrf.mxu1  ;;  %v2357_v39 = vpop.f32.mrf.mxu0  ;;  %2806 = vmatprep.mubr.bf16.mxu0 %v2600_v14 }
 0x2ef   : > { %v2358_v49 = vadd.f32 %v2357_v39, %v6295_v22  ;;  %2807 = vmatmul.mubr.bf16.gmra.mxu0 %v2599_v3  ;;  %v2467_v32 = vadd.f32 %v2466_v20, %v2354_v4 }
 0x2f0   : > { %v2468_v50 = vpop.f32.mrf.mxu1  ;;  %v2359_v59 = vpop.f32.mrf.mxu0 }
 0x2f1   : > { %v2469_v10 = vadd.f32 %v2468_v50, %v2356_v18  ;;  %v2360_v19 = vadd.f32 %v2359_v59, %v6298_v11  ;;  %v2547_v28 = vmul.f32 0.02, %v2467_v32  ;;  %vm2515_vm13 = vcmp.gt.f32.partialorder %v2467_v32, 0.0 }
 0x2f2   : > { %v2470_v37 = vpop.f32.mrf.mxu1 }
 0x2f3   : > { %v2471_v15 = vadd.f32 %v2470_v37, %v2358_v49  ;;  %v2548_v43 = vmul.f32 0.02, %v2469_v10  ;;  %vm2516_vm12 = vcmp.gt.f32.partialorder %v2469_v10, 0.0  ;;  %v2579_v55 = vsel %vm2515_vm13, %v2467_v32, %v2547_v28  ;;  %v4597_v49 = vld [vmem:[%s6824_s9] sm:$0xff]  }
 0x2f4   : > { %v2472_v16 = vpop.f32.mrf.mxu1  ;;  %4298 = vmatprep.subr.bf16.mxu1 %v4597_v49 }
 0x2f5   : > { %vm2517_vm11 = vcmp.gt.f32.partialorder %v2471_v15, 0.0  ;;  %v2549_v6 = vmul.f32 0.02, %v2471_v15  ;;  %v2473_v21 = vadd.f32 %v2472_v16, %v2360_v19  ;;  %v2580_v34 = vsel %vm2516_vm12, %v2469_v10, %v2548_v43  ;;  %4299 = vmatpush3.bf16.msra.mxu1 %v4597_v49 }
 0x2f7   : > { %v2363_v17 = vpop.f32.mrf.mxu0  ;;  %vm2518_vm14 = vcmp.gt.f32.partialorder %v2473_v21, 0.0  ;;  %v2550_v24 = vmul.f32 0.02, %v2473_v21  ;;  %v2581_v5 = vsel %vm2517_vm11, %v2471_v15, %v2549_v6 }
 0x2f8   : > { %v2364_v35 = vadd.f32 %v2363_v17, %v6295_v22  ;;  %v2601_v13 = vpack.c.bf16 %v2581_v5, %v2579_v55 }
 0x2f9   : > { %v2365_v62 = vpop.f32.mrf.mxu0  ;;  %v2582_v46 = vsel %vm2518_vm14, %v2473_v21, %v2550_v24  ;;  %v6353_v21 = vld [vmem:[%s6823_s8] ss:$0 sm:$0xff] }
 0x2fa   : > { %v2366_v60 = vadd.f32 %v2365_v62, %v6298_v11  ;;  %v2602_v63 = vpack.c.bf16 %v2582_v46, %v2580_v34 }
 0x2fb   : > { %v2367_v33 = vpop.f32.mrf.mxu0 }
 0x2fc   : > { %v2368_v36 = vadd.f32 %v2367_v33, %v6295_v22  ;;  %2814 = vmatprep.mubr.bf16.mxu0 %v2602_v63 }
 0x2fd   : > { %v2369_v8 = vpop.f32.mrf.mxu0  ;;  %2815 = vmatmul.mubr.bf16.gmra.mxu0 %v2601_v13 }
 0x2fe   : > { %v2476_v41 = vpop.f32.mrf.mxu1  ;;  %v2370_v57 = vadd.f32 %v2369_v8, %v6298_v11 }
 0x2ff   : > { %v2477_v7 = vadd.f32 %v2476_v41, %v2364_v35 }
 0x300   : > { %v2478_v58 = vpop.f32.mrf.mxu1 }
 0x301   : > { %v2479_v12 = vadd.f32 %v2478_v58, %v2366_v60  ;;  %v2551_v27 = vmul.f32 0.02, %v2477_v7  ;;  %vm2519_vm2 = vcmp.gt.f32.partialorder %v2477_v7, 0.0 }
 0x302   : > { %v2480_v31 = vpop.f32.mrf.mxu1 }
 0x303   : > { %v2481_v40 = vadd.f32 %v2480_v31, %v2368_v36  ;;  %v2552_v44 = vmul.f32 0.02, %v2479_v12  ;;  %vm2520_vm0 = vcmp.gt.f32.partialorder %v2479_v12, 0.0  ;;  %v2583_v54 = vsel %vm2519_vm2, %v2477_v7, %v2551_v27 }
 0x304   : > { %v2482_v25 = vpop.f32.mrf.mxu1 }
 0x305   : > { %vm2521_vm15 = vcmp.gt.f32.partialorder %v2481_v40, 0.0  ;;  %v2553_v0 = vmul.f32 0.02, %v2481_v40  ;;  %v2483_v38 = vadd.f32 %v2482_v25, %v2370_v57  ;;  %v2584_v23 = vsel %vm2520_vm0, %v2479_v12, %v2552_v44 }
 0x306   : > { %v2373_v61 = vpop.f32.mrf.mxu0 }
 0x307   : > { %vm2522_vm3 = vcmp.gt.f32.partialorder %v2483_v38, 0.0  ;;  %v2554_v51 = vmul.f32 0.02, %v2483_v38  ;;  %v2585_v30 = vsel %vm2521_vm15, %v2481_v40, %v2553_v0  ;;  %v2374_v26 = vadd.f32 %v2373_v61, %v6295_v22 }
 0x308   : > { %v2375_v1 = vpop.f32.mrf.mxu0  ;;  %v2603_v47 = vpack.c.bf16 %v2585_v30, %v2583_v54 }
 0x309   : > { %v2586_v48 = vsel %vm2522_vm3, %v2483_v38, %v2554_v51  ;;  %v2376_v52 = vadd.f32 %v2375_v1, %v6298_v11 }
 0x30a   : > { %v2604_v56 = vpack.c.bf16 %v2586_v48, %v2584_v23  ;;  %v2377_v9 = vpop.f32.mrf.mxu0 }
 0x30b   : > { %v2486_v42 = vpop.f32.mrf.mxu1  ;;  %v2378_v29 = vadd.f32 %v2377_v9, %v6295_v22 }
 0x30c   : > { %2822 = vmatprep.mubr.bf16.mxu0 %v2604_v56  ;;  %v2379_v18 = vpop.f32.mrf.mxu0  ;;  %v2487_v4 = vadd.f32 %v2486_v42, %v2374_v26 }
 0x30d   : > { %v2488_v53 = vpop.f32.mrf.mxu1  ;;  %2823 = vmatmul.mubr.bf16.gmra.mxu0 %v2603_v47  ;;  %v2380_v2 = vadd.f32 %v2379_v18, %v6298_v11 }
 0x30e   : > { %v2489_v14 = vadd.f32 %v2488_v53, %v2376_v52  ;;  %v2555_v22 = vmul.f32 0.02, %v2487_v4  ;;  %vm2523_vm6 = vcmp.gt.f32.partialorder %v2487_v4, 0.0 }
 0x30f   : > { %v2490_v20 = vpop.f32.mrf.mxu1 }
 0x310   : > { %v2491_v39 = vadd.f32 %v2490_v20, %v2378_v29  ;;  %v2556_v50 = vmul.f32 0.02, %v2489_v14  ;;  %vm2524_vm5 = vcmp.gt.f32.partialorder %v2489_v14, 0.0  ;;  %v2587_v16 = vsel %vm2523_vm6, %v2487_v4, %v2555_v22 }
 0x311   : > { %v2492_v3 = vpop.f32.mrf.mxu1 }
 0x312   : > { %vm2525_vm4 = vcmp.gt.f32.partialorder %v2491_v39, 0.0  ;;  %v2557_v59 = vmul.f32 0.02, %v2491_v39  ;;  %v2493_v10 = vadd.f32 %v2492_v3, %v2380_v2  ;;  %v2588_v32 = vsel %vm2524_vm5, %v2489_v14, %v2556_v50 }
 0x314   : > { %vm2526_vm7 = vcmp.gt.f32.partialorder %v2493_v10, 0.0  ;;  %v2558_v19 = vmul.f32 0.02, %v2493_v10  ;;  %v2589_v11 = vsel %vm2525_vm4, %v2491_v39, %v2557_v59 }
 0x315   : > { %v2605_v43 = vpack.c.bf16 %v2589_v11, %v2587_v16 }
 0x316   : > { %v2590_v37 = vsel %vm2526_vm7, %v2493_v10, %v2558_v19 }
 0x317   : > { %v2606_v15 = vpack.c.bf16 %v2590_v37, %v2588_v32 }
 0x319   : > { %2830 = vmatprep.mubr.bf16.mxu0 %v2606_v15 }
 0x31a   : > { %2831 = vmatmul.mubr.bf16.gmra.mxu0 %v2605_v43 }
 0x365   : > { %v4208_v6 = vpop.f32.mrf.mxu0 }
 0x367   : > { %v4209_v28 = vpop.f32.mrf.mxu0 }
 0x368   : > { %v4210_v17 = vadd.f32 %v4209_v28, %v4208_v6 }
 0x369   : > { %v4211_v24 = vpop.f32.mrf.mxu0 }
 0x36a   : > { %v2777_v45 = vadd.f32 %v4210_v17, %v6353_v21 }
 0x36b   : > { %v4212_v62 = vpop.f32.mrf.mxu0 }
 0x36c   : > { %v4213_v5 = vadd.f32 %v4212_v62, %v4211_v24  ;;  %v2855_v34 = vmul.f32 0.02, %v2777_v45  ;;  %vm2839_vm8 = vcmp.gt.f32.partialorder %v2777_v45, 0.0 }
 0x36e   : > { %v2780_v46 = vadd.f32 %v4213_v5, %v6353_v21  ;;  %v2871_v33 = vsel %vm2839_vm8, %v2777_v45, %v2855_v34 }
 0x370   : > { %vm2840_vm9 = vcmp.gt.f32.partialorder %v2780_v46, 0.0  ;;  %v2856_v60 = vmul.f32 0.02, %v2780_v46 }
 0x372   : > { %v2872_v63 = vsel %vm2840_vm9, %v2780_v46, %v2856_v60 }
 0x373   : > { %v2887_v55 = vpack.c.bf16 %v2872_v63, %v2871_v33 }
 0x375   : > { %4300 = vmatprep.mubr.bf16.mxu1 %v2887_v55 }
 0x37b   : > { %v4214_v35 = vpop.f32.mrf.mxu0 }
 0x37d   : > { %v4215_v41 = vpop.f32.mrf.mxu0 }
 0x37e   : > { %v4216_v13 = vadd.f32 %v4215_v41, %v4214_v35 }
 0x37f   : > { %v4217_v36 = vpop.f32.mrf.mxu0 }
 0x380   : > { %v2785_v8 = vadd.f32 %v4216_v13, %v6353_v21 }
 0x381   : > { %v4218_v58 = vpop.f32.mrf.mxu0 }
 0x382   : > { %v4219_v12 = vadd.f32 %v4218_v58, %v4217_v36  ;;  %v2857_v57 = vmul.f32 0.02, %v2785_v8  ;;  %vm2841_vm10 = vcmp.gt.f32.partialorder %v2785_v8, 0.0 }
 0x384   : > { %v2788_v7 = vadd.f32 %v4219_v12, %v6353_v21  ;;  %v2873_v40 = vsel %vm2841_vm10, %v2785_v8, %v2857_v57 }
 0x386   : > { %vm2842_vm11 = vcmp.gt.f32.partialorder %v2788_v7, 0.0  ;;  %v2858_v31 = vmul.f32 0.02, %v2788_v7 }
 0x388   : > { %v2874_v25 = vsel %vm2842_vm11, %v2788_v7, %v2858_v31 }
 0x389   : > { %v2888_v44 = vpack.c.bf16 %v2874_v25, %v2873_v40 }
 0x38b   : > { %4301 = vmatmul.mubr.bf16.vlgmr.msra.gmra.mxu1 %v2888_v44  ;;  %v4220_v0 = vpop.f32.mrf.mxu0 }
 0x38d   : > { %v4221_v38 = vpop.f32.mrf.mxu0 }
 0x38e   : > { %v4222_v27 = vadd.f32 %v4221_v38, %v4220_v0 }
 0x38f   : > { %v4223_v51 = vpop.f32.mrf.mxu0 }
 0x390   : > { %v2793_v61 = vadd.f32 %v4222_v27, %v6353_v21 }
 0x391   : > { %v4224_v30 = vpop.f32.mrf.mxu0 }
 0x392   : > { %v4225_v1 = vadd.f32 %v4224_v30, %v4223_v51  ;;  %v2859_v23 = vmul.f32 0.02, %v2793_v61  ;;  %vm2843_vm12 = vcmp.gt.f32.partialorder %v2793_v61, 0.0 }
 0x394   : > { %v2796_v48 = vadd.f32 %v4225_v1, %v6353_v21  ;;  %v2875_v56 = vsel %vm2843_vm12, %v2793_v61, %v2859_v23 }
 0x396   : > { %vm2844_vm13 = vcmp.gt.f32.partialorder %v2796_v48, 0.0  ;;  %v2860_v52 = vmul.f32 0.02, %v2796_v48 }
 0x398   : > { %v2876_v54 = vsel %vm2844_vm13, %v2796_v48, %v2860_v52 }
 0x399   : > { %v2889_v26 = vpack.c.bf16 %v2876_v54, %v2875_v56 }
 0x39b   : > { %4304 = vmatprep.mubr.bf16.mxu1 %v2889_v26 }
 0x39f   : > { %v4226_v42 = vpop.f32.mrf.mxu0 }
 0x3a1   : > { %v4227_v9 = vpop.f32.mrf.mxu0 }
 0x3a2   : > { %v4228_v47 = vadd.f32 %v4227_v9, %v4226_v42 }
 0x3a3   : > { %v4229_v29 = vpop.f32.mrf.mxu0 }
 0x3a4   : > { %v2801_v53 = vadd.f32 %v4228_v47, %v6353_v21  ;;  %v6374_v47 = vld [vmem:[%s6825_s10] ss:$0 sm:$0xff] }
 0x3a5   : > { %v4230_v18 = vpop.f32.mrf.mxu0 }
 0x3a6   : > { %v4231_v14 = vadd.f32 %v4230_v18, %v4229_v29  ;;  %v2861_v2 = vmul.f32 0.02, %v2801_v53  ;;  %vm2845_vm14 = vcmp.gt.f32.partialorder %v2801_v53, 0.0 }
 0x3a8   : > { %v2804_v4 = vadd.f32 %v4231_v14, %v6353_v21  ;;  %v2877_v3 = vsel %vm2845_vm14, %v2801_v53, %v2861_v2 }
 0x3aa   : > { %vm2846_vm15 = vcmp.gt.f32.partialorder %v2804_v4, 0.0  ;;  %v2862_v20 = vmul.f32 0.02, %v2804_v4 }
 0x3ac   : > { %v2878_v49 = vsel %vm2846_vm15, %v2804_v4, %v2862_v20 }
 0x3ad   : > { %v2890_v50 = vpack.c.bf16 %v2878_v49, %v2877_v3 }
 0x3af   : > { %v4232_v39 = vpop.f32.mrf.mxu0  ;;  %4305 = vmatmul.mubr.bf16.gmra.mxu1 %v2890_v50 }
 0x3b1   : > { %v4233_v59 = vpop.f32.mrf.mxu0 }
 0x3b2   : > { %v4234_v10 = vadd.f32 %v4233_v59, %v4232_v39 }
 0x3b3   : > { %v4235_v22 = vpop.f32.mrf.mxu0 }
 0x3b4   : > { %v2809_v19 = vadd.f32 %v4234_v10, %v6353_v21 }
 0x3b5   : > { %v4236_v11 = vpop.f32.mrf.mxu0 }
 0x3b6   : > { %v4237_v32 = vadd.f32 %v4236_v11, %v4235_v22  ;;  %v2863_v37 = vmul.f32 0.02, %v2809_v19  ;;  %vm2847_vm0 = vcmp.gt.f32.partialorder %v2809_v19, 0.0 }
 0x3b8   : > { %v2812_v15 = vadd.f32 %v4237_v32, %v6353_v21  ;;  %v2879_v6 = vsel %vm2847_vm0, %v2809_v19, %v2863_v37 }
 0x3ba   : > { %vm2848_vm2 = vcmp.gt.f32.partialorder %v2812_v15, 0.0  ;;  %v2864_v16 = vmul.f32 0.02, %v2812_v15 }
 0x3bc   : > { %v2880_v28 = vsel %vm2848_vm2, %v2812_v15, %v2864_v16 }
 0x3bd   : > { %v4238_v43 = vpop.f32.mrf.mxu0  ;;  %v2891_v17 = vpack.c.bf16 %v2880_v28, %v2879_v6 }
 0x3bf   : > { %v4239_v24 = vpop.f32.mrf.mxu0  ;;  %4308 = vmatprep.mubr.bf16.mxu1 %v2891_v17 }
 0x3c0   : > { %v4240_v45 = vadd.f32 %v4239_v24, %v4238_v43 }
 0x3c1   : > { %v4241_v62 = vpop.f32.mrf.mxu0 }
 0x3c2   : > { %v2817_v5 = vadd.f32 %v4240_v45, %v6353_v21 }
 0x3c3   : > { %v4242_v34 = vpop.f32.mrf.mxu0 }
 0x3c4   : > { %v4243_v46 = vadd.f32 %v4242_v34, %v4241_v62  ;;  %v2865_v60 = vmul.f32 0.02, %v2817_v5  ;;  %vm2849_vm3 = vcmp.gt.f32.partialorder %v2817_v5, 0.0 }
 0x3c6   : > { %v2820_v33 = vadd.f32 %v4243_v46, %v6353_v21  ;;  %v2881_v35 = vsel %vm2849_vm3, %v2817_v5, %v2865_v60 }
 0x3c8   : > { %vm2850_vm4 = vcmp.gt.f32.partialorder %v2820_v33, 0.0  ;;  %v2866_v63 = vmul.f32 0.02, %v2820_v33 }
 0x3ca   : > { %v2882_v41 = vsel %vm2850_vm4, %v2820_v33, %v2866_v63 }
 0x3cb   : > { %v2892_v13 = vpack.c.bf16 %v2882_v41, %v2881_v35 }
 0x3cd   : > { %v4244_v55 = vpop.f32.mrf.mxu0  ;;  %4309 = vmatmul.mubr.bf16.gmra.mxu1 %v2892_v13 }
 0x3cf   : > { %v4245_v36 = vpop.f32.mrf.mxu0 }
 0x3d0   : > { %v4246_v8 = vadd.f32 %v4245_v36, %v4244_v55 }
 0x3d1   : > { %v4247_v58 = vpop.f32.mrf.mxu0 }
 0x3d2   : > { %v2825_v12 = vadd.f32 %v4246_v8, %v6353_v21 }
 0x3d3   : > { %v4248_v57 = vpop.f32.mrf.mxu0 }
 0x3d4   : > { %v4249_v7 = vadd.f32 %v4248_v57, %v4247_v58  ;;  %v2867_v31 = vmul.f32 0.02, %v2825_v12  ;;  %vm2851_vm5 = vcmp.gt.f32.partialorder %v2825_v12, 0.0 }
 0x3d6   : > { %v2828_v40 = vadd.f32 %v4249_v7, %v6353_v21  ;;  %v2883_v0 = vsel %vm2851_vm5, %v2825_v12, %v2867_v31 }
 0x3d8   : > { %vm2852_vm6 = vcmp.gt.f32.partialorder %v2828_v40, 0.0  ;;  %v2868_v25 = vmul.f32 0.02, %v2828_v40 }
 0x3da   : > { %v4250_v44 = vpop.f32.mrf.mxu0  ;;  %v2884_v38 = vsel %vm2852_vm6, %v2828_v40, %v2868_v25 }
 0x3db   : > { %v2893_v27 = vpack.c.bf16 %v2884_v38, %v2883_v0 }
 0x3dc   : > { %v4251_v51 = vpop.f32.mrf.mxu0 }
 0x3dd   : > { %v4252_v61 = vadd.f32 %v4251_v51, %v4250_v44  ;;  %4312 = vmatprep.mubr.bf16.mxu1 %v2893_v27 }
 0x3de   : > { %v4253_v30 = vpop.f32.mrf.mxu0 }
 0x3df   : > { %v2833_v1 = vadd.f32 %v4252_v61, %v6353_v21 }
 0x3e0   : > { %v4254_v23 = vpop.f32.mrf.mxu0 }
 0x3e1   : > { %v4255_v48 = vadd.f32 %v4254_v23, %v4253_v30  ;;  %v2869_v52 = vmul.f32 0.02, %v2833_v1  ;;  %vm2853_vm7 = vcmp.gt.f32.partialorder %v2833_v1, 0.0 }
 0x3e3   : > { %v2836_v56 = vadd.f32 %v4255_v48, %v6353_v21  ;;  %v2885_v26 = vsel %vm2853_vm7, %v2833_v1, %v2869_v52 }
 0x3e5   : > { %vm2854_vm8 = vcmp.gt.f32.partialorder %v2836_v56, 0.0  ;;  %v2870_v54 = vmul.f32 0.02, %v2836_v56 }
 0x3e7   : > { %v2886_v42 = vsel %vm2854_vm8, %v2836_v56, %v2870_v54  ;;  %v4598_v54 = vld [vmem:[%s6828_s13 + $0x18] sm:$0xff]  }
 0x3e8   : > { %v2894_v9 = vpack.c.bf16 %v2886_v42, %v2885_v26  ;;  %4316 = vmatprep.subr.bf16.mxu1 %v4598_v54  ;;  %v4599_v42 = vld [vmem:[%s6828_s13 + $0x10] sm:$0xff]  }
 0x3e9   : > { %4317 = vmatpush3.bf16.msra.mxu1 %v4598_v54 }
 0x3ea   : > { %4313 = vmatmul.mubr.bf16.gmra.mxu1 %v2894_v9  ;;  %4318 = vmatprep.subr.bf16.mxu1 %v4599_v42 }
 0x3ed   : > { %4319 = vmatpush3.bf16.msra.mxu1 %v4599_v42 }
 0x44b   : > { %v4302_v29 = vpop.f32.mrf.mxu1 }
 0x44c   : > { %v6377_v53 = vadd.f32 %v4302_v29, %v6374_v47 }
 0x44d   : > { %v3000_v18 = vpop.f32.mrf.mxu1 }
 0x44e   : > { %v6380_v14 = vadd.f32 %v6374_v47, %v3000_v18  ;;  %v3071_v21 = vsel %vm762_vm1, %v6377_v53, 0.0  ;;  %v3115_v50 = vmul.f32 %v6377_v53, %v6377_v53 }
 0x44f   : > { %3072 = vadd.xlane.f32.xlu0 %v3071_v21  ;;  %v4303_v2 = vpop.f32.mrf.mxu1 }
 0x450   : > { %v6385_v4 = vadd.f32 %v4303_v2, %v6374_v47  ;;  %v3065_v49 = vsel %vm762_vm1, %v6380_v14, 0.0  ;;  %v3135_v10 = vsel %vm762_vm1, %v3115_v50, 0.0  ;;  %v3113_v19 = vmul.f32 %v6380_v14, %v6380_v14 }
 0x451   : > { %v3003_v20 = vpop.f32.mrf.mxu1 }
 0x452   : > { %v6388_v39 = vadd.f32 %v6374_v47, %v3003_v20  ;;  %v3074_v3 = vsel %vm762_vm1, %v6385_v4, 0.0  ;;  %v3116_v22 = vmul.f32 %v6385_v4, %v6385_v4  ;;  %v3129_v32 = vsel %vm762_vm1, %v3113_v19, 0.0 }
 0x453   : > { %3075 = vadd.xlane.f32.xlu1 %v3074_v3  ;;  %3066 = vadd.xlane.f32.xlu0 %v3065_v49  ;;  %v4600_v3 = vld [vmem:[%s6828_s13 + $0x8] sm:$0xff]  }
 0x454   : > { %v3068_v59 = vsel %vm762_vm1, %v6388_v39, 0.0  ;;  %v3138_v11 = vsel %vm762_vm1, %v3116_v22, 0.0  ;;  %v3114_v37 = vmul.f32 %v6388_v39, %v6388_v39  ;;  %4320 = vmatprep.subr.bf16.mxu1 %v4600_v3 }
 0x455   : > { %4321 = vmatpush3.bf16.msra.mxu1 %v4600_v3  ;;  %v6520_v3 = vld [vmem:[%s6826_s11] ss:$0 sm:$0xff] }
 0x456   : > { %v3132_v15 = vsel %vm762_vm1, %v3114_v37, 0.0 }
 0x457   : > { %3069 = vadd.xlane.f32.xlu1 %v3068_v59  ;;  %3136 = vadd.xlane.f32.xlu0 %v3135_v10 }
 0x45b   : > { %3139 = vadd.xlane.f32.xlu1 %v3138_v11  ;;  %3130 = vadd.xlane.f32.xlu0 %v3129_v32  ;;  %v4601_v11 = vld [vmem:[%s6828_s13] sm:$0xff]  }
 0x45c   : > { %4322 = vmatprep.subr.bf16.mxu1 %v4601_v11 }
 0x45d   : > { %4323 = vmatpush3.bf16.msra.mxu1 %v4601_v11 }
 0x45f   : > { %3133 = vadd.xlane.f32.xlu1 %v3132_v15 }
 0x46f   : > { %v4306_v16 = vpop.f32.mrf.mxu1 }
 0x470   : > { %v6409_v43 = vadd.f32 %v4306_v16, %v6374_v47 }
 0x471   : > { %v3016_v6 = vpop.f32.mrf.mxu1 }
 0x472   : > { %v6412_v28 = vadd.f32 %v6374_v47, %v3016_v6  ;;  %v3083_v17 = vsel %vm762_vm1, %v6409_v43, 0.0  ;;  %v3119_v60 = vmul.f32 %v6409_v43, %v6409_v43 }
 0x473   : > { %v4307_v24 = vpop.f32.mrf.mxu1  ;;  %3084 = vadd.xlane.f32.xlu0 %v3083_v17 }
 0x474   : > { %v6417_v45 = vadd.f32 %v4307_v24, %v6374_v47  ;;  %v3077_v46 = vsel %vm762_vm1, %v6412_v28, 0.0  ;;  %v3147_v63 = vsel %vm762_vm1, %v3119_v60, 0.0  ;;  %v3117_v35 = vmul.f32 %v6412_v28, %v6412_v28 }
 0x475   : > { %v3019_v62 = vpop.f32.mrf.mxu1 }
 0x476   : > { %v6420_v5 = vadd.f32 %v6374_v47, %v3019_v62  ;;  %v3086_v34 = vsel %vm762_vm1, %v6417_v45, 0.0  ;;  %v3120_v55 = vmul.f32 %v6417_v45, %v6417_v45  ;;  %v3141_v13 = vsel %vm762_vm1, %v3117_v35, 0.0 }
 0x477   : > { %3087 = vadd.xlane.f32.xlu1 %v3086_v34  ;;  %3078 = vadd.xlane.f32.xlu0 %v3077_v46 }
 0x478   : > { %v3080_v33 = vsel %vm762_vm1, %v6420_v5, 0.0  ;;  %v3150_v41 = vsel %vm762_vm1, %v3120_v55, 0.0  ;;  %v3118_v36 = vmul.f32 %v6420_v5, %v6420_v5 }
 0x47a   : > { %v3144_v8 = vsel %vm762_vm1, %v3118_v36, 0.0 }
 0x47b   : > { %3081 = vadd.xlane.f32.xlu1 %v3080_v33  ;;  %3148 = vadd.xlane.f32.xlu0 %v3147_v63 }
 0x47f   : > { %3151 = vadd.xlane.f32.xlu1 %v3150_v41  ;;  %3142 = vadd.xlane.f32.xlu0 %v3141_v13 }
 0x483   : > { %3145 = vadd.xlane.f32.xlu1 %v3144_v8 }
 0x48d   : > { %v4310_v58 = vpop.f32.mrf.mxu1 }
 0x48e   : > { %v6441_v12 = vadd.f32 %v4310_v58, %v6374_v47 }
 0x48f   : > { %v3032_v57 = vpop.f32.mrf.mxu1 }
 0x490   : > { %v6444_v7 = vadd.f32 %v6374_v47, %v3032_v57  ;;  %v3095_v31 = vsel %vm762_vm1, %v6441_v12, 0.0  ;;  %v3123_v51 = vmul.f32 %v6441_v12, %v6441_v12 }
 0x491   : > { %v4311_v40 = vpop.f32.mrf.mxu1  ;;  %3096 = vadd.xlane.f32.xlu0 %v3095_v31 }
 0x492   : > { %v6449_v25 = vadd.f32 %v4311_v40, %v6374_v47  ;;  %v3089_v27 = vsel %vm762_vm1, %v6444_v7, 0.0  ;;  %v3159_v30 = vsel %vm762_vm1, %v3123_v51, 0.0  ;;  %v3121_v23 = vmul.f32 %v6444_v7, %v6444_v7 }
 0x493   : > { %v3035_v44 = vpop.f32.mrf.mxu1 }
 0x494   : > { %v6452_v0 = vadd.f32 %v6374_v47, %v3035_v44  ;;  %v3098_v38 = vsel %vm762_vm1, %v6449_v25, 0.0  ;;  %v3124_v1 = vmul.f32 %v6449_v25, %v6449_v25  ;;  %v3153_v52 = vsel %vm762_vm1, %v3121_v23, 0.0 }
 0x495   : > { %3099 = vadd.xlane.f32.xlu1 %v3098_v38  ;;  %3090 = vadd.xlane.f32.xlu0 %v3089_v27 }
 0x496   : > { %v3092_v61 = vsel %vm762_vm1, %v6452_v0, 0.0  ;;  %v3162_v48 = vsel %vm762_vm1, %v3124_v1, 0.0  ;;  %v3122_v56 = vmul.f32 %v6452_v0, %v6452_v0 }
 0x498   : > { %v3156_v26 = vsel %vm762_vm1, %v3122_v56, 0.0 }
 0x499   : > { %3093 = vadd.xlane.f32.xlu1 %v3092_v61  ;;  %3160 = vadd.xlane.f32.xlu0 %v3159_v30 }
 0x49d   : > { %3163 = vadd.xlane.f32.xlu1 %v3162_v48  ;;  %3154 = vadd.xlane.f32.xlu0 %v3153_v52 }
 0x4a1   : > { %3157 = vadd.xlane.f32.xlu1 %v3156_v26 }
 0x4aa   : > { %v4314_v9 = vpop.f32.mrf.mxu1 }
 0x4ab   : > { %v6479_v29 = vadd.f32 %v4314_v9, %v6374_v47 }
 0x4ac   : > { %v3048_v18 = vpop.f32.mrf.mxu1 }
 0x4ad   : > { %v6482_v21 = vadd.f32 %v6374_v47, %v3048_v18  ;;  %v3107_v2 = vsel %vm762_vm1, %v6479_v29, 0.0  ;;  %v3127_v15 = vmul.f32 %v6479_v29, %v6479_v29 }
 0x4ae   : > { %3108 = vadd.xlane.f32.xlu0 %v3107_v2  ;;  %v4315_v20 = vpop.f32.mrf.mxu1 }
 0x4af   : > { %v6490_v49 = vadd.f32 %v4315_v20, %v6374_v47  ;;  %v3101_v22 = vsel %vm762_vm1, %v6482_v21, 0.0  ;;  %v3125_v19 = vmul.f32 %v6482_v21, %v6482_v21  ;;  %v3171_v6 = vsel %vm762_vm1, %v3127_v15, 0.0 }
 0x4b0   : > { %v3051_v50 = vpop.f32.mrf.mxu1 }
 0x4b1   : > { %v6493_v59 = vadd.f32 %v6374_v47, %v3051_v50  ;;  %v3110_v10 = vsel %vm762_vm1, %v6490_v49, 0.0  ;;  %v3165_v32 = vsel %vm762_vm1, %v3125_v19, 0.0  ;;  %v3128_v17 = vmul.f32 %v6490_v49, %v6490_v49 }
 0x4b2   : > { %3111 = vadd.xlane.f32.xlu1 %v3110_v10  ;;  %3102 = vadd.xlane.f32.xlu0 %v3101_v22 }
 0x4b3   : > { %v3104_v47 = vsel %vm762_vm1, %v6493_v59, 0.0  ;;  %v3126_v37 = vmul.f32 %v6493_v59, %v6493_v59  ;;  %v3174_v24 = vsel %vm762_vm1, %v3128_v17, 0.0 }
 0x4b5   : > { %v3168_v16 = vsel %vm762_vm1, %v3126_v37, 0.0 }
 0x4b6   : > { %3105 = vadd.xlane.f32.xlu1 %v3104_v47  ;;  %3166 = vadd.xlane.f32.xlu0 %v3165_v32  ;;  %v6528_v32 = vld [vmem:[%s6827_s12] ss:$0 sm:$0xff] }
 0x4ba   : > { %3169 = vadd.xlane.f32.xlu1 %v3168_v16  ;;  %3172 = vadd.xlane.f32.xlu0 %v3171_v6 }
 0x4be   : > { %3175 = vadd.xlane.f32.xlu1 %v3174_v24 }
 0x4d8   : > { %v3073_v62 = vpop.xlane.xlu0 %3072 }
 0x4d9   : > { %v3179_v60 = vmul.f32 0.015625, %v3073_v62 }
 0x4db   : > { %v3211_v35 = vmul.f32 %v3179_v60, %v3179_v60  ;;  %v3259_v2 = vsub.f32 %v6377_v53, %v3179_v60 }
 0x4dc   : > { %v3076_v34 = vpop.xlane.xlu1 %3075  ;;  %v3067_v46 = vpop.xlane.xlu0 %3066 }
 0x4dd   : > { %v3180_v33 = vmul.f32 0.015625, %v3076_v34  ;;  %v3177_v41 = vmul.f32 0.015625, %v3067_v46 }
 0x4df   : > { %v3212_v8 = vmul.f32 %v3180_v33, %v3180_v33  ;;  %v3209_v40 = vmul.f32 %v3177_v41, %v3177_v41  ;;  %v3260_v10 = vsub.f32 %v6385_v4, %v3180_v33  ;;  %v3257_v19 = vsub.f32 %v6380_v14, %v3177_v41 }
 0x4e0   : > { %v3070_v63 = vpop.xlane.xlu1 %3069  ;;  %v3137_v55 = vpop.xlane.xlu0 %3136 }
 0x4e1   : > { %v3195_v13 = vmul.f32 0.015625, %v3137_v55  ;;  %v3178_v58 = vmul.f32 0.015625, %v3070_v63 }
 0x4e3   : > { %v3227_v36 = vsub.f32 %v3195_v13, %v3211_v35  ;;  %v3210_v1 = vmul.f32 %v3178_v58, %v3178_v58  ;;  %v3258_v16 = vsub.f32 %v6388_v39, %v3178_v58 }
 0x4e4   : > { %v3140_v57 = vpop.xlane.xlu1 %3139  ;;  %v3131_v31 = vpop.xlane.xlu0 %3130 }
 0x4e5   : > { %v3243_v44 = vmax.f32 %v3227_v36, 0.0  ;;  %v3196_v38 = vmul.f32 0.015625, %v3140_v57  ;;  %v3193_v27 = vmul.f32 0.015625, %v3131_v31 }
 0x4e7   : > { %v3275_v51 = vadd.f32 1e-05, %v3243_v44  ;;  %v3228_v61 = vsub.f32 %v3196_v38, %v3212_v8  ;;  %v3225_v30 = vsub.f32 %v3193_v27, %v3209_v40 }
 0x4e8   : > { %v3134_v23 = vpop.xlane.xlu1 %3133 }
 0x4e9   : > { %4634 = vrsqrt.f32 %v3275_v51  ;;  %v3244_v48 = vmax.f32 %v3228_v61, 0.0  ;;  %v3241_v52 = vmax.f32 %v3225_v30, 0.0  ;;  %v3194_v56 = vmul.f32 0.015625, %v3134_v23 }
 0x4eb   : > { %v3276_v54 = vadd.f32 1e-05, %v3244_v48  ;;  %v3273_v26 = vadd.f32 1e-05, %v3241_v52  ;;  %v3226_v42 = vsub.f32 %v3194_v56, %v3210_v1 }
 0x4ed   : > { %4636 = vrsqrt.f32 %v3276_v54  ;;  %v3242_v9 = vmax.f32 %v3226_v42, 0.0 }
 0x4ee   : > { %4638 = vrsqrt.f32 %v3273_v26 }
 0x4ef   : > { %v3274_v18 = vadd.f32 1e-05, %v3242_v9 }
 0x4f1   : > { %4640 = vrsqrt.f32 %v3274_v18 }
 0x4f6   : > { %v4635_v20 = vpop.eup %4634 }
 0x4f7   : > { %v3307_v50 = vmul.f32 %v4635_v20, %v3259_v2 }
 0x4f9   : > { %v3329_v11 = vmul.f32 %v6520_v3, %v3307_v50 }
 0x4fa   : > { %v4637_v22 = vpop.eup %4636 }
 0x4fb   : > { %v4639_v47 = vpop.eup %4638  ;;  %v3308_v53 = vmul.f32 %v4637_v22, %v3260_v10  ;;  %v3351_v4 = vadd.f32 %v6528_v32, %v3329_v11 }
 0x4fc   : > { %v3085_v37 = vpop.xlane.xlu0 %3084  ;;  %v3305_v15 = vmul.f32 %v4639_v47, %v3257_v19 }
 0x4fd   : > { %v3330_v6 = vmul.f32 %v6520_v3, %v3308_v53  ;;  %v3183_v60 = vmul.f32 0.015625, %v3085_v37  ;;  %vm3367_vm9 = vcmp.gt.f32.partialorder %v3351_v4, 0.0  ;;  %v3383_v39 = vmul.f32 0.02, %v3351_v4 }
 0x4fe   : > { %v4641_v17 = vpop.eup %4640  ;;  %v3327_v14 = vmul.f32 %v6520_v3, %v3305_v15 }
 0x4ff   : > { %v3352_v24 = vadd.f32 %v6528_v32, %v3330_v6  ;;  %v3306_v46 = vmul.f32 %v4641_v17, %v3258_v16  ;;  %v3215_v57 = vmul.f32 %v3183_v60, %v3183_v60  ;;  %v3399_v27 = vsel %vm3367_vm9, %v3351_v4, %v3383_v39 }
 0x500   : > { %v3088_v62 = vpop.xlane.xlu1 %3087  ;;  %v3079_v34 = vpop.xlane.xlu0 %3078  ;;  %v3349_v33 = vadd.f32 %v6528_v32, %v3327_v14  ;;  %v3263_v4 = vsub.f32 %v6409_v43, %v3183_v60 }
 0x501   : > { %v3328_v63 = vmul.f32 %v6520_v3, %v3306_v46  ;;  %v6537_v55 = vmul.f32 0.015625, %v3088_v62  ;;  %v3384_v35 = vmul.f32 0.02, %v3352_v24  ;;  %v6539_v41 = vmul.f32 0.015625, %v3079_v34 }
 0x502   : > { %v3381_v58 = vmul.f32 0.02, %v3349_v33  ;;  %vm3368_vm10 = vcmp.gt.f32.partialorder %v3352_v24, 0.0  ;;  %vm3365_vm11 = vcmp.gt.f32.partialorder %v3349_v33, 0.0 }
 0x503   : > { %v3350_v8 = vadd.f32 %v6528_v32, %v3328_v63  ;;  %v3216_v44 = vmul.f32 %v6537_v55, %v6537_v55  ;;  %v3400_v51 = vsel %vm3368_vm10, %v3352_v24, %v3384_v35  ;;  %v3213_v61 = vmul.f32 %v6539_v41, %v6539_v41 }
 0x504   : > { %v3082_v13 = vpop.xlane.xlu1 %3081  ;;  %v3149_v36 = vpop.xlane.xlu0 %3148  ;;  %v3397_v48 = vsel %vm3365_vm11, %v3349_v33, %v3381_v58  ;;  %v3414_v9 = vpack.c.bf16 %v3400_v51, %v3399_v27  ;;  %v3264_v46 = vsub.f32 %v6417_v45, %v6537_v55  ;;  %v3261_v63 = vsub.f32 %v6412_v28, %v6539_v41 }
 0x505   : > { %v3199_v31 = vmul.f32 0.015625, %v3149_v36  ;;  %vm3366_vm12 = vcmp.gt.f32.partialorder %v3350_v8, 0.0  ;;  %v3382_v40 = vmul.f32 0.02, %v3350_v8  ;;  %v6547_v30 = vmul.f32 0.015625, %v3082_v13 }
 0x507   : > { %v3231_v38 = vsub.f32 %v3199_v31, %v3215_v57  ;;  %v3398_v52 = vsel %vm3366_vm12, %v3350_v8, %v3382_v40  ;;  %v3214_v50 = vmul.f32 %v6547_v30, %v6547_v30  ;;  %v3262_v45 = vsub.f32 %v6420_v5, %v6547_v30 }
 0x508   : > { %v3152_v1 = vpop.xlane.xlu1 %3151  ;;  %v3143_v23 = vpop.xlane.xlu0 %3142  ;;  %v3413_v42 = vpack.c.bf16 %v3398_v52, %v3397_v48 }
 0x509   : > { %v3247_v56 = vmax.f32 %v3231_v38, 0.0  ;;  %v3200_v54 = vmul.f32 0.015625, %v3152_v1  ;;  %v3197_v26 = vmul.f32 0.015625, %v3143_v23 }
 0x50a   : > { %4324 = vmatprep.mubr.msk.bf16.mxu1 %vm762_vm1, %v3413_v42 }
 0x50b   : > { %v3279_v18 = vadd.f32 1e-05, %v3247_v56  ;;  %v3232_v2 = vsub.f32 %v3200_v54, %v3216_v44  ;;  %v3229_v20 = vsub.f32 %v3197_v26, %v3213_v61  ;;  %4325 = vmatmul.mubr.msk.bf16.vlgmr.msra.gmra.mxu1 %vm762_vm1, %v3414_v9 }
 0x50c   : > { %v3146_v10 = vpop.xlane.xlu1 %3145 }
 0x50d   : > { %4642 = vrsqrt.f32 %v3279_v18  ;;  %v3248_v22 = vmax.f32 %v3232_v2, 0.0  ;;  %v3245_v19 = vmax.f32 %v3229_v20, 0.0  ;;  %v3198_v11 = vmul.f32 0.015625, %v3146_v10 }
 0x50f   : > { %v3280_v47 = vadd.f32 1e-05, %v3248_v22  ;;  %v3277_v53 = vadd.f32 1e-05, %v3245_v19  ;;  %v3230_v37 = vsub.f32 %v3198_v11, %v3214_v50 }
 0x511   : > { %4644 = vrsqrt.f32 %v3280_v47  ;;  %v3246_v15 = vmax.f32 %v3230_v37, 0.0 }
 0x512   : > { %4646 = vrsqrt.f32 %v3277_v53 }
 0x513   : > { %v3278_v16 = vadd.f32 1e-05, %v3246_v15 }
 0x515   : > { %4648 = vrsqrt.f32 %v3278_v16 }
 0x51a   : > { %v3097_v6 = vpop.xlane.xlu0 %3096  ;;  %v4643_v17 = vpop.eup %4642 }
 0x51b   : > { %v6554_v62 = vmul.f32 0.015625, %v3097_v6  ;;  %v3311_v34 = vmul.f32 %v4643_v17, %v3263_v4 }
 0x51d   : > { %v3219_v43 = vmul.f32 %v6554_v62, %v6554_v62  ;;  %v3333_v31 = vmul.f32 %v6520_v3, %v3311_v34 }
 0x51e   : > { %v3100_v14 = vpop.xlane.xlu1 %3099  ;;  %v3091_v24 = vpop.xlane.xlu0 %3090 }
 0x51f   : > { %v4645_v33 = vpop.eup %4644  ;;  %v6560_v39 = vmul.f32 0.015625, %v3100_v14  ;;  %v6562_v35 = vmul.f32 0.015625, %v3091_v24  ;;  %v3355_v52 = vadd.f32 %v6528_v32, %v3333_v31 }
 0x520   : > { %v4647_v8 = vpop.eup %4646  ;;  %v3312_v58 = vmul.f32 %v4645_v33, %v3264_v46 }
 0x521   : > { %v3309_v57 = vmul.f32 %v4647_v8, %v3261_v63  ;;  %v3220_v40 = vmul.f32 %v6560_v39, %v6560_v39  ;;  %v3217_v44 = vmul.f32 %v6562_v35, %v6562_v35  ;;  %v3387_v47 = vmul.f32 0.02, %v3355_v52 }
 0x522   : > { %v3094_v13 = vpop.xlane.xlu1 %3093  ;;  %v3161_v36 = vpop.xlane.xlu0 %3160  ;;  %v3334_v28 = vmul.f32 %v6520_v3, %v3312_v58  ;;  %vm3371_vm0 = vcmp.gt.f32.partialorder %v3355_v52, 0.0 }
 0x523   : > { %v3203_v60 = vmul.f32 0.015625, %v3161_v36  ;;  %v4649_v41 = vpop.eup %4648  ;;  %v6574_v38 = vmul.f32 0.015625, %v3094_v13  ;;  %v3331_v61 = vmul.f32 %v6520_v3, %v3309_v57  ;;  %v3403_v46 = vsel %vm3371_vm0, %v3355_v52, %v3387_v47 }
 0x524   : > { %v3310_v5 = vmul.f32 %v4649_v41, %v3262_v45  ;;  %v3356_v56 = vadd.f32 %v6528_v32, %v3334_v28  ;;  %v3267_v36 = vsub.f32 %v6441_v12, %v6554_v62  ;;  %v3268_v57 = vsub.f32 %v6449_v25, %v6560_v39 }
 0x525   : > { %v3235_v55 = vsub.f32 %v3203_v60, %v3219_v43  ;;  %v3353_v30 = vadd.f32 %v6528_v32, %v3331_v61  ;;  %v3218_v18 = vmul.f32 %v6574_v38, %v6574_v38  ;;  %v3265_v45 = vsub.f32 %v6444_v7, %v6562_v35 }
 0x526   : > { %v3164_v27 = vpop.xlane.xlu1 %3163  ;;  %v3155_v51 = vpop.xlane.xlu0 %3154  ;;  %v3332_v9 = vmul.f32 %v6520_v3, %v3310_v5  ;;  %v3388_v20 = vmul.f32 0.02, %v3356_v56  ;;  %vm3372_vm13 = vcmp.gt.f32.partialorder %v3356_v56, 0.0  ;;  %v3266_v25 = vsub.f32 %v6452_v0, %v6574_v38 }
 0x527   : > { %v3251_v1 = vmax.f32 %v3235_v55, 0.0  ;;  %v3204_v23 = vmul.f32 0.015625, %v3164_v27  ;;  %v3201_v48 = vmul.f32 0.015625, %v3155_v51  ;;  %v3385_v11 = vmul.f32 0.02, %v3353_v30 }
 0x528   : > { %v3354_v19 = vadd.f32 %v6528_v32, %v3332_v9  ;;  %vm3369_vm14 = vcmp.gt.f32.partialorder %v3353_v30, 0.0  ;;  %v3404_v17 = vsel %vm3372_vm13, %v3356_v56, %v3388_v20 }
 0x529   : > { %v3283_v54 = vadd.f32 1e-05, %v3251_v1  ;;  %v3236_v26 = vsub.f32 %v3204_v23, %v3220_v40  ;;  %v3233_v42 = vsub.f32 %v3201_v48, %v3217_v44  ;;  %v3401_v4 = vsel %vm3369_vm14, %v3353_v30, %v3385_v11 }
 0x52a   : > { %v3158_v2 = vpop.xlane.xlu1 %3157  ;;  %vm3370_vm15 = vcmp.gt.f32.partialorder %v3354_v19, 0.0  ;;  %v3386_v16 = vmul.f32 0.02, %v3354_v19  ;;  %v3416_v33 = vpack.c.bf16 %v3404_v17, %v3403_v46 }
 0x52b   : > { %4650 = vrsqrt.f32 %v3283_v54  ;;  %v3252_v50 = vmax.f32 %v3236_v26, 0.0  ;;  %v3249_v10 = vmax.f32 %v3233_v42, 0.0  ;;  %v3202_v22 = vmul.f32 0.015625, %v3158_v2 }
 0x52c   : > { %v3402_v14 = vsel %vm3370_vm15, %v3354_v19, %v3386_v16 }
 0x52d   : > { %v3284_v53 = vadd.f32 1e-05, %v3252_v50  ;;  %v3281_v37 = vadd.f32 1e-05, %v3249_v10  ;;  %v3234_v15 = vsub.f32 %v3202_v22, %v3218_v18  ;;  %v3415_v34 = vpack.c.bf16 %v3402_v14, %v3401_v4 }
 0x52f   : > { %4652 = vrsqrt.f32 %v3284_v53  ;;  %v3250_v6 = vmax.f32 %v3234_v15, 0.0  ;;  %4328 = vmatprep.mubr.msk.bf16.mxu1 %vm762_vm1, %v3415_v34 }
 0x530   : > { %4654 = vrsqrt.f32 %v3281_v37  ;;  %4329 = vmatmul.mubr.msk.bf16.gmra.mxu1 %vm762_vm1, %v3416_v33 }
 0x531   : > { %v3282_v24 = vadd.f32 1e-05, %v3250_v6 }
 0x533   : > { %4656 = vrsqrt.f32 %v3282_v24 }
 0x537   : > { %v3109_v63 = vpop.xlane.xlu0 %3108 }
 0x538   : > { %v4651_v13 = vpop.eup %4650  ;;  %v6594_v55 = vmul.f32 0.015625, %v3109_v63 }
 0x539   : > { %v3315_v58 = vmul.f32 %v4651_v13, %v3267_v36 }
 0x53a   : > { %v3223_v1 = vmul.f32 %v6594_v55, %v6594_v55 }
 0x53b   : > { %v3112_v8 = vpop.xlane.xlu1 %3111  ;;  %v3103_v43 = vpop.xlane.xlu0 %3102  ;;  %v3337_v61 = vmul.f32 %v6520_v3, %v3315_v58 }
 0x53c   : > { %v6588_v60 = vmul.f32 0.015625, %v3103_v43  ;;  %v4653_v31 = vpop.eup %4652  ;;  %v6606_v23 = vmul.f32 0.015625, %v3112_v8 }
 0x53d   : > { %v4655_v40 = vpop.eup %4654  ;;  %v3316_v27 = vmul.f32 %v4653_v31, %v3268_v57  ;;  %v3359_v42 = vadd.f32 %v6528_v32, %v3337_v61 }
 0x53e   : > { %v3221_v12 = vmul.f32 %v6588_v60, %v6588_v60  ;;  %v3313_v51 = vmul.f32 %v4655_v40, %v3265_v45  ;;  %v3224_v10 = vmul.f32 %v6606_v23, %v6606_v23  ;;  %v3269_v43 = vsub.f32 %v6482_v21, %v6588_v60 }
 0x53f   : > { %v3106_v28 = vpop.xlane.xlu1 %3105  ;;  %v3167_v41 = vpop.xlane.xlu0 %3166  ;;  %v3338_v7 = vmul.f32 %v6520_v3, %v3316_v27  ;;  %v3391_v16 = vmul.f32 0.02, %v3359_v42  ;;  %vm3375_vm5 = vcmp.gt.f32.partialorder %v3359_v42, 0.0 }
 0x540   : > { %v6598_v62 = vmul.f32 0.015625, %v3106_v28  ;;  %v3205_v44 = vmul.f32 0.015625, %v3167_v41  ;;  %v4657_v35 = vpop.eup %4656  ;;  %v3335_v52 = vmul.f32 %v6520_v3, %v3313_v51  ;;  %v3271_v41 = vsub.f32 %v6479_v29, %v6594_v55 }
 0x541   : > { %v3314_v0 = vmul.f32 %v4657_v35, %v3266_v25  ;;  %v3360_v9 = vadd.f32 %v6528_v32, %v3338_v7  ;;  %v3407_v36 = vsel %vm3375_vm5, %v3359_v42, %v3391_v16  ;;  %v3272_v51 = vsub.f32 %v6490_v49, %v6606_v23 }
 0x542   : > { %v3237_v39 = vsub.f32 %v3205_v44, %v3221_v12  ;;  %v3222_v48 = vmul.f32 %v6598_v62, %v6598_v62  ;;  %v3357_v38 = vadd.f32 %v6528_v32, %v3335_v52  ;;  %v3270_v31 = vsub.f32 %v6493_v59, %v6598_v62 }
 0x543   : > { %v3170_v5 = vpop.xlane.xlu1 %3169  ;;  %v3173_v30 = vpop.xlane.xlu0 %3172  ;;  %v3336_v50 = vmul.f32 %v6520_v3, %v3314_v0  ;;  %v3392_v19 = vmul.f32 0.02, %v3360_v9  ;;  %vm3376_vm2 = vcmp.gt.f32.partialorder %v3360_v9, 0.0 }
 0x544   : > { %v3253_v56 = vmax.f32 %v3237_v39, 0.0  ;;  %v3206_v54 = vmul.f32 0.015625, %v3170_v5  ;;  %v3207_v26 = vmul.f32 0.015625, %v3173_v30  ;;  %v3389_v15 = vmul.f32 0.02, %v3357_v38 }
 0x545   : > { %v3358_v37 = vadd.f32 %v6528_v32, %v3336_v50  ;;  %vm3373_vm3 = vcmp.gt.f32.partialorder %v3357_v38, 0.0  ;;  %v3408_v34 = vsel %vm3376_vm2, %v3360_v9, %v3392_v19 }
 0x546   : > { %v3285_v18 = vadd.f32 1e-05, %v3253_v56  ;;  %v3238_v2 = vsub.f32 %v3206_v54, %v3222_v48  ;;  %v3239_v20 = vsub.f32 %v3207_v26, %v3223_v1  ;;  %v3405_v46 = vsel %vm3373_vm3, %v3357_v38, %v3389_v15  ;;  %v6648_v38 = vld [vmem:[%s6830_s15] ss:$0 sm:$0xff] }
 0x547   : > { %v3176_v22 = vpop.xlane.xlu1 %3175  ;;  %vm3374_vm4 = vcmp.gt.f32.partialorder %v3358_v37, 0.0  ;;  %v3390_v14 = vmul.f32 0.02, %v3358_v37  ;;  %v3418_v8 = vpack.c.bf16 %v3408_v34, %v3407_v36 }
 0x548   : > { %4658 = vrsqrt.f32 %v3285_v18  ;;  %v3254_v11 = vmax.f32 %v3238_v2, 0.0  ;;  %v3255_v47 = vmax.f32 %v3239_v20, 0.0  ;;  %v3208_v53 = vmul.f32 0.015625, %v3176_v22 }
 0x549   : > { %v3406_v33 = vsel %vm3374_vm4, %v3358_v37, %v3390_v14 }
 0x54a   : > { %v3286_v6 = vadd.f32 1e-05, %v3254_v11  ;;  %v3287_v17 = vadd.f32 1e-05, %v3255_v47  ;;  %v3240_v4 = vsub.f32 %v3208_v53, %v3224_v10  ;;  %v3417_v13 = vpack.c.bf16 %v3406_v33, %v3405_v46 }
 0x54c   : > { %4660 = vrsqrt.f32 %v3286_v6  ;;  %v3256_v24 = vmax.f32 %v3240_v4, 0.0  ;;  %4332 = vmatprep.mubr.msk.bf16.mxu1 %vm762_vm1, %v3417_v13 }
 0x54d   : > { %4662 = vrsqrt.f32 %v3287_v17  ;;  %4333 = vmatmul.mubr.msk.bf16.gmra.mxu1 %vm762_vm1, %v3418_v8 }
 0x54e   : > { %v3288_v63 = vadd.f32 1e-05, %v3256_v24 }
 0x550   : > { %4664 = vrsqrt.f32 %v3288_v63 }
 0x555   : > { %v4659_v58 = vpop.eup %4658 }
 0x556   : > { %v3317_v57 = vmul.f32 %v4659_v58, %v3269_v43 }
 0x558   : > { %v3339_v45 = vmul.f32 %v6520_v3, %v3317_v57 }
 0x559   : > { %v4661_v28 = vpop.eup %4660 }
 0x55a   : > { %v4663_v40 = vpop.eup %4662  ;;  %v3318_v12 = vmul.f32 %v4661_v28, %v3270_v31  ;;  %v3361_v44 = vadd.f32 %v6528_v32, %v3339_v45 }
 0x55b   : > { %v3319_v27 = vmul.f32 %v4663_v40, %v3271_v41 }
 0x55c   : > { %v3340_v21 = vmul.f32 %v6520_v3, %v3318_v12  ;;  %v3393_v62 = vmul.f32 0.02, %v3361_v44  ;;  %vm3377_vm6 = vcmp.gt.f32.partialorder %v3361_v44, 0.0 }
 0x55d   : > { %v4665_v60 = vpop.eup %4664  ;;  %v3341_v61 = vmul.f32 %v6520_v3, %v3319_v27 }
 0x55e   : > { %v3362_v59 = vadd.f32 %v6528_v32, %v3340_v21  ;;  %v3320_v25 = vmul.f32 %v4665_v60, %v3272_v51  ;;  %v3409_v7 = vsel %vm3377_vm6, %v3361_v44, %v3393_v62 }
 0x55f   : > { %v3363_v29 = vadd.f32 %v6528_v32, %v3341_v61 }
 0x560   : > { %vm3378_vm7 = vcmp.gt.f32.partialorder %v3362_v59, 0.0  ;;  %v3394_v55 = vmul.f32 0.02, %v3362_v59  ;;  %v3342_v39 = vmul.f32 %v6520_v3, %v3320_v25  ;;  %v6641_v3 = vld [vmem:[%s6829_s14] ss:$0 sm:$0xff] }
 0x561   : > { %v3395_v1 = vmul.f32 0.02, %v3363_v29  ;;  %vm3379_vm8 = vcmp.gt.f32.partialorder %v3363_v29, 0.0 }
 0x562   : > { %v3410_v35 = vsel %vm3378_vm7, %v3362_v59, %v3394_v55  ;;  %v3364_v49 = vadd.f32 %v6528_v32, %v3342_v39 }
 0x563   : > { %v3419_v23 = vpack.c.bf16 %v3410_v35, %v3409_v7  ;;  %v3411_v5 = vsel %vm3379_vm8, %v3363_v29, %v3395_v1 }
 0x564   : > { %vm3380_vm9 = vcmp.gt.f32.partialorder %v3364_v49, 0.0  ;;  %v3396_v48 = vmul.f32 0.02, %v3364_v49 }
 0x565   : > { %4336 = vmatprep.mubr.msk.bf16.mxu1 %vm762_vm1, %v3419_v23 }
 0x566   : > { %v3412_v30 = vsel %vm3380_vm9, %v3364_v49, %v3396_v48 }
 0x567   : > { %v3420_v52 = vpack.c.bf16 %v3412_v30, %v3411_v5 }
 0x569   : > { %4337 = vmatmul.mubr.msk.bf16.gmra.mxu1 %vm762_vm1, %v3420_v52 }
 0x5cb   : > { %v4326_v56 = vpop.f32.mrf.mxu1 }
 0x5cc   : > { %v3527_v32 = vadd.f32 %v4326_v56, %v6641_v3 }
 0x5cd   : > { %v3518_v54 = vpop.f32.mrf.mxu1 }
 0x5ce   : > { %v3599_v26 = vmul.f32 0.02, %v3527_v32  ;;  %v3519_v0 = vadd.f32 %v6641_v3, %v3518_v54  ;;  %vm3583_vm10 = vcmp.gt.f32.partialorder %v3527_v32, 0.0 }
 0x5cf   : > { %v4327_v42 = vpop.f32.mrf.mxu1 }
 0x5d0   : > { %v3597_v9 = vmul.f32 0.02, %v3519_v0  ;;  %v3530_v18 = vadd.f32 %v4327_v42, %v6641_v3  ;;  %v3615_v2 = vsel %vm3583_vm10, %v3527_v32, %v3599_v26  ;;  %vm3581_vm1 = vcmp.gt.f32.partialorder %v3519_v0, 0.0 }
 0x5d1   : > { %v3521_v20 = vpop.f32.mrf.mxu1  ;;  %v3638_v50 = vmul.f32 %v6648_v38, %v3615_v2  ;;  %vm3707_vm10 = vcmask 7168  }
 0x5d2   : > { %v3600_v10 = vmul.f32 0.02, %v3530_v18  ;;  %v3522_v22 = vadd.f32 %v6641_v3, %v3521_v20  ;;  %vm3584_vm11 = vcmp.gt.f32.partialorder %v3530_v18, 0.0  ;;  %v3613_v19 = vsel %vm3581_vm1, %v3519_v0, %v3597_v9 }
 0x5d3   : > { %3656 = vadd.xlane.f32.xlu0 %v3638_v50  ;;  %v3636_v37 = vmul.f32 %v6648_v38, %v3613_v19 }
 0x5d4   : > { %v3598_v11 = vmul.f32 0.02, %v3522_v22  ;;  %v3616_v47 = vsel %vm3584_vm11, %v3530_v18, %v3600_v10  ;;  %vm3582_vm12 = vcmp.gt.f32.partialorder %v3522_v22, 0.0 }
 0x5d5   : > { %v3639_v53 = vmul.f32 %v6648_v38, %v3616_v47 }
 0x5d6   : > { %v3614_v15 = vsel %vm3582_vm12, %v3522_v22, %v3598_v11 }
 0x5d7   : > { %3658 = vadd.xlane.f32.xlu1 %v3639_v53  ;;  %3652 = vadd.xlane.f32.xlu0 %v3636_v37  ;;  %v3637_v16 = vmul.f32 %v6648_v38, %v3614_v15  ;;  %v4171_v37 = vld [vmem:[#allocation2] ss:$0 sm:$0xff] }
 0x5db   : > { %3654 = vadd.xlane.f32.xlu1 %v3637_v16 }
 0x5f0   : > { %v4330_v6 = vpop.f32.mrf.mxu1 }
 0x5f1   : > { %v3543_v17 = vadd.f32 %v4330_v6, %v6641_v3 }
 0x5f2   : > { %v3534_v4 = vpop.f32.mrf.mxu1 }
 0x5f3   : > { %v3603_v14 = vmul.f32 0.02, %v3543_v17  ;;  %v3535_v24 = vadd.f32 %v6641_v3, %v3534_v4  ;;  %vm3587_vm13 = vcmp.gt.f32.partialorder %v3543_v17, 0.0 }
 0x5f4   : > { %v4331_v34 = vpop.f32.mrf.mxu1 }
 0x5f5   : > { %v3601_v46 = vmul.f32 0.02, %v3535_v24  ;;  %v3546_v33 = vadd.f32 %v4331_v34, %v6641_v3  ;;  %v3619_v63 = vsel %vm3587_vm13, %v3543_v17, %v3603_v14  ;;  %vm3585_vm14 = vcmp.gt.f32.partialorder %v3535_v24, 0.0 }
 0x5f6   : > { %v3537_v13 = vpop.f32.mrf.mxu1  ;;  %v3642_v36 = vmul.f32 %v6648_v38, %v3619_v63 }
 0x5f7   : > { %v3604_v8 = vmul.f32 0.02, %v3546_v33  ;;  %v3538_v43 = vadd.f32 %v6641_v3, %v3537_v13  ;;  %vm3588_vm15 = vcmp.gt.f32.partialorder %v3546_v33, 0.0  ;;  %v3617_v58 = vsel %vm3585_vm14, %v3535_v24, %v3601_v46 }
 0x5f8   : > { %3664 = vadd.xlane.f32.xlu0 %v3642_v36  ;;  %v3640_v28 = vmul.f32 %v6648_v38, %v3617_v58 }
 0x5f9   : > { %v3602_v57 = vmul.f32 0.02, %v3538_v43  ;;  %v3620_v31 = vsel %vm3588_vm15, %v3546_v33, %v3604_v8  ;;  %vm3586_vm0 = vcmp.gt.f32.partialorder %v3538_v43, 0.0 }
 0x5fa   : > { %v3643_v45 = vmul.f32 %v6648_v38, %v3620_v31 }
 0x5fb   : > { %v3618_v41 = vsel %vm3586_vm0, %v3538_v43, %v3602_v57 }
 0x5fc   : > { %3666 = vadd.xlane.f32.xlu1 %v3643_v45  ;;  %3660 = vadd.xlane.f32.xlu0 %v3640_v28  ;;  %v3641_v40 = vmul.f32 %v6648_v38, %v3618_v41 }
 0x600   : > { %3662 = vadd.xlane.f32.xlu1 %v3641_v40 }
 0x60d   : > { %v4334_v12 = vpop.f32.mrf.mxu1 }
 0x60e   : > { %v3559_v44 = vadd.f32 %v4334_v12, %v6641_v3 }
 0x60f   : > { %v3550_v27 = vpop.f32.mrf.mxu1 }
 0x610   : > { %v3607_v51 = vmul.f32 0.02, %v3559_v44  ;;  %v3551_v21 = vadd.f32 %v6641_v3, %v3550_v27  ;;  %vm3591_vm2 = vcmp.gt.f32.partialorder %v3559_v44, 0.0 }
 0x611   : > { %v4335_v60 = vpop.f32.mrf.mxu1 }
 0x612   : > { %v3605_v61 = vmul.f32 0.02, %v3551_v21  ;;  %v3562_v59 = vadd.f32 %v4335_v60, %v6641_v3  ;;  %v3623_v62 = vsel %vm3591_vm2, %v3559_v44, %v3607_v51  ;;  %vm3589_vm3 = vcmp.gt.f32.partialorder %v3551_v21, 0.0 }
 0x613   : > { %v3553_v25 = vpop.f32.mrf.mxu1  ;;  %v3646_v29 = vmul.f32 %v6648_v38, %v3623_v62 }
 0x614   : > { %v3608_v55 = vmul.f32 0.02, %v3562_v59  ;;  %v3554_v39 = vadd.f32 %v6641_v3, %v3553_v25  ;;  %vm3592_vm4 = vcmp.gt.f32.partialorder %v3562_v59, 0.0  ;;  %v3621_v7 = vsel %vm3589_vm3, %v3551_v21, %v3605_v61 }
 0x615   : > { %3672 = vadd.xlane.f32.xlu0 %v3646_v29  ;;  %v3644_v23 = vmul.f32 %v6648_v38, %v3621_v7 }
 0x616   : > { %v3606_v35 = vmul.f32 0.02, %v3554_v39  ;;  %v3624_v49 = vsel %vm3592_vm4, %v3562_v59, %v3608_v55  ;;  %vm3590_vm5 = vcmp.gt.f32.partialorder %v3554_v39, 0.0 }
 0x617   : > { %v3647_v1 = vmul.f32 %v6648_v38, %v3624_v49 }
 0x618   : > { %v3622_v48 = vsel %vm3590_vm5, %v3554_v39, %v3606_v35 }
 0x619   : > { %3674 = vadd.xlane.f32.xlu1 %v3647_v1  ;;  %3668 = vadd.xlane.f32.xlu0 %v3644_v23  ;;  %v3645_v5 = vmul.f32 %v6648_v38, %v3622_v48 }
 0x61d   : > { %3670 = vadd.xlane.f32.xlu1 %v3645_v5 }
 0x629   : > { %v4338_v30 = vpop.f32.mrf.mxu1 }
 0x62a   : > { %v3575_v52 = vadd.f32 %v4338_v30, %v6641_v3 }
 0x62b   : > { %v3566_v56 = vpop.f32.mrf.mxu1 }
 0x62c   : > { %v3567_v32 = vadd.f32 %v6641_v3, %v3566_v56  ;;  %v3611_v26 = vmul.f32 0.02, %v3575_v52  ;;  %vm3595_vm7 = vcmp.gt.f32.partialorder %v3575_v52, 0.0 }
 0x62d   : > { %v4339_v54 = vpop.f32.mrf.mxu1 }
 0x62e   : > { %v3609_v0 = vmul.f32 0.02, %v3567_v32  ;;  %v3578_v42 = vadd.f32 %v4339_v54, %v6641_v3  ;;  %vm3593_vm6 = vcmp.gt.f32.partialorder %v3567_v32, 0.0  ;;  %v3627_v22 = vsel %vm3595_vm7, %v3575_v52, %v3611_v26 }
 0x62f   : > { %v3569_v9 = vpop.f32.mrf.mxu1  ;;  %v3650_v47 = vmul.f32 %v6648_v38, %v3627_v22 }
 0x630   : > { %v3570_v18 = vadd.f32 %v6641_v3, %v3569_v9  ;;  %v3625_v2 = vsel %vm3593_vm6, %v3567_v32, %v3609_v0  ;;  %v3612_v50 = vmul.f32 0.02, %v3578_v42  ;;  %vm3596_vm9 = vcmp.gt.f32.partialorder %v3578_v42, 0.0 }
 0x631   : > { %v3648_v20 = vmul.f32 %v6648_v38, %v3625_v2 }
 0x632   : > { %v3610_v10 = vmul.f32 0.02, %v3570_v18  ;;  %vm3594_vm8 = vcmp.gt.f32.partialorder %v3570_v18, 0.0  ;;  %v3628_v53 = vsel %vm3596_vm9, %v3578_v42, %v3612_v50 }
 0x633   : > { %3676 = vadd.xlane.f32.xlu0 %v3648_v20  ;;  %v3651_v3 = vmul.f32 %v6648_v38, %v3628_v53 }
 0x634   : > { %v3626_v19 = vsel %vm3594_vm8, %v3570_v18, %v3610_v10 }
 0x635   : > { %v3649_v11 = vmul.f32 %v6648_v38, %v3626_v19 }
 0x637   : > { %3678 = vadd.xlane.f32.xlu1 %v3649_v11  ;;  %3680 = vadd.xlane.f32.xlu0 %v3650_v47 }
 0x63b   : > { %3682 = vadd.xlane.f32.xlu1 %v3651_v3 }
 0x65c   : > { %v3657_v15 = vpop.xlane.xlu0 %3656 }
 0x65d   : > { %v3693_v16 = vadd.f32 %v4171_v37, %v3657_v15 }
 0x65f   : > { %3710 = vst.msk [vmem:[%s6681_s23 + $0x10] sm:$0xff] %vm3707_vm10, %v3693_v16 }
 0x660   : > { %v3659_v6 = vpop.xlane.xlu1 %3658  ;;  %v3653_v17 = vpop.xlane.xlu0 %3652 }
 0x661   : > { %v3694_v38 = vadd.f32 %v4171_v37, %v3659_v6  ;;  %v3691_v4 = vadd.f32 %v4171_v37, %v3653_v17 }
 0x663   : > { %3711 = vst.msk [vmem:[%s6681_s23 + $0x18] sm:$0xff] %vm3707_vm10, %v3694_v38  ;;  %3708 = vst.msk [vmem:[%s6681_s23] sm:$0xff] %vm3707_vm10, %v3691_v4 }
 0x664   : > { %v3655_v14 = vpop.xlane.xlu1 %3654 }
 0x665   : > { %v3692_v24 = vadd.f32 %v4171_v37, %v3655_v14 }
 0x667   : > { %3709 = vst.msk [vmem:[%s6681_s23 + $0x8] sm:$0xff] %vm3707_vm10, %v3692_v24 }
 0x681   : > { %v3665_v34 = vpop.xlane.xlu0 %3664 }
 0x682   : > { %v3697_v46 = vadd.f32 %v4171_v37, %v3665_v34 }
 0x684   : > { %3714 = vst.msk [vmem:[%s6681_s23 + $0x30] sm:$0xff] %vm3707_vm10, %v3697_v46 }
 0x685   : > { %v3667_v33 = vpop.xlane.xlu1 %3666  ;;  %v3661_v63 = vpop.xlane.xlu0 %3660 }
 0x686   : > { %v3698_v13 = vadd.f32 %v4171_v37, %v3667_v33  ;;  %v3695_v36 = vadd.f32 %v4171_v37, %v3661_v63 }
 0x688   : > { %3715 = vst.msk [vmem:[%s6681_s23 + $0x38] sm:$0xff] %vm3707_vm10, %v3698_v13  ;;  %3712 = vst.msk [vmem:[%s6681_s23 + $0x20] sm:$0xff] %vm3707_vm10, %v3695_v36 }
 0x689   : > { %v3663_v8 = vpop.xlane.xlu1 %3662 }
 0x68a   : > { %v3696_v43 = vadd.f32 %v4171_v37, %v3663_v8 }
 0x68c   : > { %3713 = vst.msk [vmem:[%s6681_s23 + $0x28] sm:$0xff] %vm3707_vm10, %v3696_v43 }
 0x69e   : > { %v3673_v58 = vpop.xlane.xlu0 %3672 }
 0x69f   : > { %v3701_v57 = vadd.f32 %v4171_v37, %v3673_v58 }
 0x6a1   : > { %3718 = vst.msk [vmem:[%s6681_s23 + $0x50] sm:$0xff] %vm3707_vm10, %v3701_v57 }
 0x6a2   : > { %v3675_v31 = vpop.xlane.xlu1 %3674  ;;  %v3669_v45 = vpop.xlane.xlu0 %3668 }
 0x6a3   : > { %v3702_v28 = vadd.f32 %v4171_v37, %v3675_v31  ;;  %v3699_v41 = vadd.f32 %v4171_v37, %v3669_v45 }
 0x6a5   : > { %3719 = vst.msk [vmem:[%s6681_s23 + $0x58] sm:$0xff] %vm3707_vm10, %v3702_v28  ;;  %3716 = vst.msk [vmem:[%s6681_s23 + $0x40] sm:$0xff] %vm3707_vm10, %v3699_v41 }
 0x6a6   : > { %v3671_v40 = vpop.xlane.xlu1 %3670 }
 0x6a7   : > { %v3700_v12 = vadd.f32 %v4171_v37, %v3671_v40 }
 0x6a9   : > { %3717 = vst.msk [vmem:[%s6681_s23 + $0x48] sm:$0xff] %vm3707_vm10, %v3700_v12 }
 0x6bc   : > { %v3677_v44 = vpop.xlane.xlu0 %3676 }
 0x6bd   : > { %v3703_v27 = vadd.f32 %v4171_v37, %v3677_v44 }
 0x6bf   : > { %3720 = vst.msk [vmem:[%s6681_s23 + $0x60] sm:$0xff] %vm3707_vm10, %v3703_v27 }
 0x6c0   : > { %v3679_v51 = vpop.xlane.xlu1 %3678  ;;  %v3681_v21 = vpop.xlane.xlu0 %3680 }
 0x6c1   : > { %v3704_v60 = vadd.f32 %v4171_v37, %v3679_v51  ;;  %v3705_v61 = vadd.f32 %v4171_v37, %v3681_v21 }
 0x6c3   : > { %3721 = vst.msk [vmem:[%s6681_s23 + $0x68] sm:$0xff] %vm3707_vm10, %v3704_v60  ;;  %3722 = vst.msk [vmem:[%s6681_s23 + $0x70] sm:$0xff] %vm3707_vm10, %v3705_v61  ;;  %3730 = sbr.rel (!%p4939_p4) target bundleno = 1777 (0x6f1), region = 100 }
 0x6c4   : > { %v3683_v59 = vpop.xlane.xlu1 %3682 }
 0x6c5   : > { %v3706_v62 = vadd.f32 %v4171_v37, %v3683_v59 }
 0x6c7   : > { %3723 = vst.msk [vmem:[%s6681_s23 + $0x78] sm:$0xff] %vm3707_vm10, %v3706_v62 }
 0x6c8   : > { %s7106_s26 = smov (!%p3733_p9, %s3732_s26), 16 }
 0x6c9   : > { %s4174_s21 = sshll.u32 %s7106_s26, 7 }
 0x6ca   : > { %p4177_p3 = scmp.eq.s32.totalorder %s4174_s21, 0 }
 0x6cb   : > { %s6728_s22 = sshrl.u32 (!%p4177_p3), %s7106_s26, 4 }
 0x6cc   : > { %3741 = sbr.rel (%p4177_p3) target bundleno = 1777 (0x6f1), region = 104  ;;  %p4178_p4 = scmp.le.s32.totalorder (!%p4177_p3), %s6728_s22, 0 }
 0x6d1   : > { %3960 = sbr.rel (%p4178_p4) target bundleno = 1760 (0x6e0), region = 181  ;;  %s7099_s16 = smov (!%p4178_p4), %s6722_s1 }
 0x6d2   : > { %s7100_s19 = smov (!%p4178_p4), %s6681_s23  ;;  %s6737_s18 = smov (!%p4178_p4), 0  }
 0x6d3   : > { %s6739_s24 = smov (!%p4178_p4), 0  }
 0x6d6 LB: >> { %v3834_v25 = vld [vmem:[%s4788_s19] sm:$0xff]  ;;  %v3836_v29 = vld [vmem:[%s4788_s19 + $0x8] sm:$0xff]  ;;  %v3838_v55 = vld [vmem:[%s4788_s19 + $0x10] sm:$0xff]  ;;  %s3866_s28 = sadd.s32 1, %s4792_s18  ;;  %s3828_s24 = sadd.s32 1, %s4796_s24   ;;  %s4796_s24 = sphi %s6739_s24, %s3828_s24   ;;  %s4792_s18 = sphi %s6737_s18, %s7101_s18   ;;  %s4788_s19 = sphi %s7100_s19, %s3871_s19   ;;  %s4784_s16 = sphi %s7099_s16, %s3872_s16  }
 0x6d7   : >> { %3835 = vst [vmem:[%s4784_s16] sm:$0xff] %v3834_v25  ;;  %3837 = vst [vmem:[%s4784_s16 + $0x8] sm:$0xff] %v3836_v29  ;;  %v3840_v39 = vld [vmem:[%s4788_s19 + $0x18] sm:$0xff]  ;;  %v3842_v7 = vld [vmem:[%s4788_s19 + $0x20] sm:$0xff]  ;;  %p3867_p5 = scmp.ge.s32.totalorder %s3866_s28, %s6728_s22  ;;  %p3827_p8 = scmp.ge.s32.totalorder %s3828_s24, %s6728_s22 }
 0x6d8   : >> { %3839 = vst [vmem:[%s4784_s16 + $0x10] sm:$0xff] %v3838_v55  ;;  %v3844_v35 = vld [vmem:[%s4788_s19 + $0x28] sm:$0xff]  ;;  %3841 = vst [vmem:[%s4784_s16 + $0x18] sm:$0xff] %v3840_v39  ;;  %v3846_v49 = vld [vmem:[%s4788_s19 + $0x30] sm:$0xff] }
 0x6d9   : >> { %3843 = vst [vmem:[%s4784_s16 + $0x20] sm:$0xff] %v3842_v7  ;;  %3845 = vst [vmem:[%s4784_s16 + $0x28] sm:$0xff] %v3844_v35  ;;  %v3848_v1 = vld [vmem:[%s4788_s19 + $0x38] sm:$0xff]  ;;  %v3850_v23 = vld [vmem:[%s4788_s19 + $0x40] sm:$0xff]  ;;  %s7108_s28 = smov (%p3867_p5, %s3866_s28), 0 }
 0x6da   : >> { %3847 = vst [vmem:[%s4784_s16 + $0x30] sm:$0xff] %v3846_v49  ;;  %3849 = vst [vmem:[%s4784_s16 + $0x38] sm:$0xff] %v3848_v1  ;;  %v3852_v48 = vld [vmem:[%s4788_s19 + $0x48] sm:$0xff]  ;;  %v3854_v5 = vld [vmem:[%s4788_s19 + $0x50] sm:$0xff]  ;;  %s4179_s0 = sshll.u32 %s7108_s28, 7  ;;  %s7101_s18 = smov %s7108_s28 }
 0x6db   : >> { %3851 = vst [vmem:[%s4784_s16 + $0x40] sm:$0xff] %v3850_v23  ;;  %v3856_v30 = vld [vmem:[%s4788_s19 + $0x58] sm:$0xff]  ;;  %3853 = vst [vmem:[%s4784_s16 + $0x48] sm:$0xff] %v3852_v48  ;;  %v3858_v52 = vld [vmem:[%s4788_s19 + $0x60] sm:$0xff]  ;;  %3830 = sbr.rel (!%p3827_p8) target bundleno = 1750 (0x6d6), region = 187 }
 0x6dc   : >> { %3855 = vst [vmem:[%s4784_s16 + $0x50] sm:$0xff] %v3854_v5  ;;  %3857 = vst [vmem:[%s4784_s16 + $0x58] sm:$0xff] %v3856_v30  ;;  %v3860_v56 = vld [vmem:[%s4788_s19 + $0x68] sm:$0xff]  ;;  %v3862_v32 = vld [vmem:[%s4788_s19 + $0x70] sm:$0xff] }
 0x6dd   : >> { %3859 = vst [vmem:[%s4784_s16 + $0x60] sm:$0xff] %v3858_v52  ;;  %3861 = vst [vmem:[%s4784_s16 + $0x68] sm:$0xff] %v3860_v56  ;;  %v3864_v54 = vld [vmem:[%s4788_s19 + $0x78] sm:$0xff]  ;;  %s3871_s19 = scalar_lea.vmem %s6681_s23, %s4179_s0 [#allocation7]  }
 0x6de   : >> { %3863 = vst [vmem:[%s4784_s16 + $0x70] sm:$0xff] %v3862_v32  ;;  %3865 = vst [vmem:[%s4784_s16 + $0x78] sm:$0xff] %v3864_v54  ;;  %s3872_s16 = scalar_lea.vmem %s6722_s1, %s4179_s0  }
 0x6e0 PF: > { %s6797_s30 = sand.u32 15, %s7106_s26   ;;  %s4190_s20 = sshll.u32 %s6728_s22, 7 }
 0x6e1   : > { %s3877_s25 = scalar_lea.vmem %s6681_s23, %s4190_s20 [#allocation7]   ;;  %s3879_s17 = scalar_lea.vmem %s6722_s1, %s4190_s20  }
 0x6e2   : > { %p4184_p11 = scmp.le.s32.totalorder %s6797_s30, 0 }
 0x6e3   : > { %s4798_s27 = smov (!%p4184_p11), %s3879_s17   ;;  %s4802_s29 = smov (!%p4184_p11), %s3877_s25  }
 0x6e4   : > { %3974 = sbr.rel (%p4184_p11) target bundleno = 1777 (0x6f1), region = 192  ;;  %s4806_s21 = smov (!%p4184_p11), 0  }
 0x6e5   : > { %s4810_s28 = smov (!%p4184_p11), 0  }
 0x6e9 LB: >> { %v3889_v26 = vld [vmem:[%s4804_s29] sm:$0xff]  ;;  %s3891_s26 = sadd.s32 1, %s4808_s21  ;;  %s3883_s28 = sadd.s32 1, %s4812_s28   ;;  %s4812_s28 = sphi %s4810_s28, %s3883_s28   ;;  %s4808_s21 = sphi %s4806_s21, %s4807_s21   ;;  %s4804_s29 = sphi %s4802_s29, %s3896_s29   ;;  %s4800_s27 = sphi %s4798_s27, %s3897_s27  }
 0x6ea   : >> { %3890 = vst [vmem:[%s4800_s27] sm:$0xff] %v3889_v26  ;;  %p3892_p12 = scmp.ge.s32.totalorder %s3891_s26, %s6797_s30  ;;  %p3882_p0 = scmp.ge.s32.totalorder %s3883_s28, %s6797_s30 }
 0x6ec   : >> { %s7110_s26 = smov (%p3892_p12, %s3891_s26), 0  ;;  %3885 = sbr.rel (!%p3882_p0) target bundleno = 1769 (0x6e9), region = 198 }
 0x6ed   : >> { %s4185_s23 = sshll.u32 %s7110_s26, 3  ;;  %s4807_s21 = smov %s7110_s26  }
 0x6ee   : >> { %s3896_s29 = scalar_lea.vmem %s3877_s25, %s4185_s23 [#allocation7]   ;;  %s3897_s27 = scalar_lea.vmem %s3879_s17, %s4185_s23  }
 0x6f1 PF: > { %s7102_s28 = sld [smem:[#allocation11_spill]] }
 0x6f2   : > { %s7103_s26 = sld [smem:[#allocation10_spill]] }
 0x6f3   : > { %s7104_s27 = sld [smem:[#allocation12_spill]] }
 0x6f7   : > { %p28_p13 = scmp.ge.s32.totalorder %s7102_s28, 5  }
 0x6f9   :  { %30 = sbr.rel (!%p28_p13) target bundleno = 7 (0x7), region = 209 }
 0x6fe   :  { %3913 = vsyncpa [#allocation4], 1 }
 0x6ff   :  { %3915 = vsyncpa [#allocation4 + $0x1], 1 }
 0x700   :  { %3916 = vsyncpa [#allocation6], 1 }

</bundles_post_ra>
